<compile_context>
chip_gen: v7x
topology: tpu7x:2x2x1
jax: 0.10.0
libtpu: 0.0.40
codegen_flags: <defaults>
</compile_context>

<pallas_src>
import functools

import jax
import jax.numpy as jnp
from jax.experimental import pallas as pl
from jax.experimental.pallas import tpu as pltpu

IN_FEATURES = 196608   # 256 * 256 * 3, as implied by Linear(196608, 10)
OUT_FEATURES = 10

_SPLIT_SEMANTICS = {
    "core_parallel": pltpu.CORE_PARALLEL,
    "parallel": pltpu.PARALLEL,
    "arbitrary": pltpu.ARBITRARY,
}


def linear_kernel(x_ref, w_ref, b_ref, o_ref):
    """One K-tile of y_partial = x @ W.T, accumulated in the resident output block.

    x_ref: (B, tk) bf16     -- lane-dense along K
    w_ref: (N, tk) bf16     -- torch (N, K) layout, lane-dense along K
    b_ref: (1, N)  f32      -- bias, folded in at the final reduction step
    o_ref: (B, N)  f32      -- resident partial accumulator for this split
    """
    p = pl.program_id(0)
    k = pl.program_id(1)
    nk = pl.num_programs(1)

    # Contract both operands along their last (lane) dim: (B,tk) x (N,tk) -> (B,N).
    # bf16 operands, f32 accumulation.
    partial = jax.lax.dot_general(
        x_ref[...],
        w_ref[...],
        dimension_numbers=(((1,), (1,)), ((), ())),
        preferred_element_type=jnp.float32,
    )

    @pl.when(k == 0)
    def _init():
        o_ref[...] = partial

    @pl.when(k > 0)
    def _acc():
        o_ref[...] = o_ref[...] + partial

    # Fold the bias in exactly once: last reduction step of split 0.
    @pl.when(jnp.logical_and(k == nk - 1, p == 0))
    def _bias():
        o_ref[...] = o_ref[...] + b_ref[...]


@functools.partial(jax.jit, static_argnames=("tk", "num_splits", "split_mode"))
def _forward_impl(x, w_bf16, b, *, tk, num_splits, split_mode):
    """x: (B, K) f32, w_bf16: (N, K) bf16 (torch layout), b: (N,) f32 -> (B, N) f32."""
    B, K = x.shape
    N, Kw = w_bf16.shape
    assert K == Kw
    assert K % (num_splits * tk) == 0, "K must be divisible by num_splits * tk"

    nk = K // (num_splits * tk)  # reduction steps per split

    # Activations are small (~1.5 MB); casting them to bf16 keeps a single MXU
    # operand dtype and shaves a little more HBM traffic.
    x_bf16 = x.astype(jnp.bfloat16)
    b2d = b.reshape(1, N).astype(jnp.float32)

    # x and w blocks walk the K axis; block index = split * nk + k.
    x_spec = pl.BlockSpec((B, tk), lambda p, k: (0, p * nk + k))
    w_spec = pl.BlockSpec((N, tk), lambda p, k: (0, p * nk + k))
    b_spec = pl.BlockSpec((1, N), lambda p, k: (0, 0))
    # One resident (B, N) f32 accumulator per reduction split.
    out_spec = pl.BlockSpec((None, B, N), lambda p, k: (p, 0, 0))

    cost = pl.CostEstimate(
        flops=2 * B * K * N,
        transcendentals=0,
        bytes_accessed=(B * K + N * K) * 2 + (num_splits * B * N + N) * 4,
    )

    partials = pl.pallas_call(
        linear_kernel,
        out_shape=jax.ShapeDtypeStruct((num_splits, B, N), jnp.float32),
        grid_spec=pltpu.PrefetchScalarGridSpec(
            num_scalar_prefetch=0,
            grid=(num_splits, nk),
            in_specs=[x_spec, w_spec, b_spec],
            out_specs=out_spec,
        ),
        compiler_params=pltpu.CompilerParams(
            # Leading split axis is sharded across TensorCores on v7x
            # (CORE_PARALLEL); trailing axis is the K reduction.
            dimension_semantics=(_SPLIT_SEMANTICS[split_mode], pltpu.ARBITRARY),
        ),
        cost_estimate=cost,
    )(x_bf16, w_bf16, b2d)

    if num_splits == 1:
        # Bias already folded in-kernel; the pallas_call output is final.
        return partials[0]
    # Combine the per-split partial sums (tiny: num_splits x (B, N)).
    return partials.sum(axis=0)


def _split_config():
    """Pick num_splits / split-axis semantics per TPU generation.

    v7x has 2 TensorCores per chip, each with its own HBM path: split the K
    reduction in two and shard the split axis across cores.  v5e/v6e have a
    single TensorCore, where a split axis is pure overhead.
    """
    try:
        kind = jax.devices()[0].device_kind.lower()
    except Exception:
        kind = ""
    if "v7" in kind:
        return 2, "core_parallel"
    return 1, "arbitrary"


def network_forward(x, w_bf16, b, *, tk=49152):
    num_splits, split_mode = _split_config()
    if split_mode == "core_parallel":
        try:
            return _forward_impl(
                x, w_bf16, b, tk=tk, num_splits=num_splits, split_mode=split_mode
            )
        except Exception:
            # Conservative fallback if CORE_PARALLEL is rejected on this toolchain.
            return _forward_impl(
                x, w_bf16, b, tk=tk, num_splits=num_splits, split_mode="parallel"
            )
    return _forward_impl(
        x, w_bf16, b, tk=tk, num_splits=num_splits, split_mode=split_mode
    )


if __name__ == "__main__":
    key = jax.random.PRNGKey(0)
    kx, kw, kb = jax.random.split(key, 3)

    batch = 2
    # Deterministic synthetic parameters (same shapes as torch Linear(196608, 10)).
    bound = 1.0 / jnp.sqrt(jnp.float32(IN_FEATURES))
    w_f32 = jax.random.uniform(
        kw, (OUT_FEATURES, IN_FEATURES), jnp.float32, -bound, bound
    )
    b = jax.random.uniform(kb, (OUT_FEATURES,), jnp.float32, -bound, bound)
    x = jax.random.normal(kx, (batch, IN_FEATURES), jnp.float32)

    # The network stores its weight once in bf16 in HBM (halves the dominant
    # HBM stream of this bandwidth-bound GEMV).
    w_bf16 = jax.device_put(w_f32.astype(jnp.bfloat16))

    y = network_forward(x, w_bf16, b)
    y = jax.block_until_ready(y)

    # Sanity check against plain-JAX f32 reference (torch semantics: x @ W.T + b).
    # bf16 operands over a 196K-deep reduction -> loosened tolerance.
    y_ref = x @ w_f32.T + b[None, :]
    assert y.shape == (batch, OUT_FEATURES)
    assert jnp.allclose(y, y_ref, rtol=5e-2, atol=5e-2)

    print("KERNEL_OK")
</pallas_src>

<mosaic_0001>
module attributes {stable_mosaic.version = 11 : i64} {
  func.func @linear_kernel(%arg0: i32, %arg1: i32, %arg2: memref<2x49152xbf16, #tpu.memory_space<vmem>>, %arg3: memref<10x49152xbf16, #tpu.memory_space<vmem>>, %arg4: memref<1x10xf32, #tpu.memory_space<vmem>>, %arg5: memref<1x2x10xf32, #tpu.memory_space<vmem>>) attributes {dimension_semantics = [#tpu.dimension_semantics<arbitrary>, #tpu.dimension_semantics<arbitrary>], iteration_bounds = array<i64: 1, 4>, scalar_prefetch = 0 : i64, scratch_operands = 0 : i64, tpu.core_type = #tpu.core_type<tc>, window_params = [{transform_indices = @transform_0, window_bounds = array<i64: 2, 49152>}, {transform_indices = @transform_1, window_bounds = array<i64: 10, 49152>}, {pipeline_mode = #tpu.pipeline_mode<synchronous>, transform_indices = @transform_2, window_bounds = array<i64: 1, 10>}, {transform_indices = @transform_3, window_bounds = array<i64: 1, 2, 10>}]} {
    %c0 = arith.constant 0 : index
    %c0_0 = arith.constant 0 : index
    %0 = vector.load %arg2[%c0, %c0_0] : memref<2x49152xbf16, #tpu.memory_space<vmem>>, vector<2x49152xbf16>
    %c0_1 = arith.constant 0 : index
    %c0_2 = arith.constant 0 : index
    %1 = vector.load %arg3[%c0_1, %c0_2] : memref<10x49152xbf16, #tpu.memory_space<vmem>>, vector<10x49152xbf16>
    %cst = arith.constant dense<0.000000e+00> : vector<2x10xf32>
    %2 = tpu.matmul %0, %1, %cst {dimension_numbers = #tpu.dot_dimension_numbers<[1], [1], [0], [0], [0, 0, 1, 0], [], []>} : vector<2x49152xbf16>, vector<10x49152xbf16>, vector<2x10xf32> -> vector<2x10xf32>
    %c0_i32 = arith.constant 0 : i32
    %3 = arith.cmpi eq, %arg1, %c0_i32 : i32
    %4 = arith.extui %3 : i1 to i32
    %c0_i32_3 = arith.constant 0 : i32
    %5 = arith.cmpi ne, %4, %c0_i32_3 : i32
    scf.if %5 {
      %c0_8 = arith.constant 0 : index
      %c0_9 = arith.constant 0 : index
      %c0_10 = arith.constant 0 : index
      %14 = vector.load %arg5[%c0_8, %c0_9, %c0_10] : memref<1x2x10xf32, #tpu.memory_space<vmem>>, vector<1x2x10xf32>
      %15 = vector.shape_cast %14 : vector<1x2x10xf32> to vector<2x10xf32>
      %16 = vector.shape_cast %2 : vector<2x10xf32> to vector<1x2x10xf32>
      tpu.vector_store %arg5[%c0_8, %c0_9, %c0_10], %16 {strides = array<i32>} : memref<1x2x10xf32, #tpu.memory_space<vmem>>, vector<1x2x10xf32>,
    } else {
    }
    %c0_i32_4 = arith.constant 0 : i32
    %6 = arith.cmpi sgt, %arg1, %c0_i32_4 : i32
    %7 = arith.extui %6 : i1 to i32
    %c0_i32_5 = arith.constant 0 : i32
    %8 = arith.cmpi ne, %7, %c0_i32_5 : i32
    scf.if %8 {
      %c0_8 = arith.constant 0 : index
      %c0_9 = arith.constant 0 : index
      %c0_10 = arith.constant 0 : index
      %14 = vector.load %arg5[%c0_8, %c0_9, %c0_10] : memref<1x2x10xf32, #tpu.memory_space<vmem>>, vector<1x2x10xf32>
      %15 = vector.shape_cast %14 : vector<1x2x10xf32> to vector<2x10xf32>
      %16 = arith.addf %15, %2 : vector<2x10xf32>
      %c0_11 = arith.constant 0 : index
      %c0_12 = arith.constant 0 : index
      %c0_13 = arith.constant 0 : index
      %17 = vector.load %arg5[%c0_11, %c0_12, %c0_13] : memref<1x2x10xf32, #tpu.memory_space<vmem>>, vector<1x2x10xf32>
      %18 = vector.shape_cast %17 : vector<1x2x10xf32> to vector<2x10xf32>
      %19 = vector.shape_cast %16 : vector<2x10xf32> to vector<1x2x10xf32>
      tpu.vector_store %arg5[%c0_11, %c0_12, %c0_13], %19 {strides = array<i32>} : memref<1x2x10xf32, #tpu.memory_space<vmem>>, vector<1x2x10xf32>,
    } else {
    }
    %c3_i32 = arith.constant 3 : i32
    %9 = arith.cmpi eq, %arg1, %c3_i32 : i32
    %c0_i32_6 = arith.constant 0 : i32
    %10 = arith.cmpi eq, %arg0, %c0_i32_6 : i32
    %11 = arith.andi %9, %10 : i1
    %12 = arith.extui %11 : i1 to i32
    %c0_i32_7 = arith.constant 0 : i32
    %13 = arith.cmpi ne, %12, %c0_i32_7 : i32
    scf.if %13 {
      %c0_8 = arith.constant 0 : index
      %c0_9 = arith.constant 0 : index
      %c0_10 = arith.constant 0 : index
      %14 = vector.load %arg5[%c0_8, %c0_9, %c0_10] : memref<1x2x10xf32, #tpu.memory_space<vmem>>, vector<1x2x10xf32>
      %15 = vector.shape_cast %14 : vector<1x2x10xf32> to vector<2x10xf32>
      %c0_11 = arith.constant 0 : index
      %c0_12 = arith.constant 0 : index
      %16 = vector.load %arg4[%c0_11, %c0_12] : memref<1x10xf32, #tpu.memory_space<vmem>>, vector<1x10xf32>
      %17 = vector.broadcast %16 : vector<1x10xf32> to vector<2x10xf32>
      %18 = arith.addf %15, %17 : vector<2x10xf32>
      %c0_13 = arith.constant 0 : index
      %c0_14 = arith.constant 0 : index
      %c0_15 = arith.constant 0 : index
      %19 = vector.load %arg5[%c0_13, %c0_14, %c0_15] : memref<1x2x10xf32, #tpu.memory_space<vmem>>, vector<1x2x10xf32>
      %20 = vector.shape_cast %19 : vector<1x2x10xf32> to vector<2x10xf32>
      %21 = vector.shape_cast %18 : vector<2x10xf32> to vector<1x2x10xf32>
      tpu.vector_store %arg5[%c0_13, %c0_14, %c0_15], %21 {strides = array<i32>} : memref<1x2x10xf32, #tpu.memory_space<vmem>>, vector<1x2x10xf32>,
    } else {
    }
    return
  }
  func.func @transform_0(%arg0: i32, %arg1: i32) -> (i32, i32) {
    %c4_i32 = arith.constant 4 : i32
    %0 = arith.muli %arg0, %c4_i32 : i32
    %1 = arith.addi %0, %arg1 : i32
    %c0_i32 = arith.constant 0 : i32
    %c0_i32_0 = arith.constant 0 : i32
    return %c0_i32, %1 : i32, i32
  }
  func.func @transform_1(%arg0: i32, %arg1: i32) -> (i32, i32) {
    %c4_i32 = arith.constant 4 : i32
    %0 = arith.muli %arg0, %c4_i32 : i32
    %1 = arith.addi %0, %arg1 : i32
    %c0_i32 = arith.constant 0 : i32
    %c0_i32_0 = arith.constant 0 : i32
    return %c0_i32, %1 : i32, i32
  }
  func.func @transform_2(%arg0: i32, %arg1: i32) -> (i32, i32) {
    %c0_i32 = arith.constant 0 : i32
    %c0_i32_0 = arith.constant 0 : i32
    %c0_i32_1 = arith.constant 0 : i32
    return %c0_i32, %c0_i32_0 : i32, i32
  }
  func.func @transform_3(%arg0: i32, %arg1: i32) -> (i32, i32, i32) {
    %c0_i32 = arith.constant 0 : i32
    %c0_i32_0 = arith.constant 0 : i32
    %c0_i32_1 = arith.constant 0 : i32
    return %arg0, %c0_i32, %c0_i32_0 : i32, i32, i32
  }
}

</mosaic_0001>

<bundles_post_ra>
// kernel: _forward_impl.1
= control target key start
LH: loop header
LB: loop body
LE: loop exit
PB: predicated region body
PF: predicated region fallthrough
CT: control target
= control target key end

     0   :  { %8 = vsyncpa [#allocation3], 0  ;;  %s15570_s0 = inlined_call_operand.vmem [shape: bf16[2,196608], index: 0, kind: input, shape index: {}]   ;;  %s15571_s1 = inlined_call_operand.hbm [shape: bf16[10,196608], index: 1, kind: input, shape index: {}]   ;;  %s15572_s2 = inlined_call_operand.hbm [shape: f32[1,10], index: 2, kind: input, shape index: {}]   ;;  %s15573_s3 = inlined_call_operand.hbm [shape: f32[1,2,10], index: 3, kind: output, shape index: {}]  }
   0x1   :  { %10 = vsyncpa [#allocation3 + $0x1], 0 }
   0x2   :  { %11 = vsyncpa [#allocation6], 0 }
   0x3   :  { %12 = vsyncpa [#allocation4], 0  ;;  %s14648_s12 = smov 0   ;;  %s14650_s13 = smov 0  }
   0x4   :  { %s14652_s14 = smov 0   ;;  %s14654_s15 = smov 0  }
   0x5   :  { %s14656_s16 = smov 0   ;;  %s14658_s17 = smov 0  }
   0x6 LB: > { %s13188_s18 = sadd.s32 4294967295, %s14619_s17   ;;  %s71_s19 = sadd.s32 1, %s14607_s14  ;;  %s14619_s17 = sphi %s14658_s17, %s18_s17   ;;  %s14615_s16 = sphi %s14656_s16, %s15594_s16   ;;  %s14611_s15 = sphi %s14654_s15, %s15593_s15   ;;  %s14607_s14 = sphi %s14652_s14, %s15592_s14   ;;  %s14603_s13 = sphi %s14650_s13, %s15591_s13   ;;  %s14599_s12 = sphi %s14648_s12, %s15590_s12  }
   0x7   : > { %p78_p0 = scmp.ne.s32.totalorder %s14607_s14, %s14603_s13  ;;  %p79_p1 = scmp.eq.s32.totalorder %s14619_s17, 0 }
   0x8   : > { %p84_p2 = scmp.ne.s32.totalorder %s14603_s13, %s14599_s12  ;;  %p14684_p3 = scmp.eq.s32.totalorder %s13188_s18, 0 }
   0x9   : > { %p80_p4 = por %p79_p1, %p78_p0  ;;  %p13189_p5 = scmp.ge.s32.totalorder %s14619_s17, 1 }
   0xa   : > { %s15579_s20 = scalar_select %p14684_p3, 1, 0 }
   0xb   : > { %p14691_p6 = por %p14684_p3, %p84_p2  ;;  %p142_p7 = scmp.lt.s32.totalorder %s14619_s17, 5 }
   0xc   : > { %s14621_s23 = smov [#allocation5]   ;;  %p14371_p10 = scmp.lt.s32.totalorder %s14619_s17, 4 }
   0xd   : > { %s15580_s21 = scalar_select %p14691_p6, 1, 0 }
   0xe   : > { %p14696_p8 = pnand %p13189_p5, %p142_p7  ;;  %s155_s24 = sshll.u32 %s14621_s23, 4  ;;  %s156_s24 = int_to_ptr.vmem [resolvable:$true] %s155_s24 }
   0xf   : > { %s178_s25 = sand.u32 1, %s14607_s14   ;;  %p14710_p12 = pnand %p14371_p10, %p80_p4 }
  0x10   : > { %s15581_s22 = scalar_select %p14696_p8, 1, 0 }
  0x11   : > { %p14362_p9 = pneg %p14696_p8  ;;  %s14477_s30 = scalar_lea.hbm %s15572_s2, 16 }
  0x12   : > { %s15583_s27 = scalar_select %p14710_p12, 1, 0 }
  0x13   : > { %p14706_p11 = pnand %p14362_p9, %p14684_p3  ;;  %p14478_p13 = scmp.ne.s32.totalorder %s15572_s2, %s14477_s30 }
  0x14   : > { %p14484_p5 = scmp.lt.u32.totalorder %s14477_s30, %s15572_s2 }
  0x15   : > { %p14479_p0 = pneg %p14706_p11 }
  0x17   : > { %p14480_p1 = pnand %p14479_p0, %p14478_p13 }
  0x19   : > { %p14481_p2 = pneg %p14480_p1 }
  0x1b   : > { %p14486_p4 = pnand %p14484_p5, %p14481_p2 }
  0x1d   : > { %14489 = shalt.err (!%p14486_p4)
}
  0x1e   : > { %s14490_s8 = scalar_lea.vmem %s156_s24, 16  ;;  %s14497_s9 = scalar_lea.vmem %s156_s24, 32 }
  0x1f   : > { %p14491_p7 = scmp.ne.s32.totalorder %s156_s24, %s14490_s8  ;;  %p14498_p3 = scmp.lt.s32.totalorder %s156_s24, %s156_s24 }
  0x20   : > { %p14499_p6 = scmp.lt.s32.totalorder %s14497_s9, %s14490_s8 }
  0x21   : > { %p14493_p9 = pnand %p14491_p7, %p14479_p0 }
  0x22   : > { %p14500_p8 = por %p14499_p6, %p14498_p3 }
  0x23   : > { %p14494_p10 = pneg %p14493_p9 }
  0x25   : > { %p14501_p12 = pnand %p14500_p8, %p14494_p10 }
  0x27   : > { %14504 = shalt.err (!%p14501_p12)
}
  0x28   : > { %14365 = dma.hbm_to_vmem [thread:$0]  (!%p14706_p11), %s15572_s2, 16, %s156_s24, [#allocation6]  }
  0x29   : > { %s27_s12 = sadd.s32 1, %s14615_s16  ;;  %s14350_s23 = smul.u32 3072, %s178_s25 }
  0x2a   : > { %p28_p3 = scmp.ge.s32.totalorder %s27_s12, 4  ;;  %s13587_s28 = smul.u32 24576, %s14615_s16 }
  0x2b   : > { %s182_s4 = scalar_lea.vmem [#allocation2], %s14350_s23  ;;  %s14752_s7 = scalar_lea.sflag [#allocation3], %s178_s25 }
  0x2c   : > { %s15596_s12 = smov (%p28_p3, %s27_s12), 0  ;;  %s14739_s30 = scalar_lea.hbm %s15571_s1, %s13587_s28 }
  0x2d   : > { %s191_s24 = sshll.u32 %s182_s4, 4  ;;  %s68_s5 = ssub.s32 %s14615_s16, %s15596_s12  ;;  %s14743_s24 = int_to_ptr.vmem [resolvable:$true] %s191_s24 }
  0x2e   : > { %p69_p6 = scmp.eq.s32.totalorder %s68_s5, 0  ;;  %s14505_s8 = scalar_lea.hbm %s14739_s30, 49152 }
  0x2f   : > { %p14506_p8 = scmp.ne.s32.totalorder %s14739_s30, %s14505_s8  ;;  %p15584_p11 = scmp.ne.s32.totalorder %s15583_s27, 0 }
  0x30   : > { %s14748_s6 = scalar_select %p69_p6, %s14607_s14, %s71_s19  }
  0x31   : > { %p14507_p12 = pneg %p15584_p11  ;;  %s14510_s11 = scalar_lea.hbm %s15571_s1, 196608 }
  0x32   : > { %p14511_p1 = scmp.lt.u32.totalorder %s14739_s30, %s15571_s1  ;;  %p14512_p2 = scmp.lt.u32.totalorder %s14510_s11, %s14505_s8 }
  0x33   : > { %p14508_p13 = pnand %p14507_p12, %p14506_p8  ;;  %p14514_p4 = scmp.lt.u32.totalorder %s14505_s8, %s14739_s30 }
  0x34   : > { %p14513_p5 = por %p14512_p2, %p14511_p1 }
  0x35   : > { %p14509_p0 = pneg %p14508_p13 }
  0x36   : > { %p14515_p7 = por %p14514_p4, %p14513_p5 }
  0x38   : > { %p14516_p9 = pnand %p14515_p7, %p14509_p0 }
  0x3a   : > { %14519 = shalt.err (!%p14516_p9)
}
  0x3b   : > { %s14520_s19 = scalar_lea.vmem %s14743_s24, 49152  ;;  %s14622_s25 = smov [#allocation2]  }
  0x3c   : > { %p14521_p10 = scmp.ne.s32.totalorder %s14743_s24, %s14520_s19  ;;  %s14525_s26 = sshll.u32 %s14622_s25, 4  ;;  %s14526_s26 = int_to_ptr.vmem [resolvable:$false] %s14525_s26 }
  0x3d   : > { %s14527_s29 = scalar_lea.vmem %s14526_s26, 98304  ;;  %p14528_p8 = scmp.lt.s32.totalorder %s14743_s24, %s14526_s26 }
  0x3e   : > { %p14523_p3 = pnand %p14521_p10, %p14507_p12  ;;  %p14529_p13 = scmp.lt.s32.totalorder %s14527_s29, %s14520_s19 }
  0x40   : > { %p14524_p6 = pneg %p14523_p3  ;;  %p14530_p1 = por %p14529_p13, %p14528_p8 }
  0x42   : > { %p14531_p2 = pnand %p14530_p1, %p14524_p6 }
  0x44   : > { %14534 = shalt.err (!%p14531_p2)
}
  0x45   : > { %s14623_s4 = smov 98304   ;;  %s14624_s5 = smov 24576  }
  0x46   : > { %s14625_s8 = smov 1536   ;;  %p15585_p12 = scmp.ne.s32.totalorder %s15581_s22, 0 }
  0x47   : > { %14369 = dma.hbm_to_vmem [thread:$0]  (!%p15584_p11), %s14739_s30, 49152, %s14743_s24, %s14752_s7, %s14623_s4, %s14624_s5, %s14625_s8  }
  0x48   : > { %203 = sbr.rel (%p15585_p12) target bundleno = 1498 (0x5da), region = 32  ;;  %s205_s9 = sand.u32 (!%p15585_p12), 1, %s14603_s13  }
  0x49   : > { %s14351_s10 = smul.u32 (!%p15585_p12), 3072, %s205_s9  ;;  %s206_s11 = scalar_lea.sflag (!%p15585_p12), [#allocation3], %s205_s9 }
  0x4a   : > { %p15586_p0 = scmp.ne.s32.totalorder (!%p15585_p12), %s15580_s21, 0 }
  0x4b   : > { %s14783_s23 = scalar_lea.vmem (!%p15585_p12), [#allocation2], %s14351_s10 }
  0x4f   : > { %14586 = dma.done.wait (%p15586_p0), %s206_s11, 49152  }
  0x50   : > { %14588 = vsyncadd (%p15586_p0), %s206_s11, 4294918144  ;;  %p15587_p5 = scmp.ne.s32.totalorder %s15579_s20, 0 }
  0x52   : > { %14590 = dma.done.wait (%p15587_p5), [#allocation6], 16  }
  0x53   : > { %14592 = vsyncadd (%p15587_p5), [#allocation6], 4294967280  ;;  %s239_s22 = smul.u32 384, %s14611_s15  ;;  %v734_v0 = vlaneseq  ;;  %v14626_v1 = vmov 1966171168   ;;  %v298_v6 = vld [vmem:[%s14783_s23] sm:$0xff] }
  0x54   : > { %v732_v2 = vunpack.c.l.s4 %v14626_v1  ;;  %v490_v7 = vld [vmem:[%s14783_s23 + $0x600] sm:$0x11]  ;;  %v299_v17 = vld [vmem:[%s14783_s23 + $0x8] sm:$0xff]  ;;  %v300_v29 = vld [vmem:[%s14783_s23 + $0x10] sm:$0xff]  ;;  %p13579_p4 = scmp.ne.s32.totalorder %s14611_s15, 0 }
  0x55   : > { %p240_p11 = scmp.lt.s32.totalorder %s239_s22, 1535  ;;  %v735_v3 = vshrl.u32 %v734_v0, 7  ;;  %v394_v8 = vld [vmem:[%s14783_s23 + $0x300] sm:$0xff]  ;;  %v13196_v9 = vcombine.high %v298_v6, %v490_v7  ;;  %v13195_v11 = vcombine.low %v298_v6, %v490_v7  ;;  %v491_v18 = vld [vmem:[%s14783_s23 + $0x608] sm:$0x11]  ;;  %v396_v33 = vld [vmem:[%s14783_s23 + $0x310] sm:$0xff] }
  0x56   : > { %v733_v4 = vunpack.c.0.s8 %v732_v2  ;;  %v586_v10 = vld [vmem:[%s14783_s23 + $0x900] sm:$0x11]  ;;  %v395_v19 = vld [vmem:[%s14783_s23 + $0x308] sm:$0xff]  ;;  %v13198_v21 = vcombine.high %v299_v17, %v491_v18  ;;  %v492_v30 = vld [vmem:[%s14783_s23 + $0x610] sm:$0x11]  ;;  %v13197_v31 = vcombine.low %v299_v17, %v491_v18  ;;  %vm13070_vm0 = vcmask (!%p13579_p4), 74752  }
  0x57   : > { %s15598_s22 = smov (!%p240_p11, %s239_s22), 1535  ;;  %v13388_v14 = vcombine.high %v394_v8, %v586_v10  ;;  %v13387_v15 = vcombine.low %v394_v8, %v586_v10  ;;  %5386 = vmatprep.subr.bf16.mxu1 %v13196_v9  ;;  %v587_v22 = vld [vmem:[%s14783_s23 + $0x908] sm:$0x11]  ;;  %v588_v34 = vld [vmem:[%s14783_s23 + $0x910] sm:$0x11]  ;;  %v13200_v40 = vcombine.high %v300_v29, %v492_v30  ;;  %v301_v47 = vld [vmem:[%s14783_s23 + $0x18] sm:$0xff]  ;;  %v13199_v50 = vcombine.low %v300_v29, %v492_v30 }
  0x58   : > { %v14794_v5 = vsub.s32 %v733_v4, %v735_v3  ;;  %s14799_s27 = scalar_lea.vmem %s15570_s0, %s15598_s22  ;;  %5387 = vmatpush1.bf16.xpose.msra.mxu1 %v13195_v11  ;;  %v13390_v25 = vcombine.high %v395_v19, %v587_v22  ;;  %v13389_v37 = vcombine.low %v395_v19, %v587_v22  ;;  %v13392_v41 = vcombine.high %v396_v33, %v588_v34  ;;  %v493_v48 = vld [vmem:[%s14783_s23 + $0x618] sm:$0x11]  ;;  %v302_v59 = vld [vmem:[%s14783_s23 + $0x20] sm:$0xff]  ;;  %v399_v18 = vld [vmem:[%s14783_s23 + $0x328] sm:$0xff] }
  0x59   : > { %v250_v12 = vld [vmem:[%s14799_s27] sm:$0xff]  ;;  %9226 = vmatprep.subr.bf16.mxu0 %v13388_v14  ;;  %5426 = vmatprep.subr.bf16.mxu1 %v13198_v21  ;;  %v397_v51 = vld [vmem:[%s14783_s23 + $0x318] sm:$0xff]  ;;  %v13391_v53 = vcombine.low %v396_v33, %v588_v34  ;;  %v13202_v56 = vcombine.high %v301_v47, %v493_v48  ;;  %v13201_v61 = vcombine.low %v301_v47, %v493_v48  ;;  %v251_v6 = vld [vmem:[%s14799_s27 + $0x8] sm:$0xff] }
  0x5a   : > { %v274_v13 = vld [vmem:[%s14799_s27 + $0xc0] sm:$0xff]  ;;  %v737_v16 = vrot.slane %v250_v12, %v14794_v5  ;;  %9227 = vmatpush1.bf16.xpose.msra.mxu0 %v13387_v15  ;;  %v730_v35 = vcombine.high %v250_v12, %v250_v12  ;;  %v589_v52 = vld [vmem:[%s14783_s23 + $0x918] sm:$0x11]  ;;  %v275_v8 = vld [vmem:[%s14799_s27 + $0xc8] sm:$0xff]  ;;  %v786_v9 = vrot.slane %v251_v6, %v14794_v5  ;;  %v779_v34 = vcombine.high %v251_v6, %v251_v6 }
  0x5b   : > { %v1913_v20 = vrot.slane %v274_v13, %v14794_v5  ;;  %9266 = vmatprep.subr.bf16.mxu0 %v13390_v25  ;;  %v1906_v38 = vcombine.high %v274_v13, %v274_v13  ;;  %v13394_v57 = vcombine.high %v397_v51, %v589_v52  ;;  %v494_v60 = vld [vmem:[%s14783_s23 + $0x620] sm:$0x11]  ;;  %v13393_v1 = vcombine.low %v397_v51, %v589_v52  ;;  %v303_v14 = vld [vmem:[%s14783_s23 + $0x28] sm:$0xff]  ;;  %v400_v30 = vld [vmem:[%s14783_s23 + $0x330] sm:$0xff] }
  0x5c   : > { %v745_v23 = vcombine.high %v737_v16, %v737_v16  ;;  %v753_v28 = vrot.slane %v737_v16, %v14794_v5  ;;  %v744_v42 = vrot.slane %v730_v35, %v14794_v5  ;;  %v398_v63 = vld [vmem:[%s14783_s23 + $0x320] sm:$0xff]  ;;  %v13204_v4 = vcombine.high %v302_v59, %v494_v60  ;;  %v495_v15 = vld [vmem:[%s14783_s23 + $0x628] sm:$0x11]  ;;  %v401_v48 = vld [vmem:[%s14783_s23 + $0x338] sm:$0xff] }
  0x5d   : > { %v1921_v24 = vcombine.high %v1913_v20, %v1913_v20  ;;  %v1929_v32 = vrot.slane %v1913_v20, %v14794_v5  ;;  %v1920_v43 = vrot.slane %v1906_v38, %v14794_v5  ;;  %v590_v0 = vld [vmem:[%s14783_s23 + $0x920] sm:$0x11]  ;;  %v1962_v10 = vrot.slane %v275_v8, %v14794_v5  ;;  %v591_v19 = vld [vmem:[%s14783_s23 + $0x928] sm:$0x11] }
  0x5e   : > { %v767_v26 = vrot.slane %v745_v23, %v14794_v5  ;;  %v746_v44 = vcombine.high %v744_v42, %v744_v42  ;;  %v775_v46 = vcombine.high %v753_v28, %v753_v28  ;;  %v760_v58 = vrot.slane %v744_v42, %v14794_v5 }
  0x5f   : > { %v1943_v27 = vrot.slane %v1921_v24, %v14794_v5  ;;  %v1922_v45 = vcombine.high %v1920_v43, %v1920_v43  ;;  %v1951_v49 = vcombine.high %v1929_v32, %v1929_v32  ;;  %v1936_v62 = vrot.slane %v1920_v43, %v14794_v5 }
  0x60   : > { %5418 = vmatprep.mubr.bf16.mxu1 %v767_v26  ;;  %v777_v36 = vcombine.high %v767_v26, %v767_v26  ;;  %v774_v54 = vrot.slane %v746_v44, %v14794_v5  ;;  %v13396_v7 = vcombine.high %v398_v63, %v590_v0  ;;  %v794_v11 = vcombine.high %v786_v9, %v786_v9  ;;  %v304_v26 = vld [vmem:[%s14783_s23 + $0x30] sm:$0xff]  ;;  %v305_v44 = vld [vmem:[%s14783_s23 + $0x38] sm:$0xff] }
  0x61   : > { %9258 = vmatprep.mubr.bf16.mxu0 %v1943_v27  ;;  %v1953_v39 = vcombine.high %v1943_v27, %v1943_v27  ;;  %5419 = vmatmul.mubr.bf16.vlgmr.msra.gmra.mrb[0].mxu1 %v753_v28  ;;  %v1950_v55 = vrot.slane %v1922_v45, %v14794_v5  ;;  %v1970_v12 = vcombine.high %v1962_v10, %v1962_v10  ;;  %v496_v27 = vld [vmem:[%s14783_s23 + $0x630] sm:$0x11]  ;;  %v497_v45 = vld [vmem:[%s14783_s23 + $0x638] sm:$0x11] }
  0x62   : > { %9259 = vmatmul.mubr.bf16.vlgmr.msra.gmra.mrb[0].mxu0 %v1929_v32  ;;  %5427 = vmatpush1.bf16.xpose.msra.mxu1 %v13197_v31  ;;  %v778_v2 = vcombine.high %v774_v54, %v774_v54  ;;  %v776_v13 = vcombine.high %v760_v58, %v760_v58  ;;  %v13203_v16 = vcombine.low %v302_v59, %v494_v60  ;;  %v592_v31 = vld [vmem:[%s14783_s23 + $0x930] sm:$0x11]  ;;  %v402_v60 = vld [vmem:[%s14783_s23 + $0x340] sm:$0xff] }
  0x63   : > { %9267 = vmatpush1.bf16.xpose.msra.mxu0 %v13389_v37  ;;  %5458 = vmatprep.mubr.bf16.mxu1 %v777_v36  ;;  %v1954_v3 = vcombine.high %v1950_v55, %v1950_v55  ;;  %v1952_v17 = vcombine.high %v1936_v62, %v1936_v62  ;;  %v13395_v20 = vcombine.low %v398_v63, %v590_v0 }
  0x64   : > { %9298 = vmatprep.mubr.bf16.mxu0 %v1953_v39  ;;  %5466 = vmatprep.subr.bf16.mxu1 %v13200_v40  ;;  %v816_v21 = vrot.slane %v794_v11, %v14794_v5  ;;  %v1992_v22 = vrot.slane %v1970_v12, %v14794_v5  ;;  %v13206_v23 = vcombine.high %v303_v14, %v495_v15  ;;  %v307_v11 = vld [vmem:[%s14783_s23 + $0x48] sm:$0xff] }
  0x65   : > { %9306 = vmatprep.subr.bf16.mxu0 %v13392_v41  ;;  %v13398_v24 = vcombine.high %v399_v18, %v591_v19  ;;  %v802_v25 = vrot.slane %v786_v9, %v14794_v5  ;;  %v13205_v28 = vcombine.low %v303_v14, %v495_v15  ;;  %v1978_v29 = vrot.slane %v1962_v10, %v14794_v5  ;;  %v499_v12 = vld [vmem:[%s14783_s23 + $0x648] sm:$0x11] }
  0x66   : > { %v13397_v32 = vcombine.low %v399_v18, %v591_v19  ;;  %v826_v33 = vcombine.high %v816_v21, %v816_v21  ;;  %v2002_v35 = vcombine.high %v1992_v22, %v1992_v22  ;;  %v13208_v36 = vcombine.high %v304_v26, %v496_v27  ;;  %v403_v15 = vld [vmem:[%s14783_s23 + $0x348] sm:$0xff] }
  0x67   : > { %v1955_v37 = vcombine.high %v275_v8, %v275_v8  ;;  %v13400_v38 = vcombine.high %v400_v30, %v592_v31  ;;  %v793_v39 = vrot.slane %v779_v34, %v14794_v5  ;;  %v824_v43 = vcombine.high %v802_v25, %v802_v25 }
  0x68   : > { %v2000_v47 = vcombine.high %v1978_v29, %v1978_v29 }
  0x69   : > { %v1969_v40 = vrot.slane %v1955_v37, %v14794_v5  ;;  %v795_v41 = vcombine.high %v793_v39, %v793_v39 }
  0x6b   : > { %v1971_v42 = vcombine.high %v1969_v40, %v1969_v40  ;;  %v823_v51 = vrot.slane %v795_v41, %v14794_v5  ;;  %v1985_v59 = vrot.slane %v1969_v40, %v14794_v5  ;;  %v309_v41 = vld [vmem:[%s14783_s23 + $0x58] sm:$0xff] }
  0x6d   : > { %5459 = vmatmul.mubr.bf16.vlgmr.msra.gmra.mrb[0].mxu1 %v775_v46  ;;  %v13207_v46 = vcombine.low %v304_v26, %v496_v27  ;;  %v1999_v52 = vrot.slane %v1971_v42, %v14794_v5  ;;  %v827_v63 = vcombine.high %v823_v51, %v823_v51  ;;  %v2001_v14 = vcombine.high %v1985_v59, %v1985_v59  ;;  %v404_v27 = vld [vmem:[%s14783_s23 + $0x350] sm:$0xff]  ;;  %v501_v42 = vld [vmem:[%s14783_s23 + $0x658] sm:$0x11] }
  0x6e   : > { %9299 = vmatmul.mubr.bf16.vlgmr.msra.gmra.mrb[0].mxu0 %v1951_v49  ;;  %5467 = vmatpush1.bf16.xpose.msra.mxu1 %v13199_v50  ;;  %v593_v49 = vld [vmem:[%s14783_s23 + $0x938] sm:$0x11]  ;;  %v13399_v50 = vcombine.low %v400_v30, %v592_v31 }
  0x6f   : > { %9307 = vmatpush1.bf16.xpose.msra.mxu0 %v13391_v53  ;;  %5498 = vmatprep.mubr.bf16.mxu1 %v774_v54  ;;  %v13210_v53 = vcombine.high %v305_v44, %v497_v45  ;;  %v13402_v54 = vcombine.high %v401_v48, %v593_v49  ;;  %v2003_v0 = vcombine.high %v1999_v52, %v1999_v52 }
  0x70   : > { %9338 = vmatprep.mubr.bf16.mxu0 %v1950_v55  ;;  %5506 = vmatprep.subr.bf16.mxu1 %v13202_v56  ;;  %v809_v55 = vrot.slane %v793_v39, %v14794_v5  ;;  %v306_v56 = vld [vmem:[%s14783_s23 + $0x40] sm:$0xff] }
  0x71   : > { %9346 = vmatprep.subr.bf16.mxu0 %v13394_v57  ;;  %v498_v57 = vld [vmem:[%s14783_s23 + $0x640] sm:$0x11] }
  0x72   : > { %v825_v10 = vcombine.high %v809_v55, %v809_v55 }
  0x79   : > { %5499 = vmatmul.mubr.bf16.vlgmr.msra.gmra.mrb[0].mxu1 %v760_v58  ;;  %v13209_v58 = vcombine.low %v305_v44, %v497_v45  ;;  %v405_v45 = vld [vmem:[%s14783_s23 + $0x358] sm:$0xff] }
  0x7a   : > { %9339 = vmatmul.mubr.bf16.vlgmr.msra.gmra.mrb[0].mxu0 %v1936_v62  ;;  %5507 = vmatpush1.bf16.xpose.msra.mxu1 %v13201_v61  ;;  %v594_v61 = vld [vmem:[%s14783_s23 + $0x940] sm:$0x11]  ;;  %v13401_v62 = vcombine.low %v401_v48, %v593_v49 }
  0x7b   : > { %9347 = vmatpush1.bf16.xpose.msra.mxu0 %v13393_v1  ;;  %5538 = vmatprep.mubr.bf16.mxu1 %v778_v2  ;;  %v13212_v1 = vcombine.high %v306_v56, %v498_v57  ;;  %v252_v2 = vld [vmem:[%s14799_s27 + $0x10] sm:$0xff] }
  0x7c   : > { %9378 = vmatprep.mubr.bf16.mxu0 %v1954_v3  ;;  %5546 = vmatprep.subr.bf16.mxu1 %v13204_v4  ;;  %v13404_v3 = vcombine.high %v402_v60, %v594_v61  ;;  %v276_v4 = vld [vmem:[%s14799_s27 + $0xd0] sm:$0xff]  ;;  %v835_v6 = vrot.slane %v252_v2, %v14794_v5  ;;  %v828_v31 = vcombine.high %v252_v2, %v252_v2 }
  0x7d   : > { %9386 = vmatprep.subr.bf16.mxu0 %v13396_v7  ;;  %v2011_v7 = vrot.slane %v276_v4, %v14794_v5  ;;  %v2004_v34 = vcombine.high %v276_v4, %v276_v4 }
  0x7e   : > { %v843_v8 = vcombine.high %v835_v6, %v835_v6 }
  0x7f   : > { %v2019_v9 = vcombine.high %v2011_v7, %v2011_v7  ;;  %v2027_v26 = vrot.slane %v2011_v7, %v14794_v5  ;;  %v2018_v37 = vrot.slane %v2004_v34, %v14794_v5 }
  0x80   : > { %v865_v18 = vrot.slane %v843_v8, %v14794_v5  ;;  %v311_v8 = vld [vmem:[%s14783_s23 + $0x68] sm:$0xff] }
  0x81   : > { %v2041_v19 = vrot.slane %v2019_v9, %v14794_v5  ;;  %v2020_v39 = vcombine.high %v2018_v37, %v2018_v37  ;;  %v2049_v44 = vcombine.high %v2027_v26, %v2027_v26  ;;  %v503_v9 = vld [vmem:[%s14783_s23 + $0x668] sm:$0x11] }
  0x82   : > { %v875_v30 = vcombine.high %v865_v18, %v865_v18 }
  0x83   : > { %v2048_v49 = vrot.slane %v2020_v39, %v14794_v5  ;;  %v505_v39 = vld [vmem:[%s14783_s23 + $0x678] sm:$0x11] }
  0x85   : > { %5539 = vmatmul.mubr.bf16.vlgmr.msra.gmra.mrb[0].mxu1 %v776_v13  ;;  %v13211_v13 = vcombine.low %v306_v56, %v498_v57  ;;  %v2034_v56 = vrot.slane %v2018_v37, %v14794_v5  ;;  %v406_v57 = vld [vmem:[%s14783_s23 + $0x360] sm:$0xff] }
  0x86   : > { %9379 = vmatmul.mubr.bf16.vlgmr.msra.gmra.mrb[0].mxu0 %v1952_v17  ;;  %5547 = vmatpush1.bf16.xpose.msra.mxu1 %v13203_v16  ;;  %v595_v16 = vld [vmem:[%s14783_s23 + $0x948] sm:$0x11]  ;;  %v13403_v17 = vcombine.low %v402_v60, %v594_v61  ;;  %v2052_v61 = vcombine.high %v2048_v49, %v2048_v49 }
  0x87   : > { %9387 = vmatpush1.bf16.xpose.msra.mxu0 %v13395_v20  ;;  %5578 = vmatprep.mubr.bf16.mxu1 %v816_v21  ;;  %v13214_v20 = vcombine.high %v307_v11, %v499_v12  ;;  %v13406_v21 = vcombine.high %v403_v15, %v595_v16 }
  0x88   : > { %9418 = vmatprep.mubr.bf16.mxu0 %v1992_v22  ;;  %5586 = vmatprep.subr.bf16.mxu1 %v13206_v23  ;;  %v851_v22 = vrot.slane %v835_v6, %v14794_v5  ;;  %v308_v23 = vld [vmem:[%s14783_s23 + $0x50] sm:$0xff] }
  0x89   : > { %9426 = vmatprep.subr.bf16.mxu0 %v13398_v24  ;;  %v500_v24 = vld [vmem:[%s14783_s23 + $0x650] sm:$0x11] }
  0x8a   : > { %v873_v40 = vcombine.high %v851_v22, %v851_v22 }
  0x91   : > { %5579 = vmatmul.mubr.bf16.vlgmr.msra.gmra.mrb[0].mxu1 %v802_v25  ;;  %v13213_v25 = vcombine.low %v307_v11, %v499_v12  ;;  %v2050_v11 = vcombine.high %v2034_v56, %v2034_v56  ;;  %v407_v12 = vld [vmem:[%s14783_s23 + $0x368] sm:$0xff] }
  0x92   : > { %9419 = vmatmul.mubr.bf16.vlgmr.msra.gmra.mrb[0].mxu0 %v1978_v29  ;;  %5587 = vmatpush1.bf16.xpose.msra.mxu1 %v13205_v28  ;;  %v596_v28 = vld [vmem:[%s14783_s23 + $0x950] sm:$0x11]  ;;  %v13405_v29 = vcombine.low %v403_v15, %v595_v16 }
  0x93   : > { %9427 = vmatpush1.bf16.xpose.msra.mxu0 %v13397_v32  ;;  %5618 = vmatprep.mubr.bf16.mxu1 %v826_v33  ;;  %v2051_v32 = vcombine.high %v2041_v19, %v2041_v19  ;;  %v13216_v33 = vcombine.high %v308_v23, %v500_v24 }
  0x94   : > { %9458 = vmatprep.mubr.bf16.mxu0 %v2002_v35  ;;  %5626 = vmatprep.subr.bf16.mxu1 %v13208_v36  ;;  %v13408_v35 = vcombine.high %v404_v27, %v596_v28  ;;  %v842_v36 = vrot.slane %v828_v31, %v14794_v5 }
  0x95   : > { %9466 = vmatprep.subr.bf16.mxu0 %v13400_v38 }
  0x96   : > { %v844_v38 = vcombine.high %v842_v36, %v842_v36 }
  0x98   : > { %v872_v48 = vrot.slane %v844_v38, %v14794_v5  ;;  %v313_v38 = vld [vmem:[%s14783_s23 + $0x78] sm:$0xff] }
  0x9a   : > { %v876_v60 = vcombine.high %v872_v48, %v872_v48 }
  0x9d   : > { %5619 = vmatmul.mubr.bf16.vlgmr.msra.gmra.mrb[0].mxu1 %v824_v43  ;;  %v13215_v43 = vcombine.low %v308_v23, %v500_v24  ;;  %v408_v24 = vld [vmem:[%s14783_s23 + $0x370] sm:$0xff] }
  0x9e   : > { %9459 = vmatmul.mubr.bf16.vlgmr.msra.gmra.mrb[0].mxu0 %v2000_v47  ;;  %5627 = vmatpush1.bf16.xpose.msra.mxu1 %v13207_v46  ;;  %v597_v46 = vld [vmem:[%s14783_s23 + $0x958] sm:$0x11]  ;;  %v13407_v47 = vcombine.low %v404_v27, %v596_v28 }
  0x9f   : > { %9467 = vmatpush1.bf16.xpose.msra.mxu0 %v13399_v50  ;;  %5658 = vmatprep.mubr.bf16.mxu1 %v823_v51  ;;  %v13218_v50 = vcombine.high %v309_v41, %v501_v42  ;;  %v13410_v51 = vcombine.high %v405_v45, %v597_v46 }
  0xa0   : > { %9498 = vmatprep.mubr.bf16.mxu0 %v1999_v52  ;;  %5666 = vmatprep.subr.bf16.mxu1 %v13210_v53  ;;  %v858_v52 = vrot.slane %v842_v36, %v14794_v5  ;;  %v310_v53 = vld [vmem:[%s14783_s23 + $0x60] sm:$0xff] }
  0xa1   : > { %9506 = vmatprep.subr.bf16.mxu0 %v13402_v54  ;;  %v502_v54 = vld [vmem:[%s14783_s23 + $0x660] sm:$0x11] }
  0xa2   : > { %v874_v7 = vcombine.high %v858_v52, %v858_v52 }
  0xa9   : > { %5659 = vmatmul.mubr.bf16.vlgmr.msra.gmra.mrb[0].mxu1 %v809_v55  ;;  %v13217_v55 = vcombine.low %v309_v41, %v501_v42  ;;  %v409_v42 = vld [vmem:[%s14783_s23 + $0x378] sm:$0xff] }
  0xaa   : > { %9499 = vmatmul.mubr.bf16.vlgmr.msra.gmra.mrb[0].mxu0 %v1985_v59  ;;  %5667 = vmatpush1.bf16.xpose.msra.mxu1 %v13209_v58  ;;  %v598_v58 = vld [vmem:[%s14783_s23 + $0x960] sm:$0x11]  ;;  %v13409_v59 = vcombine.low %v405_v45, %v597_v46 }
  0xab   : > { %9507 = vmatpush1.bf16.xpose.msra.mxu0 %v13401_v62  ;;  %5698 = vmatprep.mubr.bf16.mxu1 %v827_v63  ;;  %v13220_v62 = vcombine.high %v310_v53, %v502_v54  ;;  %v253_v63 = vld [vmem:[%s14799_s27 + $0x18] sm:$0xff] }
  0xac   : > { %9538 = vmatprep.mubr.bf16.mxu0 %v2003_v0  ;;  %5706 = vmatprep.subr.bf16.mxu1 %v13212_v1  ;;  %v13412_v0 = vcombine.high %v406_v57, %v598_v58  ;;  %v277_v1 = vld [vmem:[%s14799_s27 + $0xd8] sm:$0xff]  ;;  %v884_v2 = vrot.slane %v253_v63, %v14794_v5  ;;  %v877_v28 = vcombine.high %v253_v63, %v253_v63 }
  0xad   : > { %9546 = vmatprep.subr.bf16.mxu0 %v13404_v3  ;;  %v2060_v3 = vrot.slane %v277_v1, %v14794_v5  ;;  %v2053_v31 = vcombine.high %v277_v1, %v277_v1 }
  0xae   : > { %v892_v4 = vcombine.high %v884_v2, %v884_v2 }
  0xaf   : > { %v2068_v6 = vcombine.high %v2060_v3, %v2060_v3  ;;  %v2076_v23 = vrot.slane %v2060_v3, %v14794_v5  ;;  %v2067_v34 = vrot.slane %v2053_v31, %v14794_v5 }
  0xb0   : > { %v914_v15 = vrot.slane %v892_v4, %v14794_v5  ;;  %v315_v4 = vld [vmem:[%s14783_s23 + $0x88] sm:$0xff] }
  0xb1   : > { %v2090_v16 = vrot.slane %v2068_v6, %v14794_v5  ;;  %v2069_v36 = vcombine.high %v2067_v34, %v2067_v34  ;;  %v2098_v41 = vcombine.high %v2076_v23, %v2076_v23  ;;  %v507_v6 = vld [vmem:[%s14783_s23 + $0x688] sm:$0x11] }
  0xb2   : > { %v924_v27 = vcombine.high %v914_v15, %v914_v15 }
  0xb3   : > { %v2097_v46 = vrot.slane %v2069_v36, %v14794_v5  ;;  %v509_v36 = vld [vmem:[%s14783_s23 + $0x698] sm:$0x11] }
  0xb5   : > { %5699 = vmatmul.mubr.bf16.vlgmr.msra.gmra.mrb[0].mxu1 %v825_v10  ;;  %v13219_v10 = vcombine.low %v310_v53, %v502_v54  ;;  %v2083_v53 = vrot.slane %v2067_v34, %v14794_v5  ;;  %v410_v54 = vld [vmem:[%s14783_s23 + $0x380] sm:$0xff] }
  0xb6   : > { %9539 = vmatmul.mubr.bf16.vlgmr.msra.gmra.mrb[0].mxu0 %v2001_v14  ;;  %5707 = vmatpush1.bf16.xpose.msra.mxu1 %v13211_v13  ;;  %v599_v13 = vld [vmem:[%s14783_s23 + $0x968] sm:$0x11]  ;;  %v13411_v14 = vcombine.low %v406_v57, %v598_v58  ;;  %v2101_v58 = vcombine.high %v2097_v46, %v2097_v46 }
  0xb7   : > { %9547 = vmatpush1.bf16.xpose.msra.mxu0 %v13403_v17  ;;  %5738 = vmatprep.mubr.bf16.mxu1 %v865_v18  ;;  %v13222_v17 = vcombine.high %v311_v8, %v503_v9  ;;  %v13414_v18 = vcombine.high %v407_v12, %v599_v13 }
  0xb8   : > { %9578 = vmatprep.mubr.bf16.mxu0 %v2041_v19  ;;  %5746 = vmatprep.subr.bf16.mxu1 %v13214_v20  ;;  %v900_v19 = vrot.slane %v884_v2, %v14794_v5  ;;  %v312_v20 = vld [vmem:[%s14783_s23 + $0x70] sm:$0xff] }
  0xb9   : > { %9586 = vmatprep.subr.bf16.mxu0 %v13406_v21  ;;  %v504_v21 = vld [vmem:[%s14783_s23 + $0x670] sm:$0x11] }
  0xba   : > { %v922_v37 = vcombine.high %v900_v19, %v900_v19 }
  0xc1   : > { %5739 = vmatmul.mubr.bf16.vlgmr.msra.gmra.mrb[0].mxu1 %v851_v22  ;;  %v13221_v22 = vcombine.low %v311_v8, %v503_v9  ;;  %v2099_v8 = vcombine.high %v2083_v53, %v2083_v53  ;;  %v411_v9 = vld [vmem:[%s14783_s23 + $0x388] sm:$0xff] }
  0xc2   : > { %9579 = vmatmul.mubr.bf16.vlgmr.msra.gmra.mrb[0].mxu0 %v2027_v26  ;;  %5747 = vmatpush1.bf16.xpose.msra.mxu1 %v13213_v25  ;;  %v600_v25 = vld [vmem:[%s14783_s23 + $0x970] sm:$0x11]  ;;  %v13413_v26 = vcombine.low %v407_v12, %v599_v13 }
  0xc3   : > { %9587 = vmatpush1.bf16.xpose.msra.mxu0 %v13405_v29  ;;  %5778 = vmatprep.mubr.bf16.mxu1 %v875_v30  ;;  %v2100_v29 = vcombine.high %v2090_v16, %v2090_v16  ;;  %v13224_v30 = vcombine.high %v312_v20, %v504_v21 }
  0xc4   : > { %9618 = vmatprep.mubr.bf16.mxu0 %v2051_v32  ;;  %5786 = vmatprep.subr.bf16.mxu1 %v13216_v33  ;;  %v13416_v32 = vcombine.high %v408_v24, %v600_v25  ;;  %v891_v33 = vrot.slane %v877_v28, %v14794_v5 }
  0xc5   : > { %9626 = vmatprep.subr.bf16.mxu0 %v13408_v35 }
  0xc6   : > { %v893_v35 = vcombine.high %v891_v33, %v891_v33 }
  0xc8   : > { %v921_v45 = vrot.slane %v893_v35, %v14794_v5  ;;  %v317_v35 = vld [vmem:[%s14783_s23 + $0x98] sm:$0xff] }
  0xca   : > { %v925_v57 = vcombine.high %v921_v45, %v921_v45 }
  0xcd   : > { %5779 = vmatmul.mubr.bf16.vlgmr.msra.gmra.mrb[0].mxu1 %v873_v40  ;;  %v13223_v40 = vcombine.low %v312_v20, %v504_v21  ;;  %v412_v21 = vld [vmem:[%s14783_s23 + $0x390] sm:$0xff] }
  0xce   : > { %9619 = vmatmul.mubr.bf16.vlgmr.msra.gmra.mrb[0].mxu0 %v2049_v44  ;;  %5787 = vmatpush1.bf16.xpose.msra.mxu1 %v13215_v43  ;;  %v601_v43 = vld [vmem:[%s14783_s23 + $0x978] sm:$0x11]  ;;  %v13415_v44 = vcombine.low %v408_v24, %v600_v25 }
  0xcf   : > { %9627 = vmatpush1.bf16.xpose.msra.mxu0 %v13407_v47  ;;  %5818 = vmatprep.mubr.bf16.mxu1 %v872_v48  ;;  %v13226_v47 = vcombine.high %v313_v38, %v505_v39  ;;  %v13418_v48 = vcombine.high %v409_v42, %v601_v43 }
  0xd0   : > { %9658 = vmatprep.mubr.bf16.mxu0 %v2048_v49  ;;  %5826 = vmatprep.subr.bf16.mxu1 %v13218_v50  ;;  %v907_v49 = vrot.slane %v891_v33, %v14794_v5  ;;  %v314_v50 = vld [vmem:[%s14783_s23 + $0x80] sm:$0xff] }
  0xd1   : > { %9666 = vmatprep.subr.bf16.mxu0 %v13410_v51  ;;  %v506_v51 = vld [vmem:[%s14783_s23 + $0x680] sm:$0x11] }
  0xd2   : > { %v923_v3 = vcombine.high %v907_v49, %v907_v49 }
  0xd9   : > { %5819 = vmatmul.mubr.bf16.vlgmr.msra.gmra.mrb[0].mxu1 %v858_v52  ;;  %v13225_v52 = vcombine.low %v313_v38, %v505_v39  ;;  %v413_v39 = vld [vmem:[%s14783_s23 + $0x398] sm:$0xff] }
  0xda   : > { %9659 = vmatmul.mubr.bf16.vlgmr.msra.gmra.mrb[0].mxu0 %v2034_v56  ;;  %5827 = vmatpush1.bf16.xpose.msra.mxu1 %v13217_v55  ;;  %v602_v55 = vld [vmem:[%s14783_s23 + $0x980] sm:$0x11]  ;;  %v13417_v56 = vcombine.low %v409_v42, %v601_v43 }
  0xdb   : > { %9667 = vmatpush1.bf16.xpose.msra.mxu0 %v13409_v59  ;;  %5858 = vmatprep.mubr.bf16.mxu1 %v876_v60  ;;  %v13228_v59 = vcombine.high %v314_v50, %v506_v51  ;;  %v254_v60 = vld [vmem:[%s14799_s27 + $0x20] sm:$0xff] }
  0xdc   : > { %9698 = vmatprep.mubr.bf16.mxu0 %v2052_v61  ;;  %5866 = vmatprep.subr.bf16.mxu1 %v13220_v62  ;;  %v13420_v61 = vcombine.high %v410_v54, %v602_v55  ;;  %v278_v62 = vld [vmem:[%s14799_s27 + $0xe0] sm:$0xff]  ;;  %v933_v63 = vrot.slane %v254_v60, %v14794_v5  ;;  %v926_v25 = vcombine.high %v254_v60, %v254_v60 }
  0xdd   : > { %9706 = vmatprep.subr.bf16.mxu0 %v13412_v0  ;;  %v2109_v0 = vrot.slane %v278_v62, %v14794_v5  ;;  %v2102_v28 = vcombine.high %v278_v62, %v278_v62 }
  0xde   : > { %v941_v1 = vcombine.high %v933_v63, %v933_v63 }
  0xdf   : > { %v2117_v2 = vcombine.high %v2109_v0, %v2109_v0  ;;  %v2125_v20 = vrot.slane %v2109_v0, %v14794_v5  ;;  %v2116_v31 = vrot.slane %v2102_v28, %v14794_v5 }
  0xe0   : > { %v963_v12 = vrot.slane %v941_v1, %v14794_v5  ;;  %v319_v1 = vld [vmem:[%s14783_s23 + $0xa8] sm:$0xff] }
  0xe1   : > { %v2139_v13 = vrot.slane %v2117_v2, %v14794_v5  ;;  %v2118_v33 = vcombine.high %v2116_v31, %v2116_v31  ;;  %v2147_v38 = vcombine.high %v2125_v20, %v2125_v20  ;;  %v511_v2 = vld [vmem:[%s14783_s23 + $0x6a8] sm:$0x11] }
  0xe2   : > { %v973_v24 = vcombine.high %v963_v12, %v963_v12 }
  0xe3   : > { %v2146_v43 = vrot.slane %v2118_v33, %v14794_v5  ;;  %v513_v33 = vld [vmem:[%s14783_s23 + $0x6b8] sm:$0x11] }
  0xe5   : > { %5859 = vmatmul.mubr.bf16.vlgmr.msra.gmra.mrb[0].mxu1 %v874_v7  ;;  %v13227_v7 = vcombine.low %v314_v50, %v506_v51  ;;  %v2132_v50 = vrot.slane %v2116_v31, %v14794_v5  ;;  %v414_v51 = vld [vmem:[%s14783_s23 + $0x3a0] sm:$0xff] }
  0xe6   : > { %9699 = vmatmul.mubr.bf16.vlgmr.msra.gmra.mrb[0].mxu0 %v2050_v11  ;;  %5867 = vmatpush1.bf16.xpose.msra.mxu1 %v13219_v10  ;;  %v603_v10 = vld [vmem:[%s14783_s23 + $0x988] sm:$0x11]  ;;  %v13419_v11 = vcombine.low %v410_v54, %v602_v55  ;;  %v2150_v55 = vcombine.high %v2146_v43, %v2146_v43 }
  0xe7   : > { %9707 = vmatpush1.bf16.xpose.msra.mxu0 %v13411_v14  ;;  %5898 = vmatprep.mubr.bf16.mxu1 %v914_v15  ;;  %v13230_v14 = vcombine.high %v315_v4, %v507_v6  ;;  %v13422_v15 = vcombine.high %v411_v9, %v603_v10 }
  0xe8   : > { %9738 = vmatprep.mubr.bf16.mxu0 %v2090_v16  ;;  %5906 = vmatprep.subr.bf16.mxu1 %v13222_v17  ;;  %v949_v16 = vrot.slane %v933_v63, %v14794_v5  ;;  %v316_v17 = vld [vmem:[%s14783_s23 + $0x90] sm:$0xff] }
  0xe9   : > { %9746 = vmatprep.subr.bf16.mxu0 %v13414_v18  ;;  %v508_v18 = vld [vmem:[%s14783_s23 + $0x690] sm:$0x11] }
  0xea   : > { %v971_v34 = vcombine.high %v949_v16, %v949_v16 }
  0xf1   : > { %5899 = vmatmul.mubr.bf16.vlgmr.msra.gmra.mrb[0].mxu1 %v900_v19  ;;  %v13229_v19 = vcombine.low %v315_v4, %v507_v6  ;;  %v2148_v4 = vcombine.high %v2132_v50, %v2132_v50  ;;  %v415_v6 = vld [vmem:[%s14783_s23 + $0x3a8] sm:$0xff] }
  0xf2   : > { %9739 = vmatmul.mubr.bf16.vlgmr.msra.gmra.mrb[0].mxu0 %v2076_v23  ;;  %5907 = vmatpush1.bf16.xpose.msra.mxu1 %v13221_v22  ;;  %v604_v22 = vld [vmem:[%s14783_s23 + $0x990] sm:$0x11]  ;;  %v13421_v23 = vcombine.low %v411_v9, %v603_v10 }
  0xf3   : > { %9747 = vmatpush1.bf16.xpose.msra.mxu0 %v13413_v26  ;;  %5938 = vmatprep.mubr.bf16.mxu1 %v924_v27  ;;  %v2149_v26 = vcombine.high %v2139_v13, %v2139_v13  ;;  %v13232_v27 = vcombine.high %v316_v17, %v508_v18 }
  0xf4   : > { %9778 = vmatprep.mubr.bf16.mxu0 %v2100_v29  ;;  %5946 = vmatprep.subr.bf16.mxu1 %v13224_v30  ;;  %v13424_v29 = vcombine.high %v412_v21, %v604_v22  ;;  %v940_v30 = vrot.slane %v926_v25, %v14794_v5 }
  0xf5   : > { %9786 = vmatprep.subr.bf16.mxu0 %v13416_v32 }
  0xf6   : > { %v942_v32 = vcombine.high %v940_v30, %v940_v30 }
  0xf8   : > { %v970_v42 = vrot.slane %v942_v32, %v14794_v5  ;;  %v321_v32 = vld [vmem:[%s14783_s23 + $0xb8] sm:$0xff] }
  0xfa   : > { %v974_v54 = vcombine.high %v970_v42, %v970_v42 }
  0xfd   : > { %5939 = vmatmul.mubr.bf16.vlgmr.msra.gmra.mrb[0].mxu1 %v922_v37  ;;  %v13231_v37 = vcombine.low %v316_v17, %v508_v18  ;;  %v416_v18 = vld [vmem:[%s14783_s23 + $0x3b0] sm:$0xff] }
  0xfe   : > { %9779 = vmatmul.mubr.bf16.vlgmr.msra.gmra.mrb[0].mxu0 %v2098_v41  ;;  %5947 = vmatpush1.bf16.xpose.msra.mxu1 %v13223_v40  ;;  %v605_v40 = vld [vmem:[%s14783_s23 + $0x998] sm:$0x11]  ;;  %v13423_v41 = vcombine.low %v412_v21, %v604_v22 }
  0xff   : > { %9787 = vmatpush1.bf16.xpose.msra.mxu0 %v13415_v44  ;;  %5978 = vmatprep.mubr.bf16.mxu1 %v921_v45  ;;  %v13234_v44 = vcombine.high %v317_v35, %v509_v36  ;;  %v13426_v45 = vcombine.high %v413_v39, %v605_v40 }
 0x100   : > { %9818 = vmatprep.mubr.bf16.mxu0 %v2097_v46  ;;  %5986 = vmatprep.subr.bf16.mxu1 %v13226_v47  ;;  %v956_v46 = vrot.slane %v940_v30, %v14794_v5  ;;  %v318_v47 = vld [vmem:[%s14783_s23 + $0xa0] sm:$0xff] }
 0x101   : > { %9826 = vmatprep.subr.bf16.mxu0 %v13418_v48  ;;  %v510_v48 = vld [vmem:[%s14783_s23 + $0x6a0] sm:$0x11] }
 0x102   : > { %v972_v0 = vcombine.high %v956_v46, %v956_v46 }
 0x109   : > { %5979 = vmatmul.mubr.bf16.vlgmr.msra.gmra.mrb[0].mxu1 %v907_v49  ;;  %v13233_v49 = vcombine.low %v317_v35, %v509_v36  ;;  %v417_v36 = vld [vmem:[%s14783_s23 + $0x3b8] sm:$0xff] }
 0x10a   : > { %9819 = vmatmul.mubr.bf16.vlgmr.msra.gmra.mrb[0].mxu0 %v2083_v53  ;;  %5987 = vmatpush1.bf16.xpose.msra.mxu1 %v13225_v52  ;;  %v606_v52 = vld [vmem:[%s14783_s23 + $0x9a0] sm:$0x11]  ;;  %v13425_v53 = vcombine.low %v413_v39, %v605_v40 }
 0x10b   : > { %9827 = vmatpush1.bf16.xpose.msra.mxu0 %v13417_v56  ;;  %6018 = vmatprep.mubr.bf16.mxu1 %v925_v57  ;;  %v13236_v56 = vcombine.high %v318_v47, %v510_v48  ;;  %v255_v57 = vld [vmem:[%s14799_s27 + $0x28] sm:$0xff] }
 0x10c   : > { %9858 = vmatprep.mubr.bf16.mxu0 %v2101_v58  ;;  %6026 = vmatprep.subr.bf16.mxu1 %v13228_v59  ;;  %v13428_v58 = vcombine.high %v414_v51, %v606_v52  ;;  %v279_v59 = vld [vmem:[%s14799_s27 + $0xe8] sm:$0xff]  ;;  %v982_v60 = vrot.slane %v255_v57, %v14794_v5  ;;  %v975_v22 = vcombine.high %v255_v57, %v255_v57 }
 0x10d   : > { %9866 = vmatprep.subr.bf16.mxu0 %v13420_v61  ;;  %v2158_v61 = vrot.slane %v279_v59, %v14794_v5  ;;  %v2151_v25 = vcombine.high %v279_v59, %v279_v59 }
 0x10e   : > { %v990_v62 = vcombine.high %v982_v60, %v982_v60 }
 0x10f   : > { %v2166_v63 = vcombine.high %v2158_v61, %v2158_v61  ;;  %v2174_v17 = vrot.slane %v2158_v61, %v14794_v5  ;;  %v2165_v28 = vrot.slane %v2151_v25, %v14794_v5 }
 0x110   : > { %v1012_v9 = vrot.slane %v990_v62, %v14794_v5  ;;  %v323_v62 = vld [vmem:[%s14783_s23 + $0xc8] sm:$0xff] }
 0x111   : > { %v2188_v10 = vrot.slane %v2166_v63, %v14794_v5  ;;  %v2167_v30 = vcombine.high %v2165_v28, %v2165_v28  ;;  %v2196_v35 = vcombine.high %v2174_v17, %v2174_v17  ;;  %v515_v63 = vld [vmem:[%s14783_s23 + $0x6c8] sm:$0x11] }
 0x112   : > { %v1022_v21 = vcombine.high %v1012_v9, %v1012_v9 }
 0x113   : > { %v2195_v40 = vrot.slane %v2167_v30, %v14794_v5  ;;  %v517_v30 = vld [vmem:[%s14783_s23 + $0x6d8] sm:$0x11] }
 0x115   : > { %6019 = vmatmul.mubr.bf16.vlgmr.msra.gmra.mrb[0].mxu1 %v923_v3  ;;  %v13235_v3 = vcombine.low %v318_v47, %v510_v48  ;;  %v2181_v47 = vrot.slane %v2165_v28, %v14794_v5  ;;  %v418_v48 = vld [vmem:[%s14783_s23 + $0x3c0] sm:$0xff] }
 0x116   : > { %9859 = vmatmul.mubr.bf16.vlgmr.msra.gmra.mrb[0].mxu0 %v2099_v8  ;;  %6027 = vmatpush1.bf16.xpose.msra.mxu1 %v13227_v7  ;;  %v607_v7 = vld [vmem:[%s14783_s23 + $0x9a8] sm:$0x11]  ;;  %v13427_v8 = vcombine.low %v414_v51, %v606_v52  ;;  %v2199_v52 = vcombine.high %v2195_v40, %v2195_v40 }
 0x117   : > { %9867 = vmatpush1.bf16.xpose.msra.mxu0 %v13419_v11  ;;  %6058 = vmatprep.mubr.bf16.mxu1 %v963_v12  ;;  %v13238_v11 = vcombine.high %v319_v1, %v511_v2  ;;  %v13430_v12 = vcombine.high %v415_v6, %v607_v7 }
 0x118   : > { %9898 = vmatprep.mubr.bf16.mxu0 %v2139_v13  ;;  %6066 = vmatprep.subr.bf16.mxu1 %v13230_v14  ;;  %v998_v13 = vrot.slane %v982_v60, %v14794_v5  ;;  %v320_v14 = vld [vmem:[%s14783_s23 + $0xb0] sm:$0xff] }
 0x119   : > { %9906 = vmatprep.subr.bf16.mxu0 %v13422_v15  ;;  %v512_v15 = vld [vmem:[%s14783_s23 + $0x6b0] sm:$0x11] }
 0x11a   : > { %v1020_v31 = vcombine.high %v998_v13, %v998_v13 }
 0x121   : > { %6059 = vmatmul.mubr.bf16.vlgmr.msra.gmra.mrb[0].mxu1 %v949_v16  ;;  %v13237_v16 = vcombine.low %v319_v1, %v511_v2  ;;  %v2197_v1 = vcombine.high %v2181_v47, %v2181_v47  ;;  %v419_v2 = vld [vmem:[%s14783_s23 + $0x3c8] sm:$0xff] }
 0x122   : > { %9899 = vmatmul.mubr.bf16.vlgmr.msra.gmra.mrb[0].mxu0 %v2125_v20  ;;  %6067 = vmatpush1.bf16.xpose.msra.mxu1 %v13229_v19  ;;  %v608_v19 = vld [vmem:[%s14783_s23 + $0x9b0] sm:$0x11]  ;;  %v13429_v20 = vcombine.low %v415_v6, %v607_v7 }
 0x123   : > { %9907 = vmatpush1.bf16.xpose.msra.mxu0 %v13421_v23  ;;  %6098 = vmatprep.mubr.bf16.mxu1 %v973_v24  ;;  %v2198_v23 = vcombine.high %v2188_v10, %v2188_v10  ;;  %v13240_v24 = vcombine.high %v320_v14, %v512_v15 }
 0x124   : > { %9938 = vmatprep.mubr.bf16.mxu0 %v2149_v26  ;;  %6106 = vmatprep.subr.bf16.mxu1 %v13232_v27  ;;  %v13432_v26 = vcombine.high %v416_v18, %v608_v19  ;;  %v989_v27 = vrot.slane %v975_v22, %v14794_v5 }
 0x125   : > { %9946 = vmatprep.subr.bf16.mxu0 %v13424_v29 }
 0x126   : > { %v991_v29 = vcombine.high %v989_v27, %v989_v27 }
 0x128   : > { %v1019_v39 = vrot.slane %v991_v29, %v14794_v5  ;;  %v325_v29 = vld [vmem:[%s14783_s23 + $0xd8] sm:$0xff] }
 0x12a   : > { %v1023_v51 = vcombine.high %v1019_v39, %v1019_v39 }
 0x12d   : > { %6099 = vmatmul.mubr.bf16.vlgmr.msra.gmra.mrb[0].mxu1 %v971_v34  ;;  %v13239_v34 = vcombine.low %v320_v14, %v512_v15  ;;  %v420_v15 = vld [vmem:[%s14783_s23 + $0x3d0] sm:$0xff] }
 0x12e   : > { %9939 = vmatmul.mubr.bf16.vlgmr.msra.gmra.mrb[0].mxu0 %v2147_v38  ;;  %6107 = vmatpush1.bf16.xpose.msra.mxu1 %v13231_v37  ;;  %v609_v37 = vld [vmem:[%s14783_s23 + $0x9b8] sm:$0x11]  ;;  %v13431_v38 = vcombine.low %v416_v18, %v608_v19 }
 0x12f   : > { %9947 = vmatpush1.bf16.xpose.msra.mxu0 %v13423_v41  ;;  %6138 = vmatprep.mubr.bf16.mxu1 %v970_v42  ;;  %v13242_v41 = vcombine.high %v321_v32, %v513_v33  ;;  %v13434_v42 = vcombine.high %v417_v36, %v609_v37 }
 0x130   : > { %9978 = vmatprep.mubr.bf16.mxu0 %v2146_v43  ;;  %6146 = vmatprep.subr.bf16.mxu1 %v13234_v44  ;;  %v1005_v43 = vrot.slane %v989_v27, %v14794_v5  ;;  %v322_v44 = vld [vmem:[%s14783_s23 + $0xc0] sm:$0xff] }
 0x131   : > { %9986 = vmatprep.subr.bf16.mxu0 %v13426_v45  ;;  %v514_v45 = vld [vmem:[%s14783_s23 + $0x6c0] sm:$0x11] }
 0x132   : > { %v1021_v61 = vcombine.high %v1005_v43, %v1005_v43 }
 0x139   : > { %6139 = vmatmul.mubr.bf16.vlgmr.msra.gmra.mrb[0].mxu1 %v956_v46  ;;  %v13241_v46 = vcombine.low %v321_v32, %v513_v33  ;;  %v421_v33 = vld [vmem:[%s14783_s23 + $0x3d8] sm:$0xff] }
 0x13a   : > { %9979 = vmatmul.mubr.bf16.vlgmr.msra.gmra.mrb[0].mxu0 %v2132_v50  ;;  %6147 = vmatpush1.bf16.xpose.msra.mxu1 %v13233_v49  ;;  %v610_v49 = vld [vmem:[%s14783_s23 + $0x9c0] sm:$0x11]  ;;  %v13433_v50 = vcombine.low %v417_v36, %v609_v37 }
 0x13b   : > { %9987 = vmatpush1.bf16.xpose.msra.mxu0 %v13425_v53  ;;  %6178 = vmatprep.mubr.bf16.mxu1 %v974_v54  ;;  %v13244_v53 = vcombine.high %v322_v44, %v514_v45  ;;  %v256_v54 = vld [vmem:[%s14799_s27 + $0x30] sm:$0xff] }
 0x13c   : > { %10018 = vmatprep.mubr.bf16.mxu0 %v2150_v55  ;;  %6186 = vmatprep.subr.bf16.mxu1 %v13236_v56  ;;  %v13436_v55 = vcombine.high %v418_v48, %v610_v49  ;;  %v280_v56 = vld [vmem:[%s14799_s27 + $0xf0] sm:$0xff]  ;;  %v1031_v57 = vrot.slane %v256_v54, %v14794_v5  ;;  %v1024_v19 = vcombine.high %v256_v54, %v256_v54 }
 0x13d   : > { %10026 = vmatprep.subr.bf16.mxu0 %v13428_v58  ;;  %v2207_v58 = vrot.slane %v280_v56, %v14794_v5  ;;  %v2200_v22 = vcombine.high %v280_v56, %v280_v56 }
 0x13e   : > { %v1039_v59 = vcombine.high %v1031_v57, %v1031_v57 }
 0x13f   : > { %v2215_v60 = vcombine.high %v2207_v58, %v2207_v58  ;;  %v2223_v14 = vrot.slane %v2207_v58, %v14794_v5  ;;  %v2214_v25 = vrot.slane %v2200_v22, %v14794_v5 }
 0x140   : > { %v1061_v6 = vrot.slane %v1039_v59, %v14794_v5  ;;  %v327_v59 = vld [vmem:[%s14783_s23 + $0xe8] sm:$0xff] }
 0x141   : > { %v2237_v7 = vrot.slane %v2215_v60, %v14794_v5  ;;  %v2216_v27 = vcombine.high %v2214_v25, %v2214_v25  ;;  %v2245_v32 = vcombine.high %v2223_v14, %v2223_v14  ;;  %v519_v60 = vld [vmem:[%s14783_s23 + $0x6e8] sm:$0x11] }
 0x142   : > { %v1071_v18 = vcombine.high %v1061_v6, %v1061_v6 }
 0x143   : > { %v2244_v37 = vrot.slane %v2216_v27, %v14794_v5  ;;  %v521_v27 = vld [vmem:[%s14783_s23 + $0x6f8] sm:$0x11] }
 0x145   : > { %6179 = vmatmul.mubr.bf16.vlgmr.msra.gmra.mrb[0].mxu1 %v972_v0  ;;  %v13243_v0 = vcombine.low %v322_v44, %v514_v45  ;;  %v2230_v44 = vrot.slane %v2214_v25, %v14794_v5  ;;  %v422_v45 = vld [vmem:[%s14783_s23 + $0x3e0] sm:$0xff] }
 0x146   : > { %10019 = vmatmul.mubr.bf16.vlgmr.msra.gmra.mrb[0].mxu0 %v2148_v4  ;;  %6187 = vmatpush1.bf16.xpose.msra.mxu1 %v13235_v3  ;;  %v611_v3 = vld [vmem:[%s14783_s23 + $0x9c8] sm:$0x11]  ;;  %v13435_v4 = vcombine.low %v418_v48, %v610_v49  ;;  %v2248_v49 = vcombine.high %v2244_v37, %v2244_v37 }
 0x147   : > { %10027 = vmatpush1.bf16.xpose.msra.mxu0 %v13427_v8  ;;  %6218 = vmatprep.mubr.bf16.mxu1 %v1012_v9  ;;  %v13246_v8 = vcombine.high %v323_v62, %v515_v63  ;;  %v13438_v9 = vcombine.high %v419_v2, %v611_v3 }
 0x148   : > { %10058 = vmatprep.mubr.bf16.mxu0 %v2188_v10  ;;  %6226 = vmatprep.subr.bf16.mxu1 %v13238_v11  ;;  %v1047_v10 = vrot.slane %v1031_v57, %v14794_v5  ;;  %v324_v11 = vld [vmem:[%s14783_s23 + $0xd0] sm:$0xff] }
 0x149   : > { %10066 = vmatprep.subr.bf16.mxu0 %v13430_v12  ;;  %v516_v12 = vld [vmem:[%s14783_s23 + $0x6d0] sm:$0x11] }
 0x14a   : > { %v1069_v28 = vcombine.high %v1047_v10, %v1047_v10 }
 0x151   : > { %6219 = vmatmul.mubr.bf16.vlgmr.msra.gmra.mrb[0].mxu1 %v998_v13  ;;  %v13245_v13 = vcombine.low %v323_v62, %v515_v63  ;;  %v2246_v62 = vcombine.high %v2230_v44, %v2230_v44  ;;  %v423_v63 = vld [vmem:[%s14783_s23 + $0x3e8] sm:$0xff] }
 0x152   : > { %10059 = vmatmul.mubr.bf16.vlgmr.msra.gmra.mrb[0].mxu0 %v2174_v17  ;;  %6227 = vmatpush1.bf16.xpose.msra.mxu1 %v13237_v16  ;;  %v612_v16 = vld [vmem:[%s14783_s23 + $0x9d0] sm:$0x11]  ;;  %v13437_v17 = vcombine.low %v419_v2, %v611_v3 }
 0x153   : > { %10067 = vmatpush1.bf16.xpose.msra.mxu0 %v13429_v20  ;;  %6258 = vmatprep.mubr.bf16.mxu1 %v1022_v21  ;;  %v2247_v20 = vcombine.high %v2237_v7, %v2237_v7  ;;  %v13248_v21 = vcombine.high %v324_v11, %v516_v12 }
 0x154   : > { %10098 = vmatprep.mubr.bf16.mxu0 %v2198_v23  ;;  %6266 = vmatprep.subr.bf16.mxu1 %v13240_v24  ;;  %v13440_v23 = vcombine.high %v420_v15, %v612_v16  ;;  %v1038_v24 = vrot.slane %v1024_v19, %v14794_v5 }
 0x155   : > { %10106 = vmatprep.subr.bf16.mxu0 %v13432_v26 }
 0x156   : > { %v1040_v26 = vcombine.high %v1038_v24, %v1038_v24 }
 0x158   : > { %v1068_v36 = vrot.slane %v1040_v26, %v14794_v5  ;;  %v329_v26 = vld [vmem:[%s14783_s23 + $0xf8] sm:$0xff] }
 0x15a   : > { %v1072_v48 = vcombine.high %v1068_v36, %v1068_v36 }
 0x15d   : > { %6259 = vmatmul.mubr.bf16.vlgmr.msra.gmra.mrb[0].mxu1 %v1020_v31  ;;  %v13247_v31 = vcombine.low %v324_v11, %v516_v12  ;;  %v424_v12 = vld [vmem:[%s14783_s23 + $0x3f0] sm:$0xff] }
 0x15e   : > { %10099 = vmatmul.mubr.bf16.vlgmr.msra.gmra.mrb[0].mxu0 %v2196_v35  ;;  %6267 = vmatpush1.bf16.xpose.msra.mxu1 %v13239_v34  ;;  %v613_v34 = vld [vmem:[%s14783_s23 + $0x9d8] sm:$0x11]  ;;  %v13439_v35 = vcombine.low %v420_v15, %v612_v16 }
 0x15f   : > { %10107 = vmatpush1.bf16.xpose.msra.mxu0 %v13431_v38  ;;  %6298 = vmatprep.mubr.bf16.mxu1 %v1019_v39  ;;  %v13250_v38 = vcombine.high %v325_v29, %v517_v30  ;;  %v13442_v39 = vcombine.high %v421_v33, %v613_v34 }
 0x160   : > { %10138 = vmatprep.mubr.bf16.mxu0 %v2195_v40  ;;  %6306 = vmatprep.subr.bf16.mxu1 %v13242_v41  ;;  %v1054_v40 = vrot.slane %v1038_v24, %v14794_v5  ;;  %v326_v41 = vld [vmem:[%s14783_s23 + $0xe0] sm:$0xff] }
 0x161   : > { %10146 = vmatprep.subr.bf16.mxu0 %v13434_v42  ;;  %v518_v42 = vld [vmem:[%s14783_s23 + $0x6e0] sm:$0x11] }
 0x162   : > { %v1070_v58 = vcombine.high %v1054_v40, %v1054_v40 }
 0x169   : > { %6299 = vmatmul.mubr.bf16.vlgmr.msra.gmra.mrb[0].mxu1 %v1005_v43  ;;  %v13249_v43 = vcombine.low %v325_v29, %v517_v30  ;;  %v425_v30 = vld [vmem:[%s14783_s23 + $0x3f8] sm:$0xff] }
 0x16a   : > { %10139 = vmatmul.mubr.bf16.vlgmr.msra.gmra.mrb[0].mxu0 %v2181_v47  ;;  %6307 = vmatpush1.bf16.xpose.msra.mxu1 %v13241_v46  ;;  %v614_v46 = vld [vmem:[%s14783_s23 + $0x9e0] sm:$0x11]  ;;  %v13441_v47 = vcombine.low %v421_v33, %v613_v34 }
 0x16b   : > { %10147 = vmatpush1.bf16.xpose.msra.mxu0 %v13433_v50  ;;  %6338 = vmatprep.mubr.bf16.mxu1 %v1023_v51  ;;  %v13252_v50 = vcombine.high %v326_v41, %v518_v42  ;;  %v257_v51 = vld [vmem:[%s14799_s27 + $0x38] sm:$0xff] }
 0x16c   : > { %10178 = vmatprep.mubr.bf16.mxu0 %v2199_v52  ;;  %6346 = vmatprep.subr.bf16.mxu1 %v13244_v53  ;;  %v13444_v52 = vcombine.high %v422_v45, %v614_v46  ;;  %v281_v53 = vld [vmem:[%s14799_s27 + $0xf8] sm:$0xff]  ;;  %v1080_v54 = vrot.slane %v257_v51, %v14794_v5  ;;  %v1073_v16 = vcombine.high %v257_v51, %v257_v51 }
 0x16d   : > { %10186 = vmatprep.subr.bf16.mxu0 %v13436_v55  ;;  %v2256_v55 = vrot.slane %v281_v53, %v14794_v5  ;;  %v2249_v19 = vcombine.high %v281_v53, %v281_v53 }
 0x16e   : > { %v1088_v56 = vcombine.high %v1080_v54, %v1080_v54 }
 0x16f   : > { %v2264_v57 = vcombine.high %v2256_v55, %v2256_v55  ;;  %v2272_v11 = vrot.slane %v2256_v55, %v14794_v5  ;;  %v2263_v22 = vrot.slane %v2249_v19, %v14794_v5 }
 0x170   : > { %v1110_v2 = vrot.slane %v1088_v56, %v14794_v5  ;;  %v331_v56 = vld [vmem:[%s14783_s23 + $0x108] sm:$0xff] }
 0x171   : > { %v2286_v3 = vrot.slane %v2264_v57, %v14794_v5  ;;  %v2265_v24 = vcombine.high %v2263_v22, %v2263_v22  ;;  %v2294_v29 = vcombine.high %v2272_v11, %v2272_v11  ;;  %v523_v57 = vld [vmem:[%s14783_s23 + $0x708] sm:$0x11] }
 0x172   : > { %v1120_v15 = vcombine.high %v1110_v2, %v1110_v2 }
 0x173   : > { %v2293_v34 = vrot.slane %v2265_v24, %v14794_v5  ;;  %v525_v24 = vld [vmem:[%s14783_s23 + $0x718] sm:$0x11] }
 0x175   : > { %6339 = vmatmul.mubr.bf16.vlgmr.msra.gmra.mrb[0].mxu1 %v1021_v61  ;;  %v13251_v61 = vcombine.low %v326_v41, %v518_v42  ;;  %v2279_v41 = vrot.slane %v2263_v22, %v14794_v5  ;;  %v426_v42 = vld [vmem:[%s14783_s23 + $0x400] sm:$0xff] }
 0x176   : > { %10179 = vmatmul.mubr.bf16.vlgmr.msra.gmra.mrb[0].mxu0 %v2197_v1  ;;  %6347 = vmatpush1.bf16.xpose.msra.mxu1 %v13243_v0  ;;  %v615_v0 = vld [vmem:[%s14783_s23 + $0x9e8] sm:$0x11]  ;;  %v13443_v1 = vcombine.low %v422_v45, %v614_v46  ;;  %v2297_v46 = vcombine.high %v2293_v34, %v2293_v34 }
 0x177   : > { %10187 = vmatpush1.bf16.xpose.msra.mxu0 %v13435_v4  ;;  %6378 = vmatprep.mubr.bf16.mxu1 %v1061_v6  ;;  %v13254_v4 = vcombine.high %v327_v59, %v519_v60  ;;  %v13446_v6 = vcombine.high %v423_v63, %v615_v0 }
 0x178   : > { %10218 = vmatprep.mubr.bf16.mxu0 %v2237_v7  ;;  %6386 = vmatprep.subr.bf16.mxu1 %v13246_v8  ;;  %v1096_v7 = vrot.slane %v1080_v54, %v14794_v5  ;;  %v328_v8 = vld [vmem:[%s14783_s23 + $0xf0] sm:$0xff] }
 0x179   : > { %10226 = vmatprep.subr.bf16.mxu0 %v13438_v9  ;;  %v520_v9 = vld [vmem:[%s14783_s23 + $0x6f0] sm:$0x11] }
 0x17a   : > { %v1118_v25 = vcombine.high %v1096_v7, %v1096_v7 }
 0x181   : > { %6379 = vmatmul.mubr.bf16.vlgmr.msra.gmra.mrb[0].mxu1 %v1047_v10  ;;  %v13253_v10 = vcombine.low %v327_v59, %v519_v60  ;;  %v2295_v59 = vcombine.high %v2279_v41, %v2279_v41  ;;  %v427_v60 = vld [vmem:[%s14783_s23 + $0x408] sm:$0xff] }
 0x182   : > { %10219 = vmatmul.mubr.bf16.vlgmr.msra.gmra.mrb[0].mxu0 %v2223_v14  ;;  %6387 = vmatpush1.bf16.xpose.msra.mxu1 %v13245_v13  ;;  %v616_v13 = vld [vmem:[%s14783_s23 + $0x9f0] sm:$0x11]  ;;  %v13445_v14 = vcombine.low %v423_v63, %v615_v0 }
 0x183   : > { %10227 = vmatpush1.bf16.xpose.msra.mxu0 %v13437_v17  ;;  %6418 = vmatprep.mubr.bf16.mxu1 %v1071_v18  ;;  %v2296_v17 = vcombine.high %v2286_v3, %v2286_v3  ;;  %v13256_v18 = vcombine.high %v328_v8, %v520_v9 }
 0x184   : > { %10258 = vmatprep.mubr.bf16.mxu0 %v2247_v20  ;;  %6426 = vmatprep.subr.bf16.mxu1 %v13248_v21  ;;  %v13448_v20 = vcombine.high %v424_v12, %v616_v13  ;;  %v1087_v21 = vrot.slane %v1073_v16, %v14794_v5 }
 0x185   : > { %10266 = vmatprep.subr.bf16.mxu0 %v13440_v23 }
 0x186   : > { %v1089_v23 = vcombine.high %v1087_v21, %v1087_v21 }
 0x188   : > { %v1117_v33 = vrot.slane %v1089_v23, %v14794_v5  ;;  %v333_v23 = vld [vmem:[%s14783_s23 + $0x118] sm:$0xff] }
 0x18a   : > { %v1121_v45 = vcombine.high %v1117_v33, %v1117_v33 }
 0x18d   : > { %6419 = vmatmul.mubr.bf16.vlgmr.msra.gmra.mrb[0].mxu1 %v1069_v28  ;;  %v13255_v28 = vcombine.low %v328_v8, %v520_v9  ;;  %v428_v9 = vld [vmem:[%s14783_s23 + $0x410] sm:$0xff] }
 0x18e   : > { %10259 = vmatmul.mubr.bf16.vlgmr.msra.gmra.mrb[0].mxu0 %v2245_v32  ;;  %6427 = vmatpush1.bf16.xpose.msra.mxu1 %v13247_v31  ;;  %v617_v31 = vld [vmem:[%s14783_s23 + $0x9f8] sm:$0x11]  ;;  %v13447_v32 = vcombine.low %v424_v12, %v616_v13 }
 0x18f   : > { %10267 = vmatpush1.bf16.xpose.msra.mxu0 %v13439_v35  ;;  %6458 = vmatprep.mubr.bf16.mxu1 %v1068_v36  ;;  %v13258_v35 = vcombine.high %v329_v26, %v521_v27  ;;  %v13450_v36 = vcombine.high %v425_v30, %v617_v31 }
 0x190   : > { %10298 = vmatprep.mubr.bf16.mxu0 %v2244_v37  ;;  %6466 = vmatprep.subr.bf16.mxu1 %v13250_v38  ;;  %v1103_v37 = vrot.slane %v1087_v21, %v14794_v5  ;;  %v330_v38 = vld [vmem:[%s14783_s23 + $0x100] sm:$0xff] }
 0x191   : > { %10306 = vmatprep.subr.bf16.mxu0 %v13442_v39  ;;  %v522_v39 = vld [vmem:[%s14783_s23 + $0x700] sm:$0x11] }
 0x192   : > { %v1119_v55 = vcombine.high %v1103_v37, %v1103_v37 }
 0x199   : > { %6459 = vmatmul.mubr.bf16.vlgmr.msra.gmra.mrb[0].mxu1 %v1054_v40  ;;  %v13257_v40 = vcombine.low %v329_v26, %v521_v27  ;;  %v429_v27 = vld [vmem:[%s14783_s23 + $0x418] sm:$0xff] }
 0x19a   : > { %10299 = vmatmul.mubr.bf16.vlgmr.msra.gmra.mrb[0].mxu0 %v2230_v44  ;;  %6467 = vmatpush1.bf16.xpose.msra.mxu1 %v13249_v43  ;;  %v618_v43 = vld [vmem:[%s14783_s23 + $0xa00] sm:$0x11]  ;;  %v13449_v44 = vcombine.low %v425_v30, %v617_v31 }
 0x19b   : > { %10307 = vmatpush1.bf16.xpose.msra.mxu0 %v13441_v47  ;;  %6498 = vmatprep.mubr.bf16.mxu1 %v1072_v48  ;;  %v13260_v47 = vcombine.high %v330_v38, %v522_v39  ;;  %v258_v48 = vld [vmem:[%s14799_s27 + $0x40] sm:$0xff] }
 0x19c   : > { %10338 = vmatprep.mubr.bf16.mxu0 %v2248_v49  ;;  %6506 = vmatprep.subr.bf16.mxu1 %v13252_v50  ;;  %v13452_v49 = vcombine.high %v426_v42, %v618_v43  ;;  %v282_v50 = vld [vmem:[%s14799_s27 + $0x100] sm:$0xff]  ;;  %v1129_v51 = vrot.slane %v258_v48, %v14794_v5  ;;  %v1122_v13 = vcombine.high %v258_v48, %v258_v48 }
 0x19d   : > { %10346 = vmatprep.subr.bf16.mxu0 %v13444_v52  ;;  %v2305_v52 = vrot.slane %v282_v50, %v14794_v5  ;;  %v2298_v16 = vcombine.high %v282_v50, %v282_v50 }
 0x19e   : > { %v1137_v53 = vcombine.high %v1129_v51, %v1129_v51 }
 0x19f   : > { %v2313_v54 = vcombine.high %v2305_v52, %v2305_v52  ;;  %v2321_v8 = vrot.slane %v2305_v52, %v14794_v5  ;;  %v2312_v19 = vrot.slane %v2298_v16, %v14794_v5 }
 0x1a0   : > { %v1159_v63 = vrot.slane %v1137_v53, %v14794_v5  ;;  %v335_v53 = vld [vmem:[%s14783_s23 + $0x128] sm:$0xff] }
 0x1a1   : > { %v2335_v0 = vrot.slane %v2313_v54, %v14794_v5  ;;  %v2314_v21 = vcombine.high %v2312_v19, %v2312_v19  ;;  %v2343_v26 = vcombine.high %v2321_v8, %v2321_v8  ;;  %v527_v54 = vld [vmem:[%s14783_s23 + $0x728] sm:$0x11] }
 0x1a2   : > { %v1169_v12 = vcombine.high %v1159_v63, %v1159_v63 }
 0x1a3   : > { %v2342_v31 = vrot.slane %v2314_v21, %v14794_v5  ;;  %v529_v21 = vld [vmem:[%s14783_s23 + $0x738] sm:$0x11] }
 0x1a5   : > { %6499 = vmatmul.mubr.bf16.vlgmr.msra.gmra.mrb[0].mxu1 %v1070_v58  ;;  %v13259_v58 = vcombine.low %v330_v38, %v522_v39  ;;  %v2328_v38 = vrot.slane %v2312_v19, %v14794_v5  ;;  %v430_v39 = vld [vmem:[%s14783_s23 + $0x420] sm:$0xff] }
 0x1a6   : > { %10339 = vmatmul.mubr.bf16.vlgmr.msra.gmra.mrb[0].mxu0 %v2246_v62  ;;  %6507 = vmatpush1.bf16.xpose.msra.mxu1 %v13251_v61  ;;  %v619_v61 = vld [vmem:[%s14783_s23 + $0xa08] sm:$0x11]  ;;  %v13451_v62 = vcombine.low %v426_v42, %v618_v43  ;;  %v2346_v43 = vcombine.high %v2342_v31, %v2342_v31 }
 0x1a7   : > { %10347 = vmatpush1.bf16.xpose.msra.mxu0 %v13443_v1  ;;  %6538 = vmatprep.mubr.bf16.mxu1 %v1110_v2  ;;  %v13262_v1 = vcombine.high %v331_v56, %v523_v57  ;;  %v13454_v2 = vcombine.high %v427_v60, %v619_v61 }
 0x1a8   : > { %10378 = vmatprep.mubr.bf16.mxu0 %v2286_v3  ;;  %6546 = vmatprep.subr.bf16.mxu1 %v13254_v4  ;;  %v1145_v3 = vrot.slane %v1129_v51, %v14794_v5  ;;  %v332_v4 = vld [vmem:[%s14783_s23 + $0x110] sm:$0xff] }
 0x1a9   : > { %10386 = vmatprep.subr.bf16.mxu0 %v13446_v6  ;;  %v524_v6 = vld [vmem:[%s14783_s23 + $0x710] sm:$0x11] }
 0x1aa   : > { %v1167_v22 = vcombine.high %v1145_v3, %v1145_v3 }
 0x1b1   : > { %6539 = vmatmul.mubr.bf16.vlgmr.msra.gmra.mrb[0].mxu1 %v1096_v7  ;;  %v13261_v7 = vcombine.low %v331_v56, %v523_v57  ;;  %v2344_v56 = vcombine.high %v2328_v38, %v2328_v38  ;;  %v431_v57 = vld [vmem:[%s14783_s23 + $0x428] sm:$0xff] }
 0x1b2   : > { %10379 = vmatmul.mubr.bf16.vlgmr.msra.gmra.mrb[0].mxu0 %v2272_v11  ;;  %6547 = vmatpush1.bf16.xpose.msra.mxu1 %v13253_v10  ;;  %v620_v10 = vld [vmem:[%s14783_s23 + $0xa10] sm:$0x11]  ;;  %v13453_v11 = vcombine.low %v427_v60, %v619_v61 }
 0x1b3   : > { %10387 = vmatpush1.bf16.xpose.msra.mxu0 %v13445_v14  ;;  %6578 = vmatprep.mubr.bf16.mxu1 %v1120_v15  ;;  %v2345_v14 = vcombine.high %v2335_v0, %v2335_v0  ;;  %v13264_v15 = vcombine.high %v332_v4, %v524_v6 }
 0x1b4   : > { %10418 = vmatprep.mubr.bf16.mxu0 %v2296_v17  ;;  %6586 = vmatprep.subr.bf16.mxu1 %v13256_v18  ;;  %v13456_v17 = vcombine.high %v428_v9, %v620_v10  ;;  %v1136_v18 = vrot.slane %v1122_v13, %v14794_v5 }
 0x1b5   : > { %10426 = vmatprep.subr.bf16.mxu0 %v13448_v20 }
 0x1b6   : > { %v1138_v20 = vcombine.high %v1136_v18, %v1136_v18 }
 0x1b8   : > { %v1166_v30 = vrot.slane %v1138_v20, %v14794_v5  ;;  %v337_v20 = vld [vmem:[%s14783_s23 + $0x138] sm:$0xff] }
 0x1ba   : > { %v1170_v42 = vcombine.high %v1166_v30, %v1166_v30 }
 0x1bd   : > { %6579 = vmatmul.mubr.bf16.vlgmr.msra.gmra.mrb[0].mxu1 %v1118_v25  ;;  %v13263_v25 = vcombine.low %v332_v4, %v524_v6  ;;  %v432_v6 = vld [vmem:[%s14783_s23 + $0x430] sm:$0xff] }
 0x1be   : > { %10419 = vmatmul.mubr.bf16.vlgmr.msra.gmra.mrb[0].mxu0 %v2294_v29  ;;  %6587 = vmatpush1.bf16.xpose.msra.mxu1 %v13255_v28  ;;  %v621_v28 = vld [vmem:[%s14783_s23 + $0xa18] sm:$0x11]  ;;  %v13455_v29 = vcombine.low %v428_v9, %v620_v10 }
 0x1bf   : > { %10427 = vmatpush1.bf16.xpose.msra.mxu0 %v13447_v32  ;;  %6618 = vmatprep.mubr.bf16.mxu1 %v1117_v33  ;;  %v13266_v32 = vcombine.high %v333_v23, %v525_v24  ;;  %v13458_v33 = vcombine.high %v429_v27, %v621_v28 }
 0x1c0   : > { %10458 = vmatprep.mubr.bf16.mxu0 %v2293_v34  ;;  %6626 = vmatprep.subr.bf16.mxu1 %v13258_v35  ;;  %v1152_v34 = vrot.slane %v1136_v18, %v14794_v5  ;;  %v334_v35 = vld [vmem:[%s14783_s23 + $0x120] sm:$0xff] }
 0x1c1   : > { %10466 = vmatprep.subr.bf16.mxu0 %v13450_v36  ;;  %v526_v36 = vld [vmem:[%s14783_s23 + $0x720] sm:$0x11] }
 0x1c2   : > { %v1168_v52 = vcombine.high %v1152_v34, %v1152_v34 }
 0x1c9   : > { %6619 = vmatmul.mubr.bf16.vlgmr.msra.gmra.mrb[0].mxu1 %v1103_v37  ;;  %v13265_v37 = vcombine.low %v333_v23, %v525_v24  ;;  %v433_v24 = vld [vmem:[%s14783_s23 + $0x438] sm:$0xff] }
 0x1ca   : > { %10459 = vmatmul.mubr.bf16.vlgmr.msra.gmra.mrb[0].mxu0 %v2279_v41  ;;  %6627 = vmatpush1.bf16.xpose.msra.mxu1 %v13257_v40  ;;  %v622_v40 = vld [vmem:[%s14783_s23 + $0xa20] sm:$0x11]  ;;  %v13457_v41 = vcombine.low %v429_v27, %v621_v28 }
 0x1cb   : > { %10467 = vmatpush1.bf16.xpose.msra.mxu0 %v13449_v44  ;;  %6658 = vmatprep.mubr.bf16.mxu1 %v1121_v45  ;;  %v13268_v44 = vcombine.high %v334_v35, %v526_v36  ;;  %v259_v45 = vld [vmem:[%s14799_s27 + $0x48] sm:$0xff] }
 0x1cc   : > { %10498 = vmatprep.mubr.bf16.mxu0 %v2297_v46  ;;  %6666 = vmatprep.subr.bf16.mxu1 %v13260_v47  ;;  %v13460_v46 = vcombine.high %v430_v39, %v622_v40  ;;  %v283_v47 = vld [vmem:[%s14799_s27 + $0x108] sm:$0xff]  ;;  %v1178_v48 = vrot.slane %v259_v45, %v14794_v5  ;;  %v1171_v10 = vcombine.high %v259_v45, %v259_v45 }
 0x1cd   : > { %10506 = vmatprep.subr.bf16.mxu0 %v13452_v49  ;;  %v2354_v49 = vrot.slane %v283_v47, %v14794_v5  ;;  %v2347_v13 = vcombine.high %v283_v47, %v283_v47 }
 0x1ce   : > { %v1186_v50 = vcombine.high %v1178_v48, %v1178_v48 }
 0x1cf   : > { %v2362_v51 = vcombine.high %v2354_v49, %v2354_v49  ;;  %v2370_v4 = vrot.slane %v2354_v49, %v14794_v5  ;;  %v2361_v16 = vrot.slane %v2347_v13, %v14794_v5 }
 0x1d0   : > { %v1208_v60 = vrot.slane %v1186_v50, %v14794_v5  ;;  %v339_v50 = vld [vmem:[%s14783_s23 + $0x148] sm:$0xff] }
 0x1d1   : > { %v2384_v61 = vrot.slane %v2362_v51, %v14794_v5  ;;  %v2363_v18 = vcombine.high %v2361_v16, %v2361_v16  ;;  %v2392_v23 = vcombine.high %v2370_v4, %v2370_v4  ;;  %v531_v51 = vld [vmem:[%s14783_s23 + $0x748] sm:$0x11] }
 0x1d2   : > { %v1218_v9 = vcombine.high %v1208_v60, %v1208_v60 }
 0x1d3   : > { %v2391_v28 = vrot.slane %v2363_v18, %v14794_v5  ;;  %v533_v18 = vld [vmem:[%s14783_s23 + $0x758] sm:$0x11] }
 0x1d5   : > { %6659 = vmatmul.mubr.bf16.vlgmr.msra.gmra.mrb[0].mxu1 %v1119_v55  ;;  %v13267_v55 = vcombine.low %v334_v35, %v526_v36  ;;  %v2377_v35 = vrot.slane %v2361_v16, %v14794_v5  ;;  %v434_v36 = vld [vmem:[%s14783_s23 + $0x440] sm:$0xff] }
 0x1d6   : > { %10499 = vmatmul.mubr.bf16.vlgmr.msra.gmra.mrb[0].mxu0 %v2295_v59  ;;  %6667 = vmatpush1.bf16.xpose.msra.mxu1 %v13259_v58  ;;  %v623_v58 = vld [vmem:[%s14783_s23 + $0xa28] sm:$0x11]  ;;  %v13459_v59 = vcombine.low %v430_v39, %v622_v40  ;;  %v2395_v40 = vcombine.high %v2391_v28, %v2391_v28 }
 0x1d7   : > { %10507 = vmatpush1.bf16.xpose.msra.mxu0 %v13451_v62  ;;  %6698 = vmatprep.mubr.bf16.mxu1 %v1159_v63  ;;  %v13270_v62 = vcombine.high %v335_v53, %v527_v54  ;;  %v13462_v63 = vcombine.high %v431_v57, %v623_v58 }
 0x1d8   : > { %10538 = vmatprep.mubr.bf16.mxu0 %v2335_v0  ;;  %6706 = vmatprep.subr.bf16.mxu1 %v13262_v1  ;;  %v1194_v0 = vrot.slane %v1178_v48, %v14794_v5  ;;  %v336_v1 = vld [vmem:[%s14783_s23 + $0x130] sm:$0xff] }
 0x1d9   : > { %10546 = vmatprep.subr.bf16.mxu0 %v13454_v2  ;;  %v528_v2 = vld [vmem:[%s14783_s23 + $0x730] sm:$0x11] }
 0x1da   : > { %v1216_v19 = vcombine.high %v1194_v0, %v1194_v0 }
 0x1e1   : > { %6699 = vmatmul.mubr.bf16.vlgmr.msra.gmra.mrb[0].mxu1 %v1145_v3  ;;  %v13269_v3 = vcombine.low %v335_v53, %v527_v54  ;;  %v2393_v53 = vcombine.high %v2377_v35, %v2377_v35  ;;  %v435_v54 = vld [vmem:[%s14783_s23 + $0x448] sm:$0xff] }
 0x1e2   : > { %10539 = vmatmul.mubr.bf16.vlgmr.msra.gmra.mrb[0].mxu0 %v2321_v8  ;;  %6707 = vmatpush1.bf16.xpose.msra.mxu1 %v13261_v7  ;;  %v624_v7 = vld [vmem:[%s14783_s23 + $0xa30] sm:$0x11]  ;;  %v13461_v8 = vcombine.low %v431_v57, %v623_v58 }
 0x1e3   : > { %10547 = vmatpush1.bf16.xpose.msra.mxu0 %v13453_v11  ;;  %6738 = vmatprep.mubr.bf16.mxu1 %v1169_v12  ;;  %v2394_v11 = vcombine.high %v2384_v61, %v2384_v61  ;;  %v13272_v12 = vcombine.high %v336_v1, %v528_v2 }
 0x1e4   : > { %10578 = vmatprep.mubr.bf16.mxu0 %v2345_v14  ;;  %6746 = vmatprep.subr.bf16.mxu1 %v13264_v15  ;;  %v13464_v14 = vcombine.high %v432_v6, %v624_v7  ;;  %v1185_v15 = vrot.slane %v1171_v10, %v14794_v5 }
 0x1e5   : > { %10586 = vmatprep.subr.bf16.mxu0 %v13456_v17 }
 0x1e6   : > { %v1187_v17 = vcombine.high %v1185_v15, %v1185_v15 }
 0x1e8   : > { %v1215_v27 = vrot.slane %v1187_v17, %v14794_v5  ;;  %v341_v17 = vld [vmem:[%s14783_s23 + $0x158] sm:$0xff] }
 0x1ea   : > { %v1219_v39 = vcombine.high %v1215_v27, %v1215_v27 }
 0x1ed   : > { %6739 = vmatmul.mubr.bf16.vlgmr.msra.gmra.mrb[0].mxu1 %v1167_v22  ;;  %v13271_v22 = vcombine.low %v336_v1, %v528_v2  ;;  %v436_v2 = vld [vmem:[%s14783_s23 + $0x450] sm:$0xff] }
 0x1ee   : > { %10579 = vmatmul.mubr.bf16.vlgmr.msra.gmra.mrb[0].mxu0 %v2343_v26  ;;  %6747 = vmatpush1.bf16.xpose.msra.mxu1 %v13263_v25  ;;  %v625_v25 = vld [vmem:[%s14783_s23 + $0xa38] sm:$0x11]  ;;  %v13463_v26 = vcombine.low %v432_v6, %v624_v7 }
 0x1ef   : > { %10587 = vmatpush1.bf16.xpose.msra.mxu0 %v13455_v29  ;;  %6778 = vmatprep.mubr.bf16.mxu1 %v1166_v30  ;;  %v13274_v29 = vcombine.high %v337_v20, %v529_v21  ;;  %v13466_v30 = vcombine.high %v433_v24, %v625_v25 }
 0x1f0   : > { %10618 = vmatprep.mubr.bf16.mxu0 %v2342_v31  ;;  %6786 = vmatprep.subr.bf16.mxu1 %v13266_v32  ;;  %v1201_v31 = vrot.slane %v1185_v15, %v14794_v5  ;;  %v338_v32 = vld [vmem:[%s14783_s23 + $0x140] sm:$0xff] }
 0x1f1   : > { %10626 = vmatprep.subr.bf16.mxu0 %v13458_v33  ;;  %v530_v33 = vld [vmem:[%s14783_s23 + $0x740] sm:$0x11] }
 0x1f2   : > { %v1217_v49 = vcombine.high %v1201_v31, %v1201_v31 }
 0x1f9   : > { %6779 = vmatmul.mubr.bf16.vlgmr.msra.gmra.mrb[0].mxu1 %v1152_v34  ;;  %v13273_v34 = vcombine.low %v337_v20, %v529_v21  ;;  %v437_v21 = vld [vmem:[%s14783_s23 + $0x458] sm:$0xff] }
 0x1fa   : > { %10619 = vmatmul.mubr.bf16.vlgmr.msra.gmra.mrb[0].mxu0 %v2328_v38  ;;  %6787 = vmatpush1.bf16.xpose.msra.mxu1 %v13265_v37  ;;  %v626_v37 = vld [vmem:[%s14783_s23 + $0xa40] sm:$0x11]  ;;  %v13465_v38 = vcombine.low %v433_v24, %v625_v25 }
 0x1fb   : > { %10627 = vmatpush1.bf16.xpose.msra.mxu0 %v13457_v41  ;;  %6818 = vmatprep.mubr.bf16.mxu1 %v1170_v42  ;;  %v13276_v41 = vcombine.high %v338_v32, %v530_v33  ;;  %v260_v42 = vld [vmem:[%s14799_s27 + $0x50] sm:$0xff] }
 0x1fc   : > { %10658 = vmatprep.mubr.bf16.mxu0 %v2346_v43  ;;  %6826 = vmatprep.subr.bf16.mxu1 %v13268_v44  ;;  %v13468_v43 = vcombine.high %v434_v36, %v626_v37  ;;  %v284_v44 = vld [vmem:[%s14799_s27 + $0x110] sm:$0xff]  ;;  %v1227_v45 = vrot.slane %v260_v42, %v14794_v5  ;;  %v1220_v7 = vcombine.high %v260_v42, %v260_v42 }
 0x1fd   : > { %10666 = vmatprep.subr.bf16.mxu0 %v13460_v46  ;;  %v2403_v46 = vrot.slane %v284_v44, %v14794_v5  ;;  %v2396_v10 = vcombine.high %v284_v44, %v284_v44 }
 0x1fe   : > { %v1235_v47 = vcombine.high %v1227_v45, %v1227_v45 }
 0x1ff   : > { %v2411_v48 = vcombine.high %v2403_v46, %v2403_v46  ;;  %v2419_v1 = vrot.slane %v2403_v46, %v14794_v5  ;;  %v2410_v13 = vrot.slane %v2396_v10, %v14794_v5 }
 0x200   : > { %v1257_v57 = vrot.slane %v1235_v47, %v14794_v5  ;;  %v343_v47 = vld [vmem:[%s14783_s23 + $0x168] sm:$0xff] }
 0x201   : > { %v2433_v58 = vrot.slane %v2411_v48, %v14794_v5  ;;  %v2412_v15 = vcombine.high %v2410_v13, %v2410_v13  ;;  %v2441_v20 = vcombine.high %v2419_v1, %v2419_v1  ;;  %v535_v48 = vld [vmem:[%s14783_s23 + $0x768] sm:$0x11] }
 0x202   : > { %v1267_v6 = vcombine.high %v1257_v57, %v1257_v57 }
 0x203   : > { %v2440_v25 = vrot.slane %v2412_v15, %v14794_v5  ;;  %v537_v15 = vld [vmem:[%s14783_s23 + $0x778] sm:$0x11] }
 0x205   : > { %6819 = vmatmul.mubr.bf16.vlgmr.msra.gmra.mrb[0].mxu1 %v1168_v52  ;;  %v13275_v52 = vcombine.low %v338_v32, %v530_v33  ;;  %v2426_v32 = vrot.slane %v2410_v13, %v14794_v5  ;;  %v438_v33 = vld [vmem:[%s14783_s23 + $0x460] sm:$0xff] }
 0x206   : > { %10659 = vmatmul.mubr.bf16.vlgmr.msra.gmra.mrb[0].mxu0 %v2344_v56  ;;  %6827 = vmatpush1.bf16.xpose.msra.mxu1 %v13267_v55  ;;  %v627_v55 = vld [vmem:[%s14783_s23 + $0xa48] sm:$0x11]  ;;  %v13467_v56 = vcombine.low %v434_v36, %v626_v37  ;;  %v2444_v37 = vcombine.high %v2440_v25, %v2440_v25 }
 0x207   : > { %10667 = vmatpush1.bf16.xpose.msra.mxu0 %v13459_v59  ;;  %6858 = vmatprep.mubr.bf16.mxu1 %v1208_v60  ;;  %v13278_v59 = vcombine.high %v339_v50, %v531_v51  ;;  %v13470_v60 = vcombine.high %v435_v54, %v627_v55 }
 0x208   : > { %10698 = vmatprep.mubr.bf16.mxu0 %v2384_v61  ;;  %6866 = vmatprep.subr.bf16.mxu1 %v13270_v62  ;;  %v1243_v61 = vrot.slane %v1227_v45, %v14794_v5  ;;  %v340_v62 = vld [vmem:[%s14783_s23 + $0x150] sm:$0xff] }
 0x209   : > { %10706 = vmatprep.subr.bf16.mxu0 %v13462_v63  ;;  %v532_v63 = vld [vmem:[%s14783_s23 + $0x750] sm:$0x11] }
 0x20a   : > { %v1265_v16 = vcombine.high %v1243_v61, %v1243_v61 }
 0x211   : > { %6859 = vmatmul.mubr.bf16.vlgmr.msra.gmra.mrb[0].mxu1 %v1194_v0  ;;  %v13277_v0 = vcombine.low %v339_v50, %v531_v51  ;;  %v2442_v50 = vcombine.high %v2426_v32, %v2426_v32  ;;  %v439_v51 = vld [vmem:[%s14783_s23 + $0x468] sm:$0xff] }
 0x212   : > { %10699 = vmatmul.mubr.bf16.vlgmr.msra.gmra.mrb[0].mxu0 %v2370_v4  ;;  %6867 = vmatpush1.bf16.xpose.msra.mxu1 %v13269_v3  ;;  %v628_v3 = vld [vmem:[%s14783_s23 + $0xa50] sm:$0x11]  ;;  %v13469_v4 = vcombine.low %v435_v54, %v627_v55 }
 0x213   : > { %10707 = vmatpush1.bf16.xpose.msra.mxu0 %v13461_v8  ;;  %6898 = vmatprep.mubr.bf16.mxu1 %v1218_v9  ;;  %v2443_v8 = vcombine.high %v2433_v58, %v2433_v58  ;;  %v13280_v9 = vcombine.high %v340_v62, %v532_v63 }
 0x214   : > { %10738 = vmatprep.mubr.bf16.mxu0 %v2394_v11  ;;  %6906 = vmatprep.subr.bf16.mxu1 %v13272_v12  ;;  %v13472_v11 = vcombine.high %v436_v2, %v628_v3  ;;  %v1234_v12 = vrot.slane %v1220_v7, %v14794_v5 }
 0x215   : > { %10746 = vmatprep.subr.bf16.mxu0 %v13464_v14 }
 0x216   : > { %v1236_v14 = vcombine.high %v1234_v12, %v1234_v12 }
 0x218   : > { %v1264_v24 = vrot.slane %v1236_v14, %v14794_v5  ;;  %v345_v14 = vld [vmem:[%s14783_s23 + $0x178] sm:$0xff] }
 0x21a   : > { %v1268_v36 = vcombine.high %v1264_v24, %v1264_v24 }
 0x21d   : > { %6899 = vmatmul.mubr.bf16.vlgmr.msra.gmra.mrb[0].mxu1 %v1216_v19  ;;  %v13279_v19 = vcombine.low %v340_v62, %v532_v63  ;;  %v440_v63 = vld [vmem:[%s14783_s23 + $0x470] sm:$0xff] }
 0x21e   : > { %10739 = vmatmul.mubr.bf16.vlgmr.msra.gmra.mrb[0].mxu0 %v2392_v23  ;;  %6907 = vmatpush1.bf16.xpose.msra.mxu1 %v13271_v22  ;;  %v629_v22 = vld [vmem:[%s14783_s23 + $0xa58] sm:$0x11]  ;;  %v13471_v23 = vcombine.low %v436_v2, %v628_v3 }
 0x21f   : > { %10747 = vmatpush1.bf16.xpose.msra.mxu0 %v13463_v26  ;;  %6938 = vmatprep.mubr.bf16.mxu1 %v1215_v27  ;;  %v13282_v26 = vcombine.high %v341_v17, %v533_v18  ;;  %v13474_v27 = vcombine.high %v437_v21, %v629_v22 }
 0x220   : > { %10778 = vmatprep.mubr.bf16.mxu0 %v2391_v28  ;;  %6946 = vmatprep.subr.bf16.mxu1 %v13274_v29  ;;  %v1250_v28 = vrot.slane %v1234_v12, %v14794_v5  ;;  %v342_v29 = vld [vmem:[%s14783_s23 + $0x160] sm:$0xff] }
 0x221   : > { %10786 = vmatprep.subr.bf16.mxu0 %v13466_v30  ;;  %v534_v30 = vld [vmem:[%s14783_s23 + $0x760] sm:$0x11] }
 0x222   : > { %v1266_v46 = vcombine.high %v1250_v28, %v1250_v28 }
 0x229   : > { %6939 = vmatmul.mubr.bf16.vlgmr.msra.gmra.mrb[0].mxu1 %v1201_v31  ;;  %v13281_v31 = vcombine.low %v341_v17, %v533_v18  ;;  %v441_v18 = vld [vmem:[%s14783_s23 + $0x478] sm:$0xff] }
 0x22a   : > { %10779 = vmatmul.mubr.bf16.vlgmr.msra.gmra.mrb[0].mxu0 %v2377_v35  ;;  %6947 = vmatpush1.bf16.xpose.msra.mxu1 %v13273_v34  ;;  %v630_v34 = vld [vmem:[%s14783_s23 + $0xa60] sm:$0x11]  ;;  %v13473_v35 = vcombine.low %v437_v21, %v629_v22 }
 0x22b   : > { %10787 = vmatpush1.bf16.xpose.msra.mxu0 %v13465_v38  ;;  %6978 = vmatprep.mubr.bf16.mxu1 %v1219_v39  ;;  %v13284_v38 = vcombine.high %v342_v29, %v534_v30  ;;  %v261_v39 = vld [vmem:[%s14799_s27 + $0x58] sm:$0xff] }
 0x22c   : > { %10818 = vmatprep.mubr.bf16.mxu0 %v2395_v40  ;;  %6986 = vmatprep.subr.bf16.mxu1 %v13276_v41  ;;  %v13476_v40 = vcombine.high %v438_v33, %v630_v34  ;;  %v285_v41 = vld [vmem:[%s14799_s27 + $0x118] sm:$0xff]  ;;  %v1276_v42 = vrot.slane %v261_v39, %v14794_v5  ;;  %v1269_v3 = vcombine.high %v261_v39, %v261_v39 }
 0x22d   : > { %10826 = vmatprep.subr.bf16.mxu0 %v13468_v43  ;;  %v2452_v43 = vrot.slane %v285_v41, %v14794_v5  ;;  %v2445_v7 = vcombine.high %v285_v41, %v285_v41 }
 0x22e   : > { %v1284_v44 = vcombine.high %v1276_v42, %v1276_v42 }
 0x22f   : > { %v2460_v45 = vcombine.high %v2452_v43, %v2452_v43  ;;  %v2468_v62 = vrot.slane %v2452_v43, %v14794_v5  ;;  %v2459_v10 = vrot.slane %v2445_v7, %v14794_v5 }
 0x230   : > { %v1306_v54 = vrot.slane %v1284_v44, %v14794_v5  ;;  %v347_v44 = vld [vmem:[%s14783_s23 + $0x188] sm:$0xff] }
 0x231   : > { %v2482_v55 = vrot.slane %v2460_v45, %v14794_v5  ;;  %v2461_v12 = vcombine.high %v2459_v10, %v2459_v10  ;;  %v2490_v17 = vcombine.high %v2468_v62, %v2468_v62  ;;  %v539_v45 = vld [vmem:[%s14783_s23 + $0x788] sm:$0x11] }
 0x232   : > { %v1316_v2 = vcombine.high %v1306_v54, %v1306_v54 }
 0x233   : > { %v2489_v22 = vrot.slane %v2461_v12, %v14794_v5  ;;  %v541_v12 = vld [vmem:[%s14783_s23 + $0x798] sm:$0x11] }
 0x235   : > { %6979 = vmatmul.mubr.bf16.vlgmr.msra.gmra.mrb[0].mxu1 %v1217_v49  ;;  %v13283_v49 = vcombine.low %v342_v29, %v534_v30  ;;  %v2475_v29 = vrot.slane %v2459_v10, %v14794_v5  ;;  %v442_v30 = vld [vmem:[%s14783_s23 + $0x480] sm:$0xff] }
 0x236   : > { %10819 = vmatmul.mubr.bf16.vlgmr.msra.gmra.mrb[0].mxu0 %v2393_v53  ;;  %6987 = vmatpush1.bf16.xpose.msra.mxu1 %v13275_v52  ;;  %v631_v52 = vld [vmem:[%s14783_s23 + $0xa68] sm:$0x11]  ;;  %v13475_v53 = vcombine.low %v438_v33, %v630_v34  ;;  %v2493_v34 = vcombine.high %v2489_v22, %v2489_v22 }
 0x237   : > { %10827 = vmatpush1.bf16.xpose.msra.mxu0 %v13467_v56  ;;  %7018 = vmatprep.mubr.bf16.mxu1 %v1257_v57  ;;  %v13286_v56 = vcombine.high %v343_v47, %v535_v48  ;;  %v13478_v57 = vcombine.high %v439_v51, %v631_v52 }
 0x238   : > { %10858 = vmatprep.mubr.bf16.mxu0 %v2433_v58  ;;  %7026 = vmatprep.subr.bf16.mxu1 %v13278_v59  ;;  %v1292_v58 = vrot.slane %v1276_v42, %v14794_v5  ;;  %v344_v59 = vld [vmem:[%s14783_s23 + $0x170] sm:$0xff] }
 0x239   : > { %10866 = vmatprep.subr.bf16.mxu0 %v13470_v60  ;;  %v536_v60 = vld [vmem:[%s14783_s23 + $0x770] sm:$0x11] }
 0x23a   : > { %v1314_v13 = vcombine.high %v1292_v58, %v1292_v58 }
 0x241   : > { %7019 = vmatmul.mubr.bf16.vlgmr.msra.gmra.mrb[0].mxu1 %v1243_v61  ;;  %v13285_v61 = vcombine.low %v343_v47, %v535_v48  ;;  %v2491_v47 = vcombine.high %v2475_v29, %v2475_v29  ;;  %v443_v48 = vld [vmem:[%s14783_s23 + $0x488] sm:$0xff] }
 0x242   : > { %10859 = vmatmul.mubr.bf16.vlgmr.msra.gmra.mrb[0].mxu0 %v2419_v1  ;;  %7027 = vmatpush1.bf16.xpose.msra.mxu1 %v13277_v0  ;;  %v632_v0 = vld [vmem:[%s14783_s23 + $0xa70] sm:$0x11]  ;;  %v13477_v1 = vcombine.low %v439_v51, %v631_v52 }
 0x243   : > { %10867 = vmatpush1.bf16.xpose.msra.mxu0 %v13469_v4  ;;  %7058 = vmatprep.mubr.bf16.mxu1 %v1267_v6  ;;  %v2492_v4 = vcombine.high %v2482_v55, %v2482_v55  ;;  %v13288_v6 = vcombine.high %v344_v59, %v536_v60 }
 0x244   : > { %10898 = vmatprep.mubr.bf16.mxu0 %v2443_v8  ;;  %7066 = vmatprep.subr.bf16.mxu1 %v13280_v9  ;;  %v13480_v8 = vcombine.high %v440_v63, %v632_v0  ;;  %v1283_v9 = vrot.slane %v1269_v3, %v14794_v5 }
 0x245   : > { %10906 = vmatprep.subr.bf16.mxu0 %v13472_v11 }
 0x246   : > { %v1285_v11 = vcombine.high %v1283_v9, %v1283_v9 }
 0x248   : > { %v1313_v21 = vrot.slane %v1285_v11, %v14794_v5  ;;  %v349_v11 = vld [vmem:[%s14783_s23 + $0x198] sm:$0xff] }
 0x24a   : > { %v1317_v33 = vcombine.high %v1313_v21, %v1313_v21 }
 0x24d   : > { %7059 = vmatmul.mubr.bf16.vlgmr.msra.gmra.mrb[0].mxu1 %v1265_v16  ;;  %v13287_v16 = vcombine.low %v344_v59, %v536_v60  ;;  %v444_v60 = vld [vmem:[%s14783_s23 + $0x490] sm:$0xff] }
 0x24e   : > { %10899 = vmatmul.mubr.bf16.vlgmr.msra.gmra.mrb[0].mxu0 %v2441_v20  ;;  %7067 = vmatpush1.bf16.xpose.msra.mxu1 %v13279_v19  ;;  %v633_v19 = vld [vmem:[%s14783_s23 + $0xa78] sm:$0x11]  ;;  %v13479_v20 = vcombine.low %v440_v63, %v632_v0 }
 0x24f   : > { %10907 = vmatpush1.bf16.xpose.msra.mxu0 %v13471_v23  ;;  %7098 = vmatprep.mubr.bf16.mxu1 %v1264_v24  ;;  %v13290_v23 = vcombine.high %v345_v14, %v537_v15  ;;  %v13482_v24 = vcombine.high %v441_v18, %v633_v19 }
 0x250   : > { %10938 = vmatprep.mubr.bf16.mxu0 %v2440_v25  ;;  %7106 = vmatprep.subr.bf16.mxu1 %v13282_v26  ;;  %v1299_v25 = vrot.slane %v1283_v9, %v14794_v5  ;;  %v346_v26 = vld [vmem:[%s14783_s23 + $0x180] sm:$0xff] }
 0x251   : > { %10946 = vmatprep.subr.bf16.mxu0 %v13474_v27  ;;  %v538_v27 = vld [vmem:[%s14783_s23 + $0x780] sm:$0x11] }
 0x252   : > { %v1315_v43 = vcombine.high %v1299_v25, %v1299_v25 }
 0x259   : > { %7099 = vmatmul.mubr.bf16.vlgmr.msra.gmra.mrb[0].mxu1 %v1250_v28  ;;  %v13289_v28 = vcombine.low %v345_v14, %v537_v15  ;;  %v445_v15 = vld [vmem:[%s14783_s23 + $0x498] sm:$0xff] }
 0x25a   : > { %10939 = vmatmul.mubr.bf16.vlgmr.msra.gmra.mrb[0].mxu0 %v2426_v32  ;;  %7107 = vmatpush1.bf16.xpose.msra.mxu1 %v13281_v31  ;;  %v634_v31 = vld [vmem:[%s14783_s23 + $0xa80] sm:$0x11]  ;;  %v13481_v32 = vcombine.low %v441_v18, %v633_v19 }
 0x25b   : > { %10947 = vmatpush1.bf16.xpose.msra.mxu0 %v13473_v35  ;;  %7138 = vmatprep.mubr.bf16.mxu1 %v1268_v36  ;;  %v13292_v35 = vcombine.high %v346_v26, %v538_v27  ;;  %v262_v36 = vld [vmem:[%s14799_s27 + $0x60] sm:$0xff] }
 0x25c   : > { %10978 = vmatprep.mubr.bf16.mxu0 %v2444_v37  ;;  %7146 = vmatprep.subr.bf16.mxu1 %v13284_v38  ;;  %v13484_v37 = vcombine.high %v442_v30, %v634_v31  ;;  %v286_v38 = vld [vmem:[%s14799_s27 + $0x120] sm:$0xff]  ;;  %v1325_v39 = vrot.slane %v262_v36, %v14794_v5  ;;  %v1318_v0 = vcombine.high %v262_v36, %v262_v36 }
 0x25d   : > { %10986 = vmatprep.subr.bf16.mxu0 %v13476_v40  ;;  %v2501_v40 = vrot.slane %v286_v38, %v14794_v5  ;;  %v2494_v3 = vcombine.high %v286_v38, %v286_v38 }
 0x25e   : > { %v1333_v41 = vcombine.high %v1325_v39, %v1325_v39 }
 0x25f   : > { %v2509_v42 = vcombine.high %v2501_v40, %v2501_v40  ;;  %v2517_v59 = vrot.slane %v2501_v40, %v14794_v5  ;;  %v2508_v7 = vrot.slane %v2494_v3, %v14794_v5 }
 0x260   : > { %v1355_v51 = vrot.slane %v1333_v41, %v14794_v5  ;;  %v351_v41 = vld [vmem:[%s14783_s23 + $0x1a8] sm:$0xff] }
 0x261   : > { %v2531_v52 = vrot.slane %v2509_v42, %v14794_v5  ;;  %v2510_v9 = vcombine.high %v2508_v7, %v2508_v7  ;;  %v2539_v14 = vcombine.high %v2517_v59, %v2517_v59  ;;  %v543_v42 = vld [vmem:[%s14783_s23 + $0x7a8] sm:$0x11] }
 0x262   : > { %v1365_v63 = vcombine.high %v1355_v51, %v1355_v51 }
 0x263   : > { %v2538_v19 = vrot.slane %v2510_v9, %v14794_v5  ;;  %v545_v9 = vld [vmem:[%s14783_s23 + $0x7b8] sm:$0x11] }
 0x265   : > { %7139 = vmatmul.mubr.bf16.vlgmr.msra.gmra.mrb[0].mxu1 %v1266_v46  ;;  %v13291_v46 = vcombine.low %v346_v26, %v538_v27  ;;  %v2524_v26 = vrot.slane %v2508_v7, %v14794_v5  ;;  %v446_v27 = vld [vmem:[%s14783_s23 + $0x4a0] sm:$0xff] }
 0x266   : > { %10979 = vmatmul.mubr.bf16.vlgmr.msra.gmra.mrb[0].mxu0 %v2442_v50  ;;  %7147 = vmatpush1.bf16.xpose.msra.mxu1 %v13283_v49  ;;  %v635_v49 = vld [vmem:[%s14783_s23 + $0xa88] sm:$0x11]  ;;  %v13483_v50 = vcombine.low %v442_v30, %v634_v31  ;;  %v2542_v31 = vcombine.high %v2538_v19, %v2538_v19 }
 0x267   : > { %10987 = vmatpush1.bf16.xpose.msra.mxu0 %v13475_v53  ;;  %7178 = vmatprep.mubr.bf16.mxu1 %v1306_v54  ;;  %v13294_v53 = vcombine.high %v347_v44, %v539_v45  ;;  %v13486_v54 = vcombine.high %v443_v48, %v635_v49 }
 0x268   : > { %11018 = vmatprep.mubr.bf16.mxu0 %v2482_v55  ;;  %7186 = vmatprep.subr.bf16.mxu1 %v13286_v56  ;;  %v1341_v55 = vrot.slane %v1325_v39, %v14794_v5  ;;  %v348_v56 = vld [vmem:[%s14783_s23 + $0x190] sm:$0xff] }
 0x269   : > { %11026 = vmatprep.subr.bf16.mxu0 %v13478_v57  ;;  %v540_v57 = vld [vmem:[%s14783_s23 + $0x790] sm:$0x11] }
 0x26a   : > { %v1363_v10 = vcombine.high %v1341_v55, %v1341_v55 }
 0x271   : > { %7179 = vmatmul.mubr.bf16.vlgmr.msra.gmra.mrb[0].mxu1 %v1292_v58  ;;  %v13293_v58 = vcombine.low %v347_v44, %v539_v45  ;;  %v2540_v44 = vcombine.high %v2524_v26, %v2524_v26  ;;  %v447_v45 = vld [vmem:[%s14783_s23 + $0x4a8] sm:$0xff] }
 0x272   : > { %11019 = vmatmul.mubr.bf16.vlgmr.msra.gmra.mrb[0].mxu0 %v2468_v62  ;;  %7187 = vmatpush1.bf16.xpose.msra.mxu1 %v13285_v61  ;;  %v636_v61 = vld [vmem:[%s14783_s23 + $0xa90] sm:$0x11]  ;;  %v13485_v62 = vcombine.low %v443_v48, %v635_v49 }
 0x273   : > { %11027 = vmatpush1.bf16.xpose.msra.mxu0 %v13477_v1  ;;  %7218 = vmatprep.mubr.bf16.mxu1 %v1316_v2  ;;  %v2541_v1 = vcombine.high %v2531_v52, %v2531_v52  ;;  %v13296_v2 = vcombine.high %v348_v56, %v540_v57 }
 0x274   : > { %11058 = vmatprep.mubr.bf16.mxu0 %v2492_v4  ;;  %7226 = vmatprep.subr.bf16.mxu1 %v13288_v6  ;;  %v13488_v4 = vcombine.high %v444_v60, %v636_v61  ;;  %v1332_v6 = vrot.slane %v1318_v0, %v14794_v5 }
 0x275   : > { %11066 = vmatprep.subr.bf16.mxu0 %v13480_v8 }
 0x276   : > { %v1334_v8 = vcombine.high %v1332_v6, %v1332_v6 }
 0x278   : > { %v1362_v18 = vrot.slane %v1334_v8, %v14794_v5  ;;  %v353_v8 = vld [vmem:[%s14783_s23 + $0x1b8] sm:$0xff] }
 0x27a   : > { %v1366_v30 = vcombine.high %v1362_v18, %v1362_v18 }
 0x27d   : > { %7219 = vmatmul.mubr.bf16.vlgmr.msra.gmra.mrb[0].mxu1 %v1314_v13  ;;  %v13295_v13 = vcombine.low %v348_v56, %v540_v57  ;;  %v448_v57 = vld [vmem:[%s14783_s23 + $0x4b0] sm:$0xff] }
 0x27e   : > { %11059 = vmatmul.mubr.bf16.vlgmr.msra.gmra.mrb[0].mxu0 %v2490_v17  ;;  %7227 = vmatpush1.bf16.xpose.msra.mxu1 %v13287_v16  ;;  %v637_v16 = vld [vmem:[%s14783_s23 + $0xa98] sm:$0x11]  ;;  %v13487_v17 = vcombine.low %v444_v60, %v636_v61 }
 0x27f   : > { %11067 = vmatpush1.bf16.xpose.msra.mxu0 %v13479_v20  ;;  %7258 = vmatprep.mubr.bf16.mxu1 %v1313_v21  ;;  %v13298_v20 = vcombine.high %v349_v11, %v541_v12  ;;  %v13490_v21 = vcombine.high %v445_v15, %v637_v16 }
 0x280   : > { %11098 = vmatprep.mubr.bf16.mxu0 %v2489_v22  ;;  %7266 = vmatprep.subr.bf16.mxu1 %v13290_v23  ;;  %v1348_v22 = vrot.slane %v1332_v6, %v14794_v5  ;;  %v350_v23 = vld [vmem:[%s14783_s23 + $0x1a0] sm:$0xff] }
 0x281   : > { %11106 = vmatprep.subr.bf16.mxu0 %v13482_v24  ;;  %v542_v24 = vld [vmem:[%s14783_s23 + $0x7a0] sm:$0x11] }
 0x282   : > { %v1364_v40 = vcombine.high %v1348_v22, %v1348_v22 }
 0x289   : > { %7259 = vmatmul.mubr.bf16.vlgmr.msra.gmra.mrb[0].mxu1 %v1299_v25  ;;  %v13297_v25 = vcombine.low %v349_v11, %v541_v12  ;;  %v449_v12 = vld [vmem:[%s14783_s23 + $0x4b8] sm:$0xff] }
 0x28a   : > { %11099 = vmatmul.mubr.bf16.vlgmr.msra.gmra.mrb[0].mxu0 %v2475_v29  ;;  %7267 = vmatpush1.bf16.xpose.msra.mxu1 %v13289_v28  ;;  %v638_v28 = vld [vmem:[%s14783_s23 + $0xaa0] sm:$0x11]  ;;  %v13489_v29 = vcombine.low %v445_v15, %v637_v16 }
 0x28b   : > { %11107 = vmatpush1.bf16.xpose.msra.mxu0 %v13481_v32  ;;  %7298 = vmatprep.mubr.bf16.mxu1 %v1317_v33  ;;  %v13300_v32 = vcombine.high %v350_v23, %v542_v24  ;;  %v263_v33 = vld [vmem:[%s14799_s27 + $0x68] sm:$0xff] }
 0x28c   : > { %11138 = vmatprep.mubr.bf16.mxu0 %v2493_v34  ;;  %7306 = vmatprep.subr.bf16.mxu1 %v13292_v35  ;;  %v13492_v34 = vcombine.high %v446_v27, %v638_v28  ;;  %v287_v35 = vld [vmem:[%s14799_s27 + $0x128] sm:$0xff]  ;;  %v1374_v36 = vrot.slane %v263_v33, %v14794_v5  ;;  %v1367_v61 = vcombine.high %v263_v33, %v263_v33 }
 0x28d   : > { %11146 = vmatprep.subr.bf16.mxu0 %v13484_v37  ;;  %v2550_v37 = vrot.slane %v287_v35, %v14794_v5  ;;  %v2543_v0 = vcombine.high %v287_v35, %v287_v35 }
 0x28e   : > { %v1382_v38 = vcombine.high %v1374_v36, %v1374_v36 }
 0x28f   : > { %v2558_v39 = vcombine.high %v2550_v37, %v2550_v37  ;;  %v2566_v56 = vrot.slane %v2550_v37, %v14794_v5  ;;  %v2557_v3 = vrot.slane %v2543_v0, %v14794_v5 }
 0x290   : > { %v1404_v48 = vrot.slane %v1382_v38, %v14794_v5  ;;  %v355_v38 = vld [vmem:[%s14783_s23 + $0x1c8] sm:$0xff] }
 0x291   : > { %v2580_v49 = vrot.slane %v2558_v39, %v14794_v5  ;;  %v2559_v6 = vcombine.high %v2557_v3, %v2557_v3  ;;  %v2588_v11 = vcombine.high %v2566_v56, %v2566_v56  ;;  %v547_v39 = vld [vmem:[%s14783_s23 + $0x7c8] sm:$0x11] }
 0x292   : > { %v1414_v60 = vcombine.high %v1404_v48, %v1404_v48 }
 0x293   : > { %v2587_v16 = vrot.slane %v2559_v6, %v14794_v5  ;;  %v549_v6 = vld [vmem:[%s14783_s23 + $0x7d8] sm:$0x11] }
 0x295   : > { %7299 = vmatmul.mubr.bf16.vlgmr.msra.gmra.mrb[0].mxu1 %v1315_v43  ;;  %v13299_v43 = vcombine.low %v350_v23, %v542_v24  ;;  %v2573_v23 = vrot.slane %v2557_v3, %v14794_v5  ;;  %v450_v24 = vld [vmem:[%s14783_s23 + $0x4c0] sm:$0xff] }
 0x296   : > { %11139 = vmatmul.mubr.bf16.vlgmr.msra.gmra.mrb[0].mxu0 %v2491_v47  ;;  %7307 = vmatpush1.bf16.xpose.msra.mxu1 %v13291_v46  ;;  %v639_v46 = vld [vmem:[%s14783_s23 + $0xaa8] sm:$0x11]  ;;  %v13491_v47 = vcombine.low %v446_v27, %v638_v28  ;;  %v2591_v28 = vcombine.high %v2587_v16, %v2587_v16 }
 0x297   : > { %11147 = vmatpush1.bf16.xpose.msra.mxu0 %v13483_v50  ;;  %7338 = vmatprep.mubr.bf16.mxu1 %v1355_v51  ;;  %v13302_v50 = vcombine.high %v351_v41, %v543_v42  ;;  %v13494_v51 = vcombine.high %v447_v45, %v639_v46 }
 0x298   : > { %11178 = vmatprep.mubr.bf16.mxu0 %v2531_v52  ;;  %7346 = vmatprep.subr.bf16.mxu1 %v13294_v53  ;;  %v1390_v52 = vrot.slane %v1374_v36, %v14794_v5  ;;  %v352_v53 = vld [vmem:[%s14783_s23 + $0x1b0] sm:$0xff] }
 0x299   : > { %11186 = vmatprep.subr.bf16.mxu0 %v13486_v54  ;;  %v544_v54 = vld [vmem:[%s14783_s23 + $0x7b0] sm:$0x11] }
 0x29a   : > { %v1412_v7 = vcombine.high %v1390_v52, %v1390_v52 }
 0x2a1   : > { %7339 = vmatmul.mubr.bf16.vlgmr.msra.gmra.mrb[0].mxu1 %v1341_v55  ;;  %v13301_v55 = vcombine.low %v351_v41, %v543_v42  ;;  %v2589_v41 = vcombine.high %v2573_v23, %v2573_v23  ;;  %v451_v42 = vld [vmem:[%s14783_s23 + $0x4c8] sm:$0xff] }
 0x2a2   : > { %11179 = vmatmul.mubr.bf16.vlgmr.msra.gmra.mrb[0].mxu0 %v2517_v59  ;;  %7347 = vmatpush1.bf16.xpose.msra.mxu1 %v13293_v58  ;;  %v640_v58 = vld [vmem:[%s14783_s23 + $0xab0] sm:$0x11]  ;;  %v13493_v59 = vcombine.low %v447_v45, %v639_v46 }
 0x2a3   : > { %11187 = vmatpush1.bf16.xpose.msra.mxu0 %v13485_v62  ;;  %7378 = vmatprep.mubr.bf16.mxu1 %v1365_v63  ;;  %v2590_v62 = vcombine.high %v2580_v49, %v2580_v49  ;;  %v13304_v63 = vcombine.high %v352_v53, %v544_v54 }
 0x2a4   : > { %11218 = vmatprep.mubr.bf16.mxu0 %v2541_v1  ;;  %7386 = vmatprep.subr.bf16.mxu1 %v13296_v2  ;;  %v13496_v1 = vcombine.high %v448_v57, %v640_v58  ;;  %v1381_v2 = vrot.slane %v1367_v61, %v14794_v5 }
 0x2a5   : > { %11226 = vmatprep.subr.bf16.mxu0 %v13488_v4 }
 0x2a6   : > { %v1383_v4 = vcombine.high %v1381_v2, %v1381_v2 }
 0x2a8   : > { %v1411_v15 = vrot.slane %v1383_v4, %v14794_v5  ;;  %v357_v4 = vld [vmem:[%s14783_s23 + $0x1d8] sm:$0xff] }
 0x2aa   : > { %v1415_v27 = vcombine.high %v1411_v15, %v1411_v15 }
 0x2ad   : > { %7379 = vmatmul.mubr.bf16.vlgmr.msra.gmra.mrb[0].mxu1 %v1363_v10  ;;  %v13303_v10 = vcombine.low %v352_v53, %v544_v54  ;;  %v452_v54 = vld [vmem:[%s14783_s23 + $0x4d0] sm:$0xff] }
 0x2ae   : > { %11219 = vmatmul.mubr.bf16.vlgmr.msra.gmra.mrb[0].mxu0 %v2539_v14  ;;  %7387 = vmatpush1.bf16.xpose.msra.mxu1 %v13295_v13  ;;  %v641_v13 = vld [vmem:[%s14783_s23 + $0xab8] sm:$0x11]  ;;  %v13495_v14 = vcombine.low %v448_v57, %v640_v58 }
 0x2af   : > { %11227 = vmatpush1.bf16.xpose.msra.mxu0 %v13487_v17  ;;  %7418 = vmatprep.mubr.bf16.mxu1 %v1362_v18  ;;  %v13306_v17 = vcombine.high %v353_v8, %v545_v9  ;;  %v13498_v18 = vcombine.high %v449_v12, %v641_v13 }
 0x2b0   : > { %11258 = vmatprep.mubr.bf16.mxu0 %v2538_v19  ;;  %7426 = vmatprep.subr.bf16.mxu1 %v13298_v20  ;;  %v1397_v19 = vrot.slane %v1381_v2, %v14794_v5  ;;  %v354_v20 = vld [vmem:[%s14783_s23 + $0x1c0] sm:$0xff] }
 0x2b1   : > { %11266 = vmatprep.subr.bf16.mxu0 %v13490_v21  ;;  %v546_v21 = vld [vmem:[%s14783_s23 + $0x7c0] sm:$0x11] }
 0x2b2   : > { %v1413_v37 = vcombine.high %v1397_v19, %v1397_v19 }
 0x2b9   : > { %7419 = vmatmul.mubr.bf16.vlgmr.msra.gmra.mrb[0].mxu1 %v1348_v22  ;;  %v13305_v22 = vcombine.low %v353_v8, %v545_v9  ;;  %v453_v9 = vld [vmem:[%s14783_s23 + $0x4d8] sm:$0xff] }
 0x2ba   : > { %11259 = vmatmul.mubr.bf16.vlgmr.msra.gmra.mrb[0].mxu0 %v2524_v26  ;;  %7427 = vmatpush1.bf16.xpose.msra.mxu1 %v13297_v25  ;;  %v642_v25 = vld [vmem:[%s14783_s23 + $0xac0] sm:$0x11]  ;;  %v13497_v26 = vcombine.low %v449_v12, %v641_v13 }
 0x2bb   : > { %11267 = vmatpush1.bf16.xpose.msra.mxu0 %v13489_v29  ;;  %7458 = vmatprep.mubr.bf16.mxu1 %v1366_v30  ;;  %v13308_v29 = vcombine.high %v354_v20, %v546_v21  ;;  %v264_v30 = vld [vmem:[%s14799_s27 + $0x70] sm:$0xff] }
 0x2bc   : > { %11298 = vmatprep.mubr.bf16.mxu0 %v2542_v31  ;;  %7466 = vmatprep.subr.bf16.mxu1 %v13300_v32  ;;  %v13500_v31 = vcombine.high %v450_v24, %v642_v25  ;;  %v288_v32 = vld [vmem:[%s14799_s27 + $0x130] sm:$0xff]  ;;  %v1423_v33 = vrot.slane %v264_v30, %v14794_v5  ;;  %v1416_v58 = vcombine.high %v264_v30, %v264_v30 }
 0x2bd   : > { %11306 = vmatprep.subr.bf16.mxu0 %v13492_v34  ;;  %v2599_v34 = vrot.slane %v288_v32, %v14794_v5  ;;  %v2592_v61 = vcombine.high %v288_v32, %v288_v32 }
 0x2be   : > { %v1431_v35 = vcombine.high %v1423_v33, %v1423_v33 }
 0x2bf   : > { %v2607_v36 = vcombine.high %v2599_v34, %v2599_v34  ;;  %v2615_v53 = vrot.slane %v2599_v34, %v14794_v5  ;;  %v2606_v0 = vrot.slane %v2592_v61, %v14794_v5 }
 0x2c0   : > { %v1453_v45 = vrot.slane %v1431_v35, %v14794_v5  ;;  %v359_v35 = vld [vmem:[%s14783_s23 + $0x1e8] sm:$0xff] }
 0x2c1   : > { %v2629_v46 = vrot.slane %v2607_v36, %v14794_v5  ;;  %v2608_v2 = vcombine.high %v2606_v0, %v2606_v0  ;;  %v2637_v8 = vcombine.high %v2615_v53, %v2615_v53  ;;  %v551_v36 = vld [vmem:[%s14783_s23 + $0x7e8] sm:$0x11] }
 0x2c2   : > { %v1463_v57 = vcombine.high %v1453_v45, %v1453_v45 }
 0x2c3   : > { %v2636_v13 = vrot.slane %v2608_v2, %v14794_v5  ;;  %v553_v2 = vld [vmem:[%s14783_s23 + $0x7f8] sm:$0x11] }
 0x2c5   : > { %7459 = vmatmul.mubr.bf16.vlgmr.msra.gmra.mrb[0].mxu1 %v1364_v40  ;;  %v13307_v40 = vcombine.low %v354_v20, %v546_v21  ;;  %v2622_v20 = vrot.slane %v2606_v0, %v14794_v5  ;;  %v454_v21 = vld [vmem:[%s14783_s23 + $0x4e0] sm:$0xff] }
 0x2c6   : > { %11299 = vmatmul.mubr.bf16.vlgmr.msra.gmra.mrb[0].mxu0 %v2540_v44  ;;  %7467 = vmatpush1.bf16.xpose.msra.mxu1 %v13299_v43  ;;  %v643_v43 = vld [vmem:[%s14783_s23 + $0xac8] sm:$0x11]  ;;  %v13499_v44 = vcombine.low %v450_v24, %v642_v25  ;;  %v2640_v25 = vcombine.high %v2636_v13, %v2636_v13 }
 0x2c7   : > { %11307 = vmatpush1.bf16.xpose.msra.mxu0 %v13491_v47  ;;  %7498 = vmatprep.mubr.bf16.mxu1 %v1404_v48  ;;  %v13310_v47 = vcombine.high %v355_v38, %v547_v39  ;;  %v13502_v48 = vcombine.high %v451_v42, %v643_v43 }
 0x2c8   : > { %11338 = vmatprep.mubr.bf16.mxu0 %v2580_v49  ;;  %7506 = vmatprep.subr.bf16.mxu1 %v13302_v50  ;;  %v1439_v49 = vrot.slane %v1423_v33, %v14794_v5  ;;  %v356_v50 = vld [vmem:[%s14783_s23 + $0x1d0] sm:$0xff] }
 0x2c9   : > { %11346 = vmatprep.subr.bf16.mxu0 %v13494_v51  ;;  %v548_v51 = vld [vmem:[%s14783_s23 + $0x7d0] sm:$0x11] }
 0x2ca   : > { %v1461_v3 = vcombine.high %v1439_v49, %v1439_v49 }
 0x2d1   : > { %7499 = vmatmul.mubr.bf16.vlgmr.msra.gmra.mrb[0].mxu1 %v1390_v52  ;;  %v13309_v52 = vcombine.low %v355_v38, %v547_v39  ;;  %v2638_v38 = vcombine.high %v2622_v20, %v2622_v20  ;;  %v455_v39 = vld [vmem:[%s14783_s23 + $0x4e8] sm:$0xff] }
 0x2d2   : > { %11339 = vmatmul.mubr.bf16.vlgmr.msra.gmra.mrb[0].mxu0 %v2566_v56  ;;  %7507 = vmatpush1.bf16.xpose.msra.mxu1 %v13301_v55  ;;  %v644_v55 = vld [vmem:[%s14783_s23 + $0xad0] sm:$0x11]  ;;  %v13501_v56 = vcombine.low %v451_v42, %v643_v43 }
 0x2d3   : > { %11347 = vmatpush1.bf16.xpose.msra.mxu0 %v13493_v59  ;;  %7538 = vmatprep.mubr.bf16.mxu1 %v1414_v60  ;;  %v2639_v59 = vcombine.high %v2629_v46, %v2629_v46  ;;  %v13312_v60 = vcombine.high %v356_v50, %v548_v51 }
 0x2d4   : > { %11378 = vmatprep.mubr.bf16.mxu0 %v2590_v62  ;;  %7546 = vmatprep.subr.bf16.mxu1 %v13304_v63  ;;  %v13504_v62 = vcombine.high %v452_v54, %v644_v55  ;;  %v1430_v63 = vrot.slane %v1416_v58, %v14794_v5 }
 0x2d5   : > { %11386 = vmatprep.subr.bf16.mxu0 %v13496_v1 }
 0x2d6   : > { %v1432_v1 = vcombine.high %v1430_v63, %v1430_v63 }
 0x2d8   : > { %v1460_v12 = vrot.slane %v1432_v1, %v14794_v5  ;;  %v361_v1 = vld [vmem:[%s14783_s23 + $0x1f8] sm:$0xff] }
 0x2da   : > { %v1464_v24 = vcombine.high %v1460_v12, %v1460_v12 }
 0x2dd   : > { %7539 = vmatmul.mubr.bf16.vlgmr.msra.gmra.mrb[0].mxu1 %v1412_v7  ;;  %v13311_v7 = vcombine.low %v356_v50, %v548_v51  ;;  %v456_v51 = vld [vmem:[%s14783_s23 + $0x4f0] sm:$0xff] }
 0x2de   : > { %11379 = vmatmul.mubr.bf16.vlgmr.msra.gmra.mrb[0].mxu0 %v2588_v11  ;;  %7547 = vmatpush1.bf16.xpose.msra.mxu1 %v13303_v10  ;;  %v645_v10 = vld [vmem:[%s14783_s23 + $0xad8] sm:$0x11]  ;;  %v13503_v11 = vcombine.low %v452_v54, %v644_v55 }
 0x2df   : > { %11387 = vmatpush1.bf16.xpose.msra.mxu0 %v13495_v14  ;;  %7578 = vmatprep.mubr.bf16.mxu1 %v1411_v15  ;;  %v13314_v14 = vcombine.high %v357_v4, %v549_v6  ;;  %v13506_v15 = vcombine.high %v453_v9, %v645_v10 }
 0x2e0   : > { %11418 = vmatprep.mubr.bf16.mxu0 %v2587_v16  ;;  %7586 = vmatprep.subr.bf16.mxu1 %v13306_v17  ;;  %v1446_v16 = vrot.slane %v1430_v63, %v14794_v5  ;;  %v358_v17 = vld [vmem:[%s14783_s23 + $0x1e0] sm:$0xff] }
 0x2e1   : > { %11426 = vmatprep.subr.bf16.mxu0 %v13498_v18  ;;  %v550_v18 = vld [vmem:[%s14783_s23 + $0x7e0] sm:$0x11] }
 0x2e2   : > { %v1462_v34 = vcombine.high %v1446_v16, %v1446_v16 }
 0x2e9   : > { %7579 = vmatmul.mubr.bf16.vlgmr.msra.gmra.mrb[0].mxu1 %v1397_v19  ;;  %v13313_v19 = vcombine.low %v357_v4, %v549_v6  ;;  %v457_v6 = vld [vmem:[%s14783_s23 + $0x4f8] sm:$0xff] }
 0x2ea   : > { %11419 = vmatmul.mubr.bf16.vlgmr.msra.gmra.mrb[0].mxu0 %v2573_v23  ;;  %7587 = vmatpush1.bf16.xpose.msra.mxu1 %v13305_v22  ;;  %v646_v22 = vld [vmem:[%s14783_s23 + $0xae0] sm:$0x11]  ;;  %v13505_v23 = vcombine.low %v453_v9, %v645_v10 }
 0x2eb   : > { %11427 = vmatpush1.bf16.xpose.msra.mxu0 %v13497_v26  ;;  %7618 = vmatprep.mubr.bf16.mxu1 %v1415_v27  ;;  %v13316_v26 = vcombine.high %v358_v17, %v550_v18  ;;  %v265_v27 = vld [vmem:[%s14799_s27 + $0x78] sm:$0xff] }
 0x2ec   : > { %11458 = vmatprep.mubr.bf16.mxu0 %v2591_v28  ;;  %7626 = vmatprep.subr.bf16.mxu1 %v13308_v29  ;;  %v13508_v28 = vcombine.high %v454_v21, %v646_v22  ;;  %v289_v29 = vld [vmem:[%s14799_s27 + $0x138] sm:$0xff]  ;;  %v1472_v30 = vrot.slane %v265_v27, %v14794_v5  ;;  %v1465_v55 = vcombine.high %v265_v27, %v265_v27 }
 0x2ed   : > { %11466 = vmatprep.subr.bf16.mxu0 %v13500_v31  ;;  %v2648_v31 = vrot.slane %v289_v29, %v14794_v5  ;;  %v2641_v58 = vcombine.high %v289_v29, %v289_v29 }
 0x2ee   : > { %v1480_v32 = vcombine.high %v1472_v30, %v1472_v30 }
 0x2ef   : > { %v2656_v33 = vcombine.high %v2648_v31, %v2648_v31  ;;  %v2664_v50 = vrot.slane %v2648_v31, %v14794_v5  ;;  %v2655_v61 = vrot.slane %v2641_v58, %v14794_v5 }
 0x2f0   : > { %v1502_v42 = vrot.slane %v1480_v32, %v14794_v5  ;;  %v363_v32 = vld [vmem:[%s14783_s23 + $0x208] sm:$0xff] }
 0x2f1   : > { %v2678_v43 = vrot.slane %v2656_v33, %v14794_v5  ;;  %v2657_v63 = vcombine.high %v2655_v61, %v2655_v61  ;;  %v2686_v4 = vcombine.high %v2664_v50, %v2664_v50  ;;  %v555_v33 = vld [vmem:[%s14783_s23 + $0x808] sm:$0x11] }
 0x2f2   : > { %v1512_v54 = vcombine.high %v1502_v42, %v1502_v42 }
 0x2f3   : > { %v2685_v10 = vrot.slane %v2657_v63, %v14794_v5  ;;  %v557_v63 = vld [vmem:[%s14783_s23 + $0x818] sm:$0x11] }
 0x2f5   : > { %7619 = vmatmul.mubr.bf16.vlgmr.msra.gmra.mrb[0].mxu1 %v1413_v37  ;;  %v13315_v37 = vcombine.low %v358_v17, %v550_v18  ;;  %v2671_v17 = vrot.slane %v2655_v61, %v14794_v5  ;;  %v458_v18 = vld [vmem:[%s14783_s23 + $0x500] sm:$0xff] }
 0x2f6   : > { %11459 = vmatmul.mubr.bf16.vlgmr.msra.gmra.mrb[0].mxu0 %v2589_v41  ;;  %7627 = vmatpush1.bf16.xpose.msra.mxu1 %v13307_v40  ;;  %v647_v40 = vld [vmem:[%s14783_s23 + $0xae8] sm:$0x11]  ;;  %v13507_v41 = vcombine.low %v454_v21, %v646_v22  ;;  %v2689_v22 = vcombine.high %v2685_v10, %v2685_v10 }
 0x2f7   : > { %11467 = vmatpush1.bf16.xpose.msra.mxu0 %v13499_v44  ;;  %7658 = vmatprep.mubr.bf16.mxu1 %v1453_v45  ;;  %v13318_v44 = vcombine.high %v359_v35, %v551_v36  ;;  %v13510_v45 = vcombine.high %v455_v39, %v647_v40 }
 0x2f8   : > { %11498 = vmatprep.mubr.bf16.mxu0 %v2629_v46  ;;  %7666 = vmatprep.subr.bf16.mxu1 %v13310_v47  ;;  %v1488_v46 = vrot.slane %v1472_v30, %v14794_v5  ;;  %v360_v47 = vld [vmem:[%s14783_s23 + $0x1f0] sm:$0xff] }
 0x2f9   : > { %11506 = vmatprep.subr.bf16.mxu0 %v13502_v48  ;;  %v552_v48 = vld [vmem:[%s14783_s23 + $0x7f0] sm:$0x11] }
 0x2fa   : > { %v1510_v0 = vcombine.high %v1488_v46, %v1488_v46 }
 0x301   : > { %7659 = vmatmul.mubr.bf16.vlgmr.msra.gmra.mrb[0].mxu1 %v1439_v49  ;;  %v13317_v49 = vcombine.low %v359_v35, %v551_v36  ;;  %v2687_v35 = vcombine.high %v2671_v17, %v2671_v17  ;;  %v459_v36 = vld [vmem:[%s14783_s23 + $0x508] sm:$0xff] }
 0x302   : > { %11499 = vmatmul.mubr.bf16.vlgmr.msra.gmra.mrb[0].mxu0 %v2615_v53  ;;  %7667 = vmatpush1.bf16.xpose.msra.mxu1 %v13309_v52  ;;  %v648_v52 = vld [vmem:[%s14783_s23 + $0xaf0] sm:$0x11]  ;;  %v13509_v53 = vcombine.low %v455_v39, %v647_v40 }
 0x303   : > { %11507 = vmatpush1.bf16.xpose.msra.mxu0 %v13501_v56  ;;  %7698 = vmatprep.mubr.bf16.mxu1 %v1463_v57  ;;  %v2688_v56 = vcombine.high %v2678_v43, %v2678_v43  ;;  %v13320_v57 = vcombine.high %v360_v47, %v552_v48 }
 0x304   : > { %11538 = vmatprep.mubr.bf16.mxu0 %v2639_v59  ;;  %7706 = vmatprep.subr.bf16.mxu1 %v13312_v60  ;;  %v13512_v59 = vcombine.high %v456_v51, %v648_v52  ;;  %v1479_v60 = vrot.slane %v1465_v55, %v14794_v5 }
 0x305   : > { %11546 = vmatprep.subr.bf16.mxu0 %v13504_v62 }
 0x306   : > { %v1481_v62 = vcombine.high %v1479_v60, %v1479_v60 }
 0x308   : > { %v1509_v9 = vrot.slane %v1481_v62, %v14794_v5  ;;  %v365_v62 = vld [vmem:[%s14783_s23 + $0x218] sm:$0xff] }
 0x30a   : > { %v1513_v21 = vcombine.high %v1509_v9, %v1509_v9 }
 0x30d   : > { %7699 = vmatmul.mubr.bf16.vlgmr.msra.gmra.mrb[0].mxu1 %v1461_v3  ;;  %v13319_v3 = vcombine.low %v360_v47, %v552_v48  ;;  %v460_v48 = vld [vmem:[%s14783_s23 + $0x510] sm:$0xff] }
 0x30e   : > { %11539 = vmatmul.mubr.bf16.vlgmr.msra.gmra.mrb[0].mxu0 %v2637_v8  ;;  %7707 = vmatpush1.bf16.xpose.msra.mxu1 %v13311_v7  ;;  %v649_v7 = vld [vmem:[%s14783_s23 + $0xaf8] sm:$0x11]  ;;  %v13511_v8 = vcombine.low %v456_v51, %v648_v52 }
 0x30f   : > { %11547 = vmatpush1.bf16.xpose.msra.mxu0 %v13503_v11  ;;  %7738 = vmatprep.mubr.bf16.mxu1 %v1460_v12  ;;  %v13322_v11 = vcombine.high %v361_v1, %v553_v2  ;;  %v13514_v12 = vcombine.high %v457_v6, %v649_v7 }
 0x310   : > { %11578 = vmatprep.mubr.bf16.mxu0 %v2636_v13  ;;  %7746 = vmatprep.subr.bf16.mxu1 %v13314_v14  ;;  %v1495_v13 = vrot.slane %v1479_v60, %v14794_v5  ;;  %v362_v14 = vld [vmem:[%s14783_s23 + $0x200] sm:$0xff] }
 0x311   : > { %11586 = vmatprep.subr.bf16.mxu0 %v13506_v15  ;;  %v554_v15 = vld [vmem:[%s14783_s23 + $0x800] sm:$0x11] }
 0x312   : > { %v1511_v31 = vcombine.high %v1495_v13, %v1495_v13 }
 0x319   : > { %7739 = vmatmul.mubr.bf16.vlgmr.msra.gmra.mrb[0].mxu1 %v1446_v16  ;;  %v13321_v16 = vcombine.low %v361_v1, %v553_v2  ;;  %v461_v2 = vld [vmem:[%s14783_s23 + $0x518] sm:$0xff] }
 0x31a   : > { %11579 = vmatmul.mubr.bf16.vlgmr.msra.gmra.mrb[0].mxu0 %v2622_v20  ;;  %7747 = vmatpush1.bf16.xpose.msra.mxu1 %v13313_v19  ;;  %v650_v19 = vld [vmem:[%s14783_s23 + $0xb00] sm:$0x11]  ;;  %v13513_v20 = vcombine.low %v457_v6, %v649_v7 }
 0x31b   : > { %11587 = vmatpush1.bf16.xpose.msra.mxu0 %v13505_v23  ;;  %7778 = vmatprep.mubr.bf16.mxu1 %v1464_v24  ;;  %v13324_v23 = vcombine.high %v362_v14, %v554_v15  ;;  %v266_v24 = vld [vmem:[%s14799_s27 + $0x80] sm:$0xff] }
 0x31c   : > { %11618 = vmatprep.mubr.bf16.mxu0 %v2640_v25  ;;  %7786 = vmatprep.subr.bf16.mxu1 %v13316_v26  ;;  %v13516_v25 = vcombine.high %v458_v18, %v650_v19  ;;  %v290_v26 = vld [vmem:[%s14799_s27 + $0x140] sm:$0xff]  ;;  %v1521_v27 = vrot.slane %v266_v24, %v14794_v5  ;;  %v1514_v52 = vcombine.high %v266_v24, %v266_v24 }
 0x31d   : > { %11626 = vmatprep.subr.bf16.mxu0 %v13508_v28  ;;  %v2697_v28 = vrot.slane %v290_v26, %v14794_v5  ;;  %v2690_v55 = vcombine.high %v290_v26, %v290_v26 }
 0x31e   : > { %v1529_v29 = vcombine.high %v1521_v27, %v1521_v27 }
 0x31f   : > { %v2705_v30 = vcombine.high %v2697_v28, %v2697_v28  ;;  %v2713_v47 = vrot.slane %v2697_v28, %v14794_v5  ;;  %v2704_v58 = vrot.slane %v2690_v55, %v14794_v5 }
 0x320   : > { %v1551_v39 = vrot.slane %v1529_v29, %v14794_v5  ;;  %v367_v29 = vld [vmem:[%s14783_s23 + $0x228] sm:$0xff] }
 0x321   : > { %v2727_v40 = vrot.slane %v2705_v30, %v14794_v5  ;;  %v2706_v60 = vcombine.high %v2704_v58, %v2704_v58  ;;  %v2735_v1 = vcombine.high %v2713_v47, %v2713_v47  ;;  %v559_v30 = vld [vmem:[%s14783_s23 + $0x828] sm:$0x11] }
 0x322   : > { %v1561_v51 = vcombine.high %v1551_v39, %v1551_v39 }
 0x323   : > { %v2734_v7 = vrot.slane %v2706_v60, %v14794_v5  ;;  %v561_v60 = vld [vmem:[%s14783_s23 + $0x838] sm:$0x11] }
 0x325   : > { %7779 = vmatmul.mubr.bf16.vlgmr.msra.gmra.mrb[0].mxu1 %v1462_v34  ;;  %v13323_v34 = vcombine.low %v362_v14, %v554_v15  ;;  %v2720_v14 = vrot.slane %v2704_v58, %v14794_v5  ;;  %v462_v15 = vld [vmem:[%s14783_s23 + $0x520] sm:$0xff] }
 0x326   : > { %11619 = vmatmul.mubr.bf16.vlgmr.msra.gmra.mrb[0].mxu0 %v2638_v38  ;;  %7787 = vmatpush1.bf16.xpose.msra.mxu1 %v13315_v37  ;;  %v651_v37 = vld [vmem:[%s14783_s23 + $0xb08] sm:$0x11]  ;;  %v13515_v38 = vcombine.low %v458_v18, %v650_v19  ;;  %v2738_v19 = vcombine.high %v2734_v7, %v2734_v7 }
 0x327   : > { %11627 = vmatpush1.bf16.xpose.msra.mxu0 %v13507_v41  ;;  %7818 = vmatprep.mubr.bf16.mxu1 %v1502_v42  ;;  %v13326_v41 = vcombine.high %v363_v32, %v555_v33  ;;  %v13518_v42 = vcombine.high %v459_v36, %v651_v37 }
 0x328   : > { %11658 = vmatprep.mubr.bf16.mxu0 %v2678_v43  ;;  %7826 = vmatprep.subr.bf16.mxu1 %v13318_v44  ;;  %v1537_v43 = vrot.slane %v1521_v27, %v14794_v5  ;;  %v364_v44 = vld [vmem:[%s14783_s23 + $0x210] sm:$0xff] }
 0x329   : > { %11666 = vmatprep.subr.bf16.mxu0 %v13510_v45  ;;  %v556_v45 = vld [vmem:[%s14783_s23 + $0x810] sm:$0x11] }
 0x32a   : > { %v1559_v61 = vcombine.high %v1537_v43, %v1537_v43 }
 0x331   : > { %7819 = vmatmul.mubr.bf16.vlgmr.msra.gmra.mrb[0].mxu1 %v1488_v46  ;;  %v13325_v46 = vcombine.low %v363_v32, %v555_v33  ;;  %v2736_v32 = vcombine.high %v2720_v14, %v2720_v14  ;;  %v463_v33 = vld [vmem:[%s14783_s23 + $0x528] sm:$0xff] }
 0x332   : > { %11659 = vmatmul.mubr.bf16.vlgmr.msra.gmra.mrb[0].mxu0 %v2664_v50  ;;  %7827 = vmatpush1.bf16.xpose.msra.mxu1 %v13317_v49  ;;  %v652_v49 = vld [vmem:[%s14783_s23 + $0xb10] sm:$0x11]  ;;  %v13517_v50 = vcombine.low %v459_v36, %v651_v37 }
 0x333   : > { %11667 = vmatpush1.bf16.xpose.msra.mxu0 %v13509_v53  ;;  %7858 = vmatprep.mubr.bf16.mxu1 %v1512_v54  ;;  %v2737_v53 = vcombine.high %v2727_v40, %v2727_v40  ;;  %v13328_v54 = vcombine.high %v364_v44, %v556_v45 }
 0x334   : > { %11698 = vmatprep.mubr.bf16.mxu0 %v2688_v56  ;;  %7866 = vmatprep.subr.bf16.mxu1 %v13320_v57  ;;  %v13520_v56 = vcombine.high %v460_v48, %v652_v49  ;;  %v1528_v57 = vrot.slane %v1514_v52, %v14794_v5 }
 0x335   : > { %11706 = vmatprep.subr.bf16.mxu0 %v13512_v59 }
 0x336   : > { %v1530_v59 = vcombine.high %v1528_v57, %v1528_v57 }
 0x338   : > { %v1558_v6 = vrot.slane %v1530_v59, %v14794_v5  ;;  %v369_v59 = vld [vmem:[%s14783_s23 + $0x238] sm:$0xff] }
 0x33a   : > { %v1562_v18 = vcombine.high %v1558_v6, %v1558_v6 }
 0x33d   : > { %7859 = vmatmul.mubr.bf16.vlgmr.msra.gmra.mrb[0].mxu1 %v1510_v0  ;;  %v13327_v0 = vcombine.low %v364_v44, %v556_v45  ;;  %v464_v45 = vld [vmem:[%s14783_s23 + $0x530] sm:$0xff] }
 0x33e   : > { %11699 = vmatmul.mubr.bf16.vlgmr.msra.gmra.mrb[0].mxu0 %v2686_v4  ;;  %7867 = vmatpush1.bf16.xpose.msra.mxu1 %v13319_v3  ;;  %v653_v3 = vld [vmem:[%s14783_s23 + $0xb18] sm:$0x11]  ;;  %v13519_v4 = vcombine.low %v460_v48, %v652_v49 }
 0x33f   : > { %11707 = vmatpush1.bf16.xpose.msra.mxu0 %v13511_v8  ;;  %7898 = vmatprep.mubr.bf16.mxu1 %v1509_v9  ;;  %v13330_v8 = vcombine.high %v365_v62, %v557_v63  ;;  %v13522_v9 = vcombine.high %v461_v2, %v653_v3 }
 0x340   : > { %11738 = vmatprep.mubr.bf16.mxu0 %v2685_v10  ;;  %7906 = vmatprep.subr.bf16.mxu1 %v13322_v11  ;;  %v1544_v10 = vrot.slane %v1528_v57, %v14794_v5  ;;  %v366_v11 = vld [vmem:[%s14783_s23 + $0x220] sm:$0xff] }
 0x341   : > { %11746 = vmatprep.subr.bf16.mxu0 %v13514_v12  ;;  %v558_v12 = vld [vmem:[%s14783_s23 + $0x820] sm:$0x11] }
 0x342   : > { %v1560_v28 = vcombine.high %v1544_v10, %v1544_v10 }
 0x349   : > { %7899 = vmatmul.mubr.bf16.vlgmr.msra.gmra.mrb[0].mxu1 %v1495_v13  ;;  %v13329_v13 = vcombine.low %v365_v62, %v557_v63  ;;  %v465_v63 = vld [vmem:[%s14783_s23 + $0x538] sm:$0xff] }
 0x34a   : > { %11739 = vmatmul.mubr.bf16.vlgmr.msra.gmra.mrb[0].mxu0 %v2671_v17  ;;  %7907 = vmatpush1.bf16.xpose.msra.mxu1 %v13321_v16  ;;  %v654_v16 = vld [vmem:[%s14783_s23 + $0xb20] sm:$0x11]  ;;  %v13521_v17 = vcombine.low %v461_v2, %v653_v3 }
 0x34b   : > { %11747 = vmatpush1.bf16.xpose.msra.mxu0 %v13513_v20  ;;  %7938 = vmatprep.mubr.bf16.mxu1 %v1513_v21  ;;  %v13332_v20 = vcombine.high %v366_v11, %v558_v12  ;;  %v267_v21 = vld [vmem:[%s14799_s27 + $0x88] sm:$0xff] }
 0x34c   : > { %11778 = vmatprep.mubr.bf16.mxu0 %v2689_v22  ;;  %7946 = vmatprep.subr.bf16.mxu1 %v13324_v23  ;;  %v13524_v22 = vcombine.high %v462_v15, %v654_v16  ;;  %v291_v23 = vld [vmem:[%s14799_s27 + $0x148] sm:$0xff]  ;;  %v1570_v24 = vrot.slane %v267_v21, %v14794_v5  ;;  %v1563_v49 = vcombine.high %v267_v21, %v267_v21 }
 0x34d   : > { %11786 = vmatprep.subr.bf16.mxu0 %v13516_v25  ;;  %v2746_v25 = vrot.slane %v291_v23, %v14794_v5  ;;  %v2739_v52 = vcombine.high %v291_v23, %v291_v23 }
 0x34e   : > { %v1578_v26 = vcombine.high %v1570_v24, %v1570_v24 }
 0x34f   : > { %v2754_v27 = vcombine.high %v2746_v25, %v2746_v25  ;;  %v2762_v44 = vrot.slane %v2746_v25, %v14794_v5  ;;  %v2753_v55 = vrot.slane %v2739_v52, %v14794_v5 }
 0x350   : > { %v1600_v36 = vrot.slane %v1578_v26, %v14794_v5  ;;  %v371_v26 = vld [vmem:[%s14783_s23 + $0x248] sm:$0xff] }
 0x351   : > { %v2776_v37 = vrot.slane %v2754_v27, %v14794_v5  ;;  %v2755_v57 = vcombine.high %v2753_v55, %v2753_v55  ;;  %v2784_v62 = vcombine.high %v2762_v44, %v2762_v44  ;;  %v563_v27 = vld [vmem:[%s14783_s23 + $0x848] sm:$0x11] }
 0x352   : > { %v1610_v48 = vcombine.high %v1600_v36, %v1600_v36 }
 0x353   : > { %v2783_v3 = vrot.slane %v2755_v57, %v14794_v5  ;;  %v565_v57 = vld [vmem:[%s14783_s23 + $0x858] sm:$0x11] }
 0x355   : > { %7939 = vmatmul.mubr.bf16.vlgmr.msra.gmra.mrb[0].mxu1 %v1511_v31  ;;  %v13331_v31 = vcombine.low %v366_v11, %v558_v12  ;;  %v2769_v11 = vrot.slane %v2753_v55, %v14794_v5  ;;  %v466_v12 = vld [vmem:[%s14783_s23 + $0x540] sm:$0xff] }
 0x356   : > { %11779 = vmatmul.mubr.bf16.vlgmr.msra.gmra.mrb[0].mxu0 %v2687_v35  ;;  %7947 = vmatpush1.bf16.xpose.msra.mxu1 %v13323_v34  ;;  %v655_v34 = vld [vmem:[%s14783_s23 + $0xb28] sm:$0x11]  ;;  %v13523_v35 = vcombine.low %v462_v15, %v654_v16  ;;  %v2787_v16 = vcombine.high %v2783_v3, %v2783_v3 }
 0x357   : > { %11787 = vmatpush1.bf16.xpose.msra.mxu0 %v13515_v38  ;;  %7978 = vmatprep.mubr.bf16.mxu1 %v1551_v39  ;;  %v13334_v38 = vcombine.high %v367_v29, %v559_v30  ;;  %v13526_v39 = vcombine.high %v463_v33, %v655_v34 }
 0x358   : > { %11818 = vmatprep.mubr.bf16.mxu0 %v2727_v40  ;;  %7986 = vmatprep.subr.bf16.mxu1 %v13326_v41  ;;  %v1586_v40 = vrot.slane %v1570_v24, %v14794_v5  ;;  %v368_v41 = vld [vmem:[%s14783_s23 + $0x230] sm:$0xff] }
 0x359   : > { %11826 = vmatprep.subr.bf16.mxu0 %v13518_v42  ;;  %v560_v42 = vld [vmem:[%s14783_s23 + $0x830] sm:$0x11] }
 0x35a   : > { %v1608_v58 = vcombine.high %v1586_v40, %v1586_v40 }
 0x361   : > { %7979 = vmatmul.mubr.bf16.vlgmr.msra.gmra.mrb[0].mxu1 %v1537_v43  ;;  %v13333_v43 = vcombine.low %v367_v29, %v559_v30  ;;  %v2785_v29 = vcombine.high %v2769_v11, %v2769_v11  ;;  %v467_v30 = vld [vmem:[%s14783_s23 + $0x548] sm:$0xff] }
 0x362   : > { %11819 = vmatmul.mubr.bf16.vlgmr.msra.gmra.mrb[0].mxu0 %v2713_v47  ;;  %7987 = vmatpush1.bf16.xpose.msra.mxu1 %v13325_v46  ;;  %v656_v46 = vld [vmem:[%s14783_s23 + $0xb30] sm:$0x11]  ;;  %v13525_v47 = vcombine.low %v463_v33, %v655_v34 }
 0x363   : > { %11827 = vmatpush1.bf16.xpose.msra.mxu0 %v13517_v50  ;;  %8018 = vmatprep.mubr.bf16.mxu1 %v1561_v51  ;;  %v2786_v50 = vcombine.high %v2776_v37, %v2776_v37  ;;  %v13336_v51 = vcombine.high %v368_v41, %v560_v42 }
 0x364   : > { %11858 = vmatprep.mubr.bf16.mxu0 %v2737_v53  ;;  %8026 = vmatprep.subr.bf16.mxu1 %v13328_v54  ;;  %v13528_v53 = vcombine.high %v464_v45, %v656_v46  ;;  %v1577_v54 = vrot.slane %v1563_v49, %v14794_v5 }
 0x365   : > { %11866 = vmatprep.subr.bf16.mxu0 %v13520_v56 }
 0x366   : > { %v1579_v56 = vcombine.high %v1577_v54, %v1577_v54 }
 0x368   : > { %v1607_v2 = vrot.slane %v1579_v56, %v14794_v5  ;;  %v373_v56 = vld [vmem:[%s14783_s23 + $0x258] sm:$0xff] }
 0x36a   : > { %v1611_v15 = vcombine.high %v1607_v2, %v1607_v2 }
 0x36d   : > { %8019 = vmatmul.mubr.bf16.vlgmr.msra.gmra.mrb[0].mxu1 %v1559_v61  ;;  %v13335_v61 = vcombine.low %v368_v41, %v560_v42  ;;  %v468_v42 = vld [vmem:[%s14783_s23 + $0x550] sm:$0xff] }
 0x36e   : > { %11859 = vmatmul.mubr.bf16.vlgmr.msra.gmra.mrb[0].mxu0 %v2735_v1  ;;  %8027 = vmatpush1.bf16.xpose.msra.mxu1 %v13327_v0  ;;  %v657_v0 = vld [vmem:[%s14783_s23 + $0xb38] sm:$0x11]  ;;  %v13527_v1 = vcombine.low %v464_v45, %v656_v46 }
 0x36f   : > { %11867 = vmatpush1.bf16.xpose.msra.mxu0 %v13519_v4  ;;  %8058 = vmatprep.mubr.bf16.mxu1 %v1558_v6  ;;  %v13338_v4 = vcombine.high %v369_v59, %v561_v60  ;;  %v13530_v6 = vcombine.high %v465_v63, %v657_v0 }
 0x370   : > { %11898 = vmatprep.mubr.bf16.mxu0 %v2734_v7  ;;  %8066 = vmatprep.subr.bf16.mxu1 %v13330_v8  ;;  %v1593_v7 = vrot.slane %v1577_v54, %v14794_v5  ;;  %v370_v8 = vld [vmem:[%s14783_s23 + $0x240] sm:$0xff] }
 0x371   : > { %11906 = vmatprep.subr.bf16.mxu0 %v13522_v9  ;;  %v562_v9 = vld [vmem:[%s14783_s23 + $0x840] sm:$0x11] }
 0x372   : > { %v1609_v25 = vcombine.high %v1593_v7, %v1593_v7 }
 0x379   : > { %8059 = vmatmul.mubr.bf16.vlgmr.msra.gmra.mrb[0].mxu1 %v1544_v10  ;;  %v13337_v10 = vcombine.low %v369_v59, %v561_v60  ;;  %v469_v60 = vld [vmem:[%s14783_s23 + $0x558] sm:$0xff] }
 0x37a   : > { %11899 = vmatmul.mubr.bf16.vlgmr.msra.gmra.mrb[0].mxu0 %v2720_v14  ;;  %8067 = vmatpush1.bf16.xpose.msra.mxu1 %v13329_v13  ;;  %v658_v13 = vld [vmem:[%s14783_s23 + $0xb40] sm:$0x11]  ;;  %v13529_v14 = vcombine.low %v465_v63, %v657_v0 }
 0x37b   : > { %11907 = vmatpush1.bf16.xpose.msra.mxu0 %v13521_v17  ;;  %8098 = vmatprep.mubr.bf16.mxu1 %v1562_v18  ;;  %v13340_v17 = vcombine.high %v370_v8, %v562_v9  ;;  %v268_v18 = vld [vmem:[%s14799_s27 + $0x90] sm:$0xff] }
 0x37c   : > { %11938 = vmatprep.mubr.bf16.mxu0 %v2738_v19  ;;  %8106 = vmatprep.subr.bf16.mxu1 %v13332_v20  ;;  %v13532_v19 = vcombine.high %v466_v12, %v658_v13  ;;  %v292_v20 = vld [vmem:[%s14799_s27 + $0x150] sm:$0xff]  ;;  %v1619_v21 = vrot.slane %v268_v18, %v14794_v5  ;;  %v1612_v46 = vcombine.high %v268_v18, %v268_v18 }
 0x37d   : > { %11946 = vmatprep.subr.bf16.mxu0 %v13524_v22  ;;  %v2795_v22 = vrot.slane %v292_v20, %v14794_v5  ;;  %v2788_v49 = vcombine.high %v292_v20, %v292_v20 }
 0x37e   : > { %v1627_v23 = vcombine.high %v1619_v21, %v1619_v21 }
 0x37f   : > { %v2803_v24 = vcombine.high %v2795_v22, %v2795_v22  ;;  %v2811_v41 = vrot.slane %v2795_v22, %v14794_v5  ;;  %v2802_v52 = vrot.slane %v2788_v49, %v14794_v5 }
 0x380   : > { %v1649_v33 = vrot.slane %v1627_v23, %v14794_v5  ;;  %v375_v23 = vld [vmem:[%s14783_s23 + $0x268] sm:$0xff] }
 0x381   : > { %v2825_v34 = vrot.slane %v2803_v24, %v14794_v5  ;;  %v2804_v54 = vcombine.high %v2802_v52, %v2802_v52  ;;  %v2833_v59 = vcombine.high %v2811_v41, %v2811_v41  ;;  %v567_v24 = vld [vmem:[%s14783_s23 + $0x868] sm:$0x11] }
 0x382   : > { %v1659_v45 = vcombine.high %v1649_v33, %v1649_v33 }
 0x383   : > { %v2832_v0 = vrot.slane %v2804_v54, %v14794_v5  ;;  %v569_v54 = vld [vmem:[%s14783_s23 + $0x878] sm:$0x11] }
 0x385   : > { %8099 = vmatmul.mubr.bf16.vlgmr.msra.gmra.mrb[0].mxu1 %v1560_v28  ;;  %v13339_v28 = vcombine.low %v370_v8, %v562_v9  ;;  %v2818_v8 = vrot.slane %v2802_v52, %v14794_v5  ;;  %v470_v9 = vld [vmem:[%s14783_s23 + $0x560] sm:$0xff] }
 0x386   : > { %11939 = vmatmul.mubr.bf16.vlgmr.msra.gmra.mrb[0].mxu0 %v2736_v32  ;;  %8107 = vmatpush1.bf16.xpose.msra.mxu1 %v13331_v31  ;;  %v659_v31 = vld [vmem:[%s14783_s23 + $0xb48] sm:$0x11]  ;;  %v13531_v32 = vcombine.low %v466_v12, %v658_v13  ;;  %v2836_v13 = vcombine.high %v2832_v0, %v2832_v0 }
 0x387   : > { %11947 = vmatpush1.bf16.xpose.msra.mxu0 %v13523_v35  ;;  %8138 = vmatprep.mubr.bf16.mxu1 %v1600_v36  ;;  %v13342_v35 = vcombine.high %v371_v26, %v563_v27  ;;  %v13534_v36 = vcombine.high %v467_v30, %v659_v31 }
 0x388   : > { %11978 = vmatprep.mubr.bf16.mxu0 %v2776_v37  ;;  %8146 = vmatprep.subr.bf16.mxu1 %v13334_v38  ;;  %v1635_v37 = vrot.slane %v1619_v21, %v14794_v5  ;;  %v372_v38 = vld [vmem:[%s14783_s23 + $0x250] sm:$0xff] }
 0x389   : > { %11986 = vmatprep.subr.bf16.mxu0 %v13526_v39  ;;  %v564_v39 = vld [vmem:[%s14783_s23 + $0x850] sm:$0x11] }
 0x38a   : > { %v1657_v55 = vcombine.high %v1635_v37, %v1635_v37 }
 0x391   : > { %8139 = vmatmul.mubr.bf16.vlgmr.msra.gmra.mrb[0].mxu1 %v1586_v40  ;;  %v13341_v40 = vcombine.low %v371_v26, %v563_v27  ;;  %v2834_v26 = vcombine.high %v2818_v8, %v2818_v8  ;;  %v471_v27 = vld [vmem:[%s14783_s23 + $0x568] sm:$0xff] }
 0x392   : > { %11979 = vmatmul.mubr.bf16.vlgmr.msra.gmra.mrb[0].mxu0 %v2762_v44  ;;  %8147 = vmatpush1.bf16.xpose.msra.mxu1 %v13333_v43  ;;  %v660_v43 = vld [vmem:[%s14783_s23 + $0xb50] sm:$0x11]  ;;  %v13533_v44 = vcombine.low %v467_v30, %v659_v31 }
 0x393   : > { %11987 = vmatpush1.bf16.xpose.msra.mxu0 %v13525_v47  ;;  %8178 = vmatprep.mubr.bf16.mxu1 %v1610_v48  ;;  %v2835_v47 = vcombine.high %v2825_v34, %v2825_v34  ;;  %v13344_v48 = vcombine.high %v372_v38, %v564_v39 }
 0x394   : > { %12018 = vmatprep.mubr.bf16.mxu0 %v2786_v50  ;;  %8186 = vmatprep.subr.bf16.mxu1 %v13336_v51  ;;  %v13536_v50 = vcombine.high %v468_v42, %v660_v43  ;;  %v1626_v51 = vrot.slane %v1612_v46, %v14794_v5 }
 0x395   : > { %12026 = vmatprep.subr.bf16.mxu0 %v13528_v53 }
 0x396   : > { %v1628_v53 = vcombine.high %v1626_v51, %v1626_v51 }
 0x398   : > { %v1656_v63 = vrot.slane %v1628_v53, %v14794_v5  ;;  %v377_v53 = vld [vmem:[%s14783_s23 + $0x278] sm:$0xff] }
 0x39a   : > { %v1660_v12 = vcombine.high %v1656_v63, %v1656_v63 }
 0x39d   : > { %8179 = vmatmul.mubr.bf16.vlgmr.msra.gmra.mrb[0].mxu1 %v1608_v58  ;;  %v13343_v58 = vcombine.low %v372_v38, %v564_v39  ;;  %v472_v39 = vld [vmem:[%s14783_s23 + $0x570] sm:$0xff] }
 0x39e   : > { %12019 = vmatmul.mubr.bf16.vlgmr.msra.gmra.mrb[0].mxu0 %v2784_v62  ;;  %8187 = vmatpush1.bf16.xpose.msra.mxu1 %v13335_v61  ;;  %v661_v61 = vld [vmem:[%s14783_s23 + $0xb58] sm:$0x11]  ;;  %v13535_v62 = vcombine.low %v468_v42, %v660_v43 }
 0x39f   : > { %12027 = vmatpush1.bf16.xpose.msra.mxu0 %v13527_v1  ;;  %8218 = vmatprep.mubr.bf16.mxu1 %v1607_v2  ;;  %v13346_v1 = vcombine.high %v373_v56, %v565_v57  ;;  %v13538_v2 = vcombine.high %v469_v60, %v661_v61 }
 0x3a0   : > { %12058 = vmatprep.mubr.bf16.mxu0 %v2783_v3  ;;  %8226 = vmatprep.subr.bf16.mxu1 %v13338_v4  ;;  %v1642_v3 = vrot.slane %v1626_v51, %v14794_v5  ;;  %v374_v4 = vld [vmem:[%s14783_s23 + $0x260] sm:$0xff] }
 0x3a1   : > { %12066 = vmatprep.subr.bf16.mxu0 %v13530_v6  ;;  %v566_v6 = vld [vmem:[%s14783_s23 + $0x860] sm:$0x11] }
 0x3a2   : > { %v1658_v22 = vcombine.high %v1642_v3, %v1642_v3 }
 0x3a9   : > { %8219 = vmatmul.mubr.bf16.vlgmr.msra.gmra.mrb[0].mxu1 %v1593_v7  ;;  %v13345_v7 = vcombine.low %v373_v56, %v565_v57  ;;  %v473_v57 = vld [vmem:[%s14783_s23 + $0x578] sm:$0xff] }
 0x3aa   : > { %12059 = vmatmul.mubr.bf16.vlgmr.msra.gmra.mrb[0].mxu0 %v2769_v11  ;;  %8227 = vmatpush1.bf16.xpose.msra.mxu1 %v13337_v10  ;;  %v662_v10 = vld [vmem:[%s14783_s23 + $0xb60] sm:$0x11]  ;;  %v13537_v11 = vcombine.low %v469_v60, %v661_v61 }
 0x3ab   : > { %12067 = vmatpush1.bf16.xpose.msra.mxu0 %v13529_v14  ;;  %8258 = vmatprep.mubr.bf16.mxu1 %v1611_v15  ;;  %v13348_v14 = vcombine.high %v374_v4, %v566_v6  ;;  %v269_v15 = vld [vmem:[%s14799_s27 + $0x98] sm:$0xff] }
 0x3ac   : > { %12098 = vmatprep.mubr.bf16.mxu0 %v2787_v16  ;;  %8266 = vmatprep.subr.bf16.mxu1 %v13340_v17  ;;  %v13540_v16 = vcombine.high %v470_v9, %v662_v10  ;;  %v293_v17 = vld [vmem:[%s14799_s27 + $0x158] sm:$0xff]  ;;  %v1668_v18 = vrot.slane %v269_v15, %v14794_v5  ;;  %v1661_v43 = vcombine.high %v269_v15, %v269_v15 }
 0x3ad   : > { %12106 = vmatprep.subr.bf16.mxu0 %v13532_v19  ;;  %v2844_v19 = vrot.slane %v293_v17, %v14794_v5  ;;  %v2837_v46 = vcombine.high %v293_v17, %v293_v17 }
 0x3ae   : > { %v1676_v20 = vcombine.high %v1668_v18, %v1668_v18 }
 0x3af   : > { %v2852_v21 = vcombine.high %v2844_v19, %v2844_v19  ;;  %v2860_v38 = vrot.slane %v2844_v19, %v14794_v5  ;;  %v2851_v49 = vrot.slane %v2837_v46, %v14794_v5 }
 0x3b0   : > { %v1698_v30 = vrot.slane %v1676_v20, %v14794_v5  ;;  %v379_v20 = vld [vmem:[%s14783_s23 + $0x288] sm:$0xff] }
 0x3b1   : > { %v2874_v31 = vrot.slane %v2852_v21, %v14794_v5  ;;  %v2853_v51 = vcombine.high %v2851_v49, %v2851_v49  ;;  %v2882_v56 = vcombine.high %v2860_v38, %v2860_v38  ;;  %v571_v21 = vld [vmem:[%s14783_s23 + $0x888] sm:$0x11] }
 0x3b2   : > { %v1708_v42 = vcombine.high %v1698_v30, %v1698_v30 }
 0x3b3   : > { %v2881_v61 = vrot.slane %v2853_v51, %v14794_v5  ;;  %v573_v51 = vld [vmem:[%s14783_s23 + $0x898] sm:$0x11] }
 0x3b5   : > { %8259 = vmatmul.mubr.bf16.vlgmr.msra.gmra.mrb[0].mxu1 %v1609_v25  ;;  %v13347_v25 = vcombine.low %v374_v4, %v566_v6  ;;  %v2867_v4 = vrot.slane %v2851_v49, %v14794_v5  ;;  %v474_v6 = vld [vmem:[%s14783_s23 + $0x580] sm:$0xff] }
 0x3b6   : > { %12099 = vmatmul.mubr.bf16.vlgmr.msra.gmra.mrb[0].mxu0 %v2785_v29  ;;  %8267 = vmatpush1.bf16.xpose.msra.mxu1 %v13339_v28  ;;  %v663_v28 = vld [vmem:[%s14783_s23 + $0xb68] sm:$0x11]  ;;  %v13539_v29 = vcombine.low %v470_v9, %v662_v10  ;;  %v2885_v10 = vcombine.high %v2881_v61, %v2881_v61 }
 0x3b7   : > { %12107 = vmatpush1.bf16.xpose.msra.mxu0 %v13531_v32  ;;  %8298 = vmatprep.mubr.bf16.mxu1 %v1649_v33  ;;  %v13350_v32 = vcombine.high %v375_v23, %v567_v24  ;;  %v13542_v33 = vcombine.high %v471_v27, %v663_v28 }
 0x3b8   : > { %12138 = vmatprep.mubr.bf16.mxu0 %v2825_v34  ;;  %8306 = vmatprep.subr.bf16.mxu1 %v13342_v35  ;;  %v1684_v34 = vrot.slane %v1668_v18, %v14794_v5  ;;  %v376_v35 = vld [vmem:[%s14783_s23 + $0x270] sm:$0xff] }
 0x3b9   : > { %12146 = vmatprep.subr.bf16.mxu0 %v13534_v36  ;;  %v568_v36 = vld [vmem:[%s14783_s23 + $0x870] sm:$0x11] }
 0x3ba   : > { %v1706_v52 = vcombine.high %v1684_v34, %v1684_v34 }
 0x3c1   : > { %8299 = vmatmul.mubr.bf16.vlgmr.msra.gmra.mrb[0].mxu1 %v1635_v37  ;;  %v13349_v37 = vcombine.low %v375_v23, %v567_v24  ;;  %v2883_v23 = vcombine.high %v2867_v4, %v2867_v4  ;;  %v475_v24 = vld [vmem:[%s14783_s23 + $0x588] sm:$0xff] }
 0x3c2   : > { %12139 = vmatmul.mubr.bf16.vlgmr.msra.gmra.mrb[0].mxu0 %v2811_v41  ;;  %8307 = vmatpush1.bf16.xpose.msra.mxu1 %v13341_v40  ;;  %v664_v40 = vld [vmem:[%s14783_s23 + $0xb70] sm:$0x11]  ;;  %v13541_v41 = vcombine.low %v471_v27, %v663_v28 }
 0x3c3   : > { %12147 = vmatpush1.bf16.xpose.msra.mxu0 %v13533_v44  ;;  %8338 = vmatprep.mubr.bf16.mxu1 %v1659_v45  ;;  %v2884_v44 = vcombine.high %v2874_v31, %v2874_v31  ;;  %v13352_v45 = vcombine.high %v376_v35, %v568_v36 }
 0x3c4   : > { %12178 = vmatprep.mubr.bf16.mxu0 %v2835_v47  ;;  %8346 = vmatprep.subr.bf16.mxu1 %v13344_v48  ;;  %v13544_v47 = vcombine.high %v472_v39, %v664_v40  ;;  %v1675_v48 = vrot.slane %v1661_v43, %v14794_v5 }
 0x3c5   : > { %12186 = vmatprep.subr.bf16.mxu0 %v13536_v50 }
 0x3c6   : > { %v1677_v50 = vcombine.high %v1675_v48, %v1675_v48 }
 0x3c8   : > { %v1705_v60 = vrot.slane %v1677_v50, %v14794_v5  ;;  %v381_v50 = vld [vmem:[%s14783_s23 + $0x298] sm:$0xff] }
 0x3ca   : > { %v1709_v9 = vcombine.high %v1705_v60, %v1705_v60 }
 0x3cd   : > { %8339 = vmatmul.mubr.bf16.vlgmr.msra.gmra.mrb[0].mxu1 %v1657_v55  ;;  %v13351_v55 = vcombine.low %v376_v35, %v568_v36  ;;  %v476_v36 = vld [vmem:[%s14783_s23 + $0x590] sm:$0xff] }
 0x3ce   : > { %12179 = vmatmul.mubr.bf16.vlgmr.msra.gmra.mrb[0].mxu0 %v2833_v59  ;;  %8347 = vmatpush1.bf16.xpose.msra.mxu1 %v13343_v58  ;;  %v665_v58 = vld [vmem:[%s14783_s23 + $0xb78] sm:$0x11]  ;;  %v13543_v59 = vcombine.low %v472_v39, %v664_v40 }
 0x3cf   : > { %12187 = vmatpush1.bf16.xpose.msra.mxu0 %v13535_v62  ;;  %8378 = vmatprep.mubr.bf16.mxu1 %v1656_v63  ;;  %v13354_v62 = vcombine.high %v377_v53, %v569_v54  ;;  %v13546_v63 = vcombine.high %v473_v57, %v665_v58 }
 0x3d0   : > { %12218 = vmatprep.mubr.bf16.mxu0 %v2832_v0  ;;  %8386 = vmatprep.subr.bf16.mxu1 %v13346_v1  ;;  %v1691_v0 = vrot.slane %v1675_v48, %v14794_v5  ;;  %v378_v1 = vld [vmem:[%s14783_s23 + $0x280] sm:$0xff] }
 0x3d1   : > { %12226 = vmatprep.subr.bf16.mxu0 %v13538_v2  ;;  %v570_v2 = vld [vmem:[%s14783_s23 + $0x880] sm:$0x11] }
 0x3d2   : > { %v1707_v19 = vcombine.high %v1691_v0, %v1691_v0 }
 0x3d9   : > { %8379 = vmatmul.mubr.bf16.vlgmr.msra.gmra.mrb[0].mxu1 %v1642_v3  ;;  %v13353_v3 = vcombine.low %v377_v53, %v569_v54  ;;  %v477_v54 = vld [vmem:[%s14783_s23 + $0x598] sm:$0xff] }
 0x3da   : > { %12219 = vmatmul.mubr.bf16.vlgmr.msra.gmra.mrb[0].mxu0 %v2818_v8  ;;  %8387 = vmatpush1.bf16.xpose.msra.mxu1 %v13345_v7  ;;  %v666_v7 = vld [vmem:[%s14783_s23 + $0xb80] sm:$0x11]  ;;  %v13545_v8 = vcombine.low %v473_v57, %v665_v58 }
 0x3db   : > { %12227 = vmatpush1.bf16.xpose.msra.mxu0 %v13537_v11  ;;  %8418 = vmatprep.mubr.bf16.mxu1 %v1660_v12  ;;  %v13356_v11 = vcombine.high %v378_v1, %v570_v2  ;;  %v270_v12 = vld [vmem:[%s14799_s27 + $0xa0] sm:$0xff] }
 0x3dc   : > { %12258 = vmatprep.mubr.bf16.mxu0 %v2836_v13  ;;  %8426 = vmatprep.subr.bf16.mxu1 %v13348_v14  ;;  %v13548_v13 = vcombine.high %v474_v6, %v666_v7  ;;  %v294_v14 = vld [vmem:[%s14799_s27 + $0x160] sm:$0xff]  ;;  %v1717_v15 = vrot.slane %v270_v12, %v14794_v5  ;;  %v1710_v40 = vcombine.high %v270_v12, %v270_v12 }
 0x3dd   : > { %12266 = vmatprep.subr.bf16.mxu0 %v13540_v16  ;;  %v2893_v16 = vrot.slane %v294_v14, %v14794_v5  ;;  %v2886_v43 = vcombine.high %v294_v14, %v294_v14 }
 0x3de   : > { %v1725_v17 = vcombine.high %v1717_v15, %v1717_v15 }
 0x3df   : > { %v2901_v18 = vcombine.high %v2893_v16, %v2893_v16  ;;  %v2909_v35 = vrot.slane %v2893_v16, %v14794_v5  ;;  %v2900_v46 = vrot.slane %v2886_v43, %v14794_v5 }
 0x3e0   : > { %v1747_v27 = vrot.slane %v1725_v17, %v14794_v5  ;;  %v383_v17 = vld [vmem:[%s14783_s23 + $0x2a8] sm:$0xff] }
 0x3e1   : > { %v2923_v28 = vrot.slane %v2901_v18, %v14794_v5  ;;  %v2902_v48 = vcombine.high %v2900_v46, %v2900_v46  ;;  %v2931_v53 = vcombine.high %v2909_v35, %v2909_v35  ;;  %v575_v18 = vld [vmem:[%s14783_s23 + $0x8a8] sm:$0x11] }
 0x3e2   : > { %v1757_v39 = vcombine.high %v1747_v27, %v1747_v27 }
 0x3e3   : > { %v2930_v58 = vrot.slane %v2902_v48, %v14794_v5  ;;  %v577_v48 = vld [vmem:[%s14783_s23 + $0x8b8] sm:$0x11] }
 0x3e5   : > { %8419 = vmatmul.mubr.bf16.vlgmr.msra.gmra.mrb[0].mxu1 %v1658_v22  ;;  %v13355_v22 = vcombine.low %v378_v1, %v570_v2  ;;  %v2916_v1 = vrot.slane %v2900_v46, %v14794_v5  ;;  %v478_v2 = vld [vmem:[%s14783_s23 + $0x5a0] sm:$0xff] }
 0x3e6   : > { %12259 = vmatmul.mubr.bf16.vlgmr.msra.gmra.mrb[0].mxu0 %v2834_v26  ;;  %8427 = vmatpush1.bf16.xpose.msra.mxu1 %v13347_v25  ;;  %v667_v25 = vld [vmem:[%s14783_s23 + $0xb88] sm:$0x11]  ;;  %v13547_v26 = vcombine.low %v474_v6, %v666_v7  ;;  %v2934_v7 = vcombine.high %v2930_v58, %v2930_v58 }
 0x3e7   : > { %12267 = vmatpush1.bf16.xpose.msra.mxu0 %v13539_v29  ;;  %8458 = vmatprep.mubr.bf16.mxu1 %v1698_v30  ;;  %v13358_v29 = vcombine.high %v379_v20, %v571_v21  ;;  %v13550_v30 = vcombine.high %v475_v24, %v667_v25 }
 0x3e8   : > { %12298 = vmatprep.mubr.bf16.mxu0 %v2874_v31  ;;  %8466 = vmatprep.subr.bf16.mxu1 %v13350_v32  ;;  %v1733_v31 = vrot.slane %v1717_v15, %v14794_v5  ;;  %v380_v32 = vld [vmem:[%s14783_s23 + $0x290] sm:$0xff] }
 0x3e9   : > { %12306 = vmatprep.subr.bf16.mxu0 %v13542_v33  ;;  %v572_v33 = vld [vmem:[%s14783_s23 + $0x890] sm:$0x11] }
 0x3ea   : > { %v1755_v49 = vcombine.high %v1733_v31, %v1733_v31 }
 0x3f1   : > { %8459 = vmatmul.mubr.bf16.vlgmr.msra.gmra.mrb[0].mxu1 %v1684_v34  ;;  %v13357_v34 = vcombine.low %v379_v20, %v571_v21  ;;  %v2932_v20 = vcombine.high %v2916_v1, %v2916_v1  ;;  %v479_v21 = vld [vmem:[%s14783_s23 + $0x5a8] sm:$0xff] }
 0x3f2   : > { %12299 = vmatmul.mubr.bf16.vlgmr.msra.gmra.mrb[0].mxu0 %v2860_v38  ;;  %8467 = vmatpush1.bf16.xpose.msra.mxu1 %v13349_v37  ;;  %v668_v37 = vld [vmem:[%s14783_s23 + $0xb90] sm:$0x11]  ;;  %v13549_v38 = vcombine.low %v475_v24, %v667_v25 }
 0x3f3   : > { %12307 = vmatpush1.bf16.xpose.msra.mxu0 %v13541_v41  ;;  %8498 = vmatprep.mubr.bf16.mxu1 %v1708_v42  ;;  %v2933_v41 = vcombine.high %v2923_v28, %v2923_v28  ;;  %v13360_v42 = vcombine.high %v380_v32, %v572_v33 }
 0x3f4   : > { %12338 = vmatprep.mubr.bf16.mxu0 %v2884_v44  ;;  %8506 = vmatprep.subr.bf16.mxu1 %v13352_v45  ;;  %v13552_v44 = vcombine.high %v476_v36, %v668_v37  ;;  %v1724_v45 = vrot.slane %v1710_v40, %v14794_v5 }
 0x3f5   : > { %12346 = vmatprep.subr.bf16.mxu0 %v13544_v47 }
 0x3f6   : > { %v1726_v47 = vcombine.high %v1724_v45, %v1724_v45 }
 0x3f8   : > { %v1754_v57 = vrot.slane %v1726_v47, %v14794_v5  ;;  %v385_v47 = vld [vmem:[%s14783_s23 + $0x2b8] sm:$0xff] }
 0x3fa   : > { %v1758_v6 = vcombine.high %v1754_v57, %v1754_v57 }
 0x3fd   : > { %8499 = vmatmul.mubr.bf16.vlgmr.msra.gmra.mrb[0].mxu1 %v1706_v52  ;;  %v13359_v52 = vcombine.low %v380_v32, %v572_v33  ;;  %v480_v33 = vld [vmem:[%s14783_s23 + $0x5b0] sm:$0xff] }
 0x3fe   : > { %12339 = vmatmul.mubr.bf16.vlgmr.msra.gmra.mrb[0].mxu0 %v2882_v56  ;;  %8507 = vmatpush1.bf16.xpose.msra.mxu1 %v13351_v55  ;;  %v669_v55 = vld [vmem:[%s14783_s23 + $0xb98] sm:$0x11]  ;;  %v13551_v56 = vcombine.low %v476_v36, %v668_v37 }
 0x3ff   : > { %12347 = vmatpush1.bf16.xpose.msra.mxu0 %v13543_v59  ;;  %8538 = vmatprep.mubr.bf16.mxu1 %v1705_v60  ;;  %v13362_v59 = vcombine.high %v381_v50, %v573_v51  ;;  %v13554_v60 = vcombine.high %v477_v54, %v669_v55 }
 0x400   : > { %12378 = vmatprep.mubr.bf16.mxu0 %v2881_v61  ;;  %8546 = vmatprep.subr.bf16.mxu1 %v13354_v62  ;;  %v1740_v61 = vrot.slane %v1724_v45, %v14794_v5  ;;  %v382_v62 = vld [vmem:[%s14783_s23 + $0x2a0] sm:$0xff] }
 0x401   : > { %12386 = vmatprep.subr.bf16.mxu0 %v13546_v63  ;;  %v574_v63 = vld [vmem:[%s14783_s23 + $0x8a0] sm:$0x11] }
 0x402   : > { %v1756_v16 = vcombine.high %v1740_v61, %v1740_v61 }
 0x409   : > { %8539 = vmatmul.mubr.bf16.vlgmr.msra.gmra.mrb[0].mxu1 %v1691_v0  ;;  %v13361_v0 = vcombine.low %v381_v50, %v573_v51  ;;  %v481_v51 = vld [vmem:[%s14783_s23 + $0x5b8] sm:$0xff] }
 0x40a   : > { %12379 = vmatmul.mubr.bf16.vlgmr.msra.gmra.mrb[0].mxu0 %v2867_v4  ;;  %8547 = vmatpush1.bf16.xpose.msra.mxu1 %v13353_v3  ;;  %v670_v3 = vld [vmem:[%s14783_s23 + $0xba0] sm:$0x11]  ;;  %v13553_v4 = vcombine.low %v477_v54, %v669_v55 }
 0x40b   : > { %12387 = vmatpush1.bf16.xpose.msra.mxu0 %v13545_v8  ;;  %8578 = vmatprep.mubr.bf16.mxu1 %v1709_v9  ;;  %v13364_v8 = vcombine.high %v382_v62, %v574_v63  ;;  %v271_v9 = vld [vmem:[%s14799_s27 + $0xa8] sm:$0xff] }
 0x40c   : > { %12418 = vmatprep.mubr.bf16.mxu0 %v2885_v10  ;;  %8586 = vmatprep.subr.bf16.mxu1 %v13356_v11  ;;  %v13556_v10 = vcombine.high %v478_v2, %v670_v3  ;;  %v295_v11 = vld [vmem:[%s14799_s27 + $0x168] sm:$0xff]  ;;  %v1766_v12 = vrot.slane %v271_v9, %v14794_v5  ;;  %v1759_v37 = vcombine.high %v271_v9, %v271_v9 }
 0x40d   : > { %12426 = vmatprep.subr.bf16.mxu0 %v13548_v13  ;;  %v2942_v13 = vrot.slane %v295_v11, %v14794_v5  ;;  %v2935_v40 = vcombine.high %v295_v11, %v295_v11 }
 0x40e   : > { %v1774_v14 = vcombine.high %v1766_v12, %v1766_v12 }
 0x40f   : > { %v2950_v15 = vcombine.high %v2942_v13, %v2942_v13  ;;  %v2958_v32 = vrot.slane %v2942_v13, %v14794_v5  ;;  %v2949_v43 = vrot.slane %v2935_v40, %v14794_v5 }
 0x410   : > { %v1796_v24 = vrot.slane %v1774_v14, %v14794_v5  ;;  %v387_v14 = vld [vmem:[%s14783_s23 + $0x2c8] sm:$0xff] }
 0x411   : > { %v2972_v25 = vrot.slane %v2950_v15, %v14794_v5  ;;  %v2951_v45 = vcombine.high %v2949_v43, %v2949_v43  ;;  %v2980_v50 = vcombine.high %v2958_v32, %v2958_v32  ;;  %v579_v15 = vld [vmem:[%s14783_s23 + $0x8c8] sm:$0x11] }
 0x412   : > { %v1806_v36 = vcombine.high %v1796_v24, %v1796_v24 }
 0x413   : > { %v2979_v55 = vrot.slane %v2951_v45, %v14794_v5  ;;  %v581_v45 = vld [vmem:[%s14783_s23 + $0x8d8] sm:$0x11] }
 0x415   : > { %8579 = vmatmul.mubr.bf16.vlgmr.msra.gmra.mrb[0].mxu1 %v1707_v19  ;;  %v13363_v19 = vcombine.low %v382_v62, %v574_v63  ;;  %v2965_v62 = vrot.slane %v2949_v43, %v14794_v5  ;;  %v482_v63 = vld [vmem:[%s14783_s23 + $0x5c0] sm:$0xff] }
 0x416   : > { %12419 = vmatmul.mubr.bf16.vlgmr.msra.gmra.mrb[0].mxu0 %v2883_v23  ;;  %8587 = vmatpush1.bf16.xpose.msra.mxu1 %v13355_v22  ;;  %v671_v22 = vld [vmem:[%s14783_s23 + $0xba8] sm:$0x11]  ;;  %v13555_v23 = vcombine.low %v478_v2, %v670_v3  ;;  %v2983_v3 = vcombine.high %v2979_v55, %v2979_v55 }
 0x417   : > { %12427 = vmatpush1.bf16.xpose.msra.mxu0 %v13547_v26  ;;  %8618 = vmatprep.mubr.bf16.mxu1 %v1747_v27  ;;  %v13366_v26 = vcombine.high %v383_v17, %v575_v18  ;;  %v13558_v27 = vcombine.high %v479_v21, %v671_v22 }
 0x418   : > { %12458 = vmatprep.mubr.bf16.mxu0 %v2923_v28  ;;  %8626 = vmatprep.subr.bf16.mxu1 %v13358_v29  ;;  %v1782_v28 = vrot.slane %v1766_v12, %v14794_v5  ;;  %v384_v29 = vld [vmem:[%s14783_s23 + $0x2b0] sm:$0xff] }
 0x419   : > { %12466 = vmatprep.subr.bf16.mxu0 %v13550_v30  ;;  %v576_v30 = vld [vmem:[%s14783_s23 + $0x8b0] sm:$0x11] }
 0x41a   : > { %v1804_v46 = vcombine.high %v1782_v28, %v1782_v28 }
 0x421   : > { %8619 = vmatmul.mubr.bf16.vlgmr.msra.gmra.mrb[0].mxu1 %v1733_v31  ;;  %v13365_v31 = vcombine.low %v383_v17, %v575_v18  ;;  %v2981_v17 = vcombine.high %v2965_v62, %v2965_v62  ;;  %v483_v18 = vld [vmem:[%s14783_s23 + $0x5c8] sm:$0xff] }
 0x422   : > { %12459 = vmatmul.mubr.bf16.vlgmr.msra.gmra.mrb[0].mxu0 %v2909_v35  ;;  %8627 = vmatpush1.bf16.xpose.msra.mxu1 %v13357_v34  ;;  %v672_v34 = vld [vmem:[%s14783_s23 + $0xbb0] sm:$0x11]  ;;  %v13557_v35 = vcombine.low %v479_v21, %v671_v22 }
 0x423   : > { %12467 = vmatpush1.bf16.xpose.msra.mxu0 %v13549_v38  ;;  %8658 = vmatprep.mubr.bf16.mxu1 %v1757_v39  ;;  %v2982_v38 = vcombine.high %v2972_v25, %v2972_v25  ;;  %v13368_v39 = vcombine.high %v384_v29, %v576_v30 }
 0x424   : > { %12498 = vmatprep.mubr.bf16.mxu0 %v2933_v41  ;;  %8666 = vmatprep.subr.bf16.mxu1 %v13360_v42  ;;  %v13560_v41 = vcombine.high %v480_v33, %v672_v34  ;;  %v1773_v42 = vrot.slane %v1759_v37, %v14794_v5 }
 0x425   : > { %12506 = vmatprep.subr.bf16.mxu0 %v13552_v44 }
 0x426   : > { %v1775_v44 = vcombine.high %v1773_v42, %v1773_v42 }
 0x428   : > { %v1803_v54 = vrot.slane %v1775_v44, %v14794_v5  ;;  %v389_v44 = vld [vmem:[%s14783_s23 + $0x2d8] sm:$0xff] }
 0x42a   : > { %v1807_v2 = vcombine.high %v1803_v54, %v1803_v54 }
 0x42d   : > { %8659 = vmatmul.mubr.bf16.vlgmr.msra.gmra.mrb[0].mxu1 %v1755_v49  ;;  %v13367_v49 = vcombine.low %v384_v29, %v576_v30  ;;  %v484_v30 = vld [vmem:[%s14783_s23 + $0x5d0] sm:$0xff] }
 0x42e   : > { %12499 = vmatmul.mubr.bf16.vlgmr.msra.gmra.mrb[0].mxu0 %v2931_v53  ;;  %8667 = vmatpush1.bf16.xpose.msra.mxu1 %v13359_v52  ;;  %v673_v52 = vld [vmem:[%s14783_s23 + $0xbb8] sm:$0x11]  ;;  %v13559_v53 = vcombine.low %v480_v33, %v672_v34 }
 0x42f   : > { %12507 = vmatpush1.bf16.xpose.msra.mxu0 %v13551_v56  ;;  %8698 = vmatprep.mubr.bf16.mxu1 %v1754_v57  ;;  %v13370_v56 = vcombine.high %v385_v47, %v577_v48  ;;  %v13562_v57 = vcombine.high %v481_v51, %v673_v52 }
 0x430   : > { %12538 = vmatprep.mubr.bf16.mxu0 %v2930_v58  ;;  %8706 = vmatprep.subr.bf16.mxu1 %v13362_v59  ;;  %v1789_v58 = vrot.slane %v1773_v42, %v14794_v5  ;;  %v386_v59 = vld [vmem:[%s14783_s23 + $0x2c0] sm:$0xff] }
 0x431   : > { %12546 = vmatprep.subr.bf16.mxu0 %v13554_v60  ;;  %v578_v60 = vld [vmem:[%s14783_s23 + $0x8c0] sm:$0x11] }
 0x432   : > { %v1805_v13 = vcombine.high %v1789_v58, %v1789_v58 }
 0x439   : > { %8699 = vmatmul.mubr.bf16.vlgmr.msra.gmra.mrb[0].mxu1 %v1740_v61  ;;  %v13369_v61 = vcombine.low %v385_v47, %v577_v48  ;;  %v485_v48 = vld [vmem:[%s14783_s23 + $0x5d8] sm:$0xff] }
 0x43a   : > { %12539 = vmatmul.mubr.bf16.vlgmr.msra.gmra.mrb[0].mxu0 %v2916_v1  ;;  %8707 = vmatpush1.bf16.xpose.msra.mxu1 %v13361_v0  ;;  %v674_v0 = vld [vmem:[%s14783_s23 + $0xbc0] sm:$0x11]  ;;  %v13561_v1 = vcombine.low %v481_v51, %v673_v52 }
 0x43b   : > { %12547 = vmatpush1.bf16.xpose.msra.mxu0 %v13553_v4  ;;  %8738 = vmatprep.mubr.bf16.mxu1 %v1758_v6  ;;  %v13372_v4 = vcombine.high %v386_v59, %v578_v60  ;;  %v272_v6 = vld [vmem:[%s14799_s27 + $0xb0] sm:$0xff] }
 0x43c   : > { %12578 = vmatprep.mubr.bf16.mxu0 %v2934_v7  ;;  %8746 = vmatprep.subr.bf16.mxu1 %v13364_v8  ;;  %v13564_v7 = vcombine.high %v482_v63, %v674_v0  ;;  %v296_v8 = vld [vmem:[%s14799_s27 + $0x170] sm:$0xff]  ;;  %v1815_v9 = vrot.slane %v272_v6, %v14794_v5  ;;  %v1808_v34 = vcombine.high %v272_v6, %v272_v6 }
 0x43d   : > { %12586 = vmatprep.subr.bf16.mxu0 %v13556_v10  ;;  %v2991_v10 = vrot.slane %v296_v8, %v14794_v5  ;;  %v2984_v37 = vcombine.high %v296_v8, %v296_v8 }
 0x43e   : > { %v1823_v11 = vcombine.high %v1815_v9, %v1815_v9 }
 0x43f   : > { %v2999_v12 = vcombine.high %v2991_v10, %v2991_v10  ;;  %v3007_v29 = vrot.slane %v2991_v10, %v14794_v5  ;;  %v2998_v40 = vrot.slane %v2984_v37, %v14794_v5 }
 0x440   : > { %v1845_v21 = vrot.slane %v1823_v11, %v14794_v5  ;;  %v391_v11 = vld [vmem:[%s14783_s23 + $0x2e8] sm:$0xff] }
 0x441   : > { %v3021_v22 = vrot.slane %v2999_v12, %v14794_v5  ;;  %v3000_v42 = vcombine.high %v2998_v40, %v2998_v40  ;;  %v3029_v47 = vcombine.high %v3007_v29, %v3007_v29  ;;  %v583_v12 = vld [vmem:[%s14783_s23 + $0x8e8] sm:$0x11] }
 0x442   : > { %v1855_v33 = vcombine.high %v1845_v21, %v1845_v21 }
 0x443   : > { %v3028_v52 = vrot.slane %v3000_v42, %v14794_v5  ;;  %v585_v42 = vld [vmem:[%s14783_s23 + $0x8f8] sm:$0x11] }
 0x445   : > { %8739 = vmatmul.mubr.bf16.vlgmr.msra.gmra.mrb[0].mxu1 %v1756_v16  ;;  %v13371_v16 = vcombine.low %v386_v59, %v578_v60  ;;  %v3014_v59 = vrot.slane %v2998_v40, %v14794_v5  ;;  %v486_v60 = vld [vmem:[%s14783_s23 + $0x5e0] sm:$0xff] }
 0x446   : > { %12579 = vmatmul.mubr.bf16.vlgmr.msra.gmra.mrb[0].mxu0 %v2932_v20  ;;  %8747 = vmatpush1.bf16.xpose.msra.mxu1 %v13363_v19  ;;  %v675_v19 = vld [vmem:[%s14783_s23 + $0xbc8] sm:$0x11]  ;;  %v13563_v20 = vcombine.low %v482_v63, %v674_v0  ;;  %v3032_v0 = vcombine.high %v3028_v52, %v3028_v52 }
 0x447   : > { %12587 = vmatpush1.bf16.xpose.msra.mxu0 %v13555_v23  ;;  %8778 = vmatprep.mubr.bf16.mxu1 %v1796_v24  ;;  %v13374_v23 = vcombine.high %v387_v14, %v579_v15  ;;  %v13566_v24 = vcombine.high %v483_v18, %v675_v19 }
 0x448   : > { %12618 = vmatprep.mubr.bf16.mxu0 %v2972_v25  ;;  %8786 = vmatprep.subr.bf16.mxu1 %v13366_v26  ;;  %v1831_v25 = vrot.slane %v1815_v9, %v14794_v5  ;;  %v388_v26 = vld [vmem:[%s14783_s23 + $0x2d0] sm:$0xff] }
 0x449   : > { %12626 = vmatprep.subr.bf16.mxu0 %v13558_v27  ;;  %v580_v27 = vld [vmem:[%s14783_s23 + $0x8d0] sm:$0x11] }
 0x44a   : > { %v1853_v43 = vcombine.high %v1831_v25, %v1831_v25 }
 0x451   : > { %8779 = vmatmul.mubr.bf16.vlgmr.msra.gmra.mrb[0].mxu1 %v1782_v28  ;;  %v13373_v28 = vcombine.low %v387_v14, %v579_v15  ;;  %v3030_v14 = vcombine.high %v3014_v59, %v3014_v59  ;;  %v487_v15 = vld [vmem:[%s14783_s23 + $0x5e8] sm:$0xff] }
 0x452   : > { %12619 = vmatmul.mubr.bf16.vlgmr.msra.gmra.mrb[0].mxu0 %v2958_v32  ;;  %8787 = vmatpush1.bf16.xpose.msra.mxu1 %v13365_v31  ;;  %v676_v31 = vld [vmem:[%s14783_s23 + $0xbd0] sm:$0x11]  ;;  %v13565_v32 = vcombine.low %v483_v18, %v675_v19 }
 0x453   : > { %12627 = vmatpush1.bf16.xpose.msra.mxu0 %v13557_v35  ;;  %8818 = vmatprep.mubr.bf16.mxu1 %v1806_v36  ;;  %v3031_v35 = vcombine.high %v3021_v22, %v3021_v22  ;;  %v13376_v36 = vcombine.high %v388_v26, %v580_v27 }
 0x454   : > { %12658 = vmatprep.mubr.bf16.mxu0 %v2982_v38  ;;  %8826 = vmatprep.subr.bf16.mxu1 %v13368_v39  ;;  %v13568_v38 = vcombine.high %v484_v30, %v676_v31  ;;  %v1822_v39 = vrot.slane %v1808_v34, %v14794_v5 }
 0x455   : > { %12666 = vmatprep.subr.bf16.mxu0 %v13560_v41 }
 0x456   : > { %v1824_v41 = vcombine.high %v1822_v39, %v1822_v39 }
 0x458   : > { %v1852_v51 = vrot.slane %v1824_v41, %v14794_v5  ;;  %v393_v41 = vld [vmem:[%s14783_s23 + $0x2f8] sm:$0xff] }
 0x45a   : > { %v1856_v63 = vcombine.high %v1852_v51, %v1852_v51 }
 0x45d   : > { %8819 = vmatmul.mubr.bf16.vlgmr.msra.gmra.mrb[0].mxu1 %v1804_v46  ;;  %v13375_v46 = vcombine.low %v388_v26, %v580_v27  ;;  %v488_v27 = vld [vmem:[%s14783_s23 + $0x5f0] sm:$0xff] }
 0x45e   : > { %12659 = vmatmul.mubr.bf16.vlgmr.msra.gmra.mrb[0].mxu0 %v2980_v50  ;;  %8827 = vmatpush1.bf16.xpose.msra.mxu1 %v13367_v49  ;;  %v677_v49 = vld [vmem:[%s14783_s23 + $0xbd8] sm:$0x11]  ;;  %v13567_v50 = vcombine.low %v484_v30, %v676_v31 }
 0x45f   : > { %12667 = vmatpush1.bf16.xpose.msra.mxu0 %v13559_v53  ;;  %8858 = vmatprep.mubr.bf16.mxu1 %v1803_v54  ;;  %v13378_v53 = vcombine.high %v389_v44, %v581_v45  ;;  %v13570_v54 = vcombine.high %v485_v48, %v677_v49 }
 0x460   : > { %12698 = vmatprep.mubr.bf16.mxu0 %v2979_v55  ;;  %8866 = vmatprep.subr.bf16.mxu1 %v13370_v56  ;;  %v1838_v55 = vrot.slane %v1822_v39, %v14794_v5  ;;  %v390_v56 = vld [vmem:[%s14783_s23 + $0x2e0] sm:$0xff] }
 0x461   : > { %12706 = vmatprep.subr.bf16.mxu0 %v13562_v57  ;;  %v582_v57 = vld [vmem:[%s14783_s23 + $0x8e0] sm:$0x11] }
 0x462   : > { %v1854_v10 = vcombine.high %v1838_v55, %v1838_v55 }
 0x469   : > { %8859 = vmatmul.mubr.bf16.vlgmr.msra.gmra.mrb[0].mxu1 %v1789_v58  ;;  %v13377_v58 = vcombine.low %v389_v44, %v581_v45  ;;  %v489_v45 = vld [vmem:[%s14783_s23 + $0x5f8] sm:$0xff] }
 0x46a   : > { %12699 = vmatmul.mubr.bf16.vlgmr.msra.gmra.mrb[0].mxu0 %v2965_v62  ;;  %8867 = vmatpush1.bf16.xpose.msra.mxu1 %v13369_v61  ;;  %v678_v61 = vld [vmem:[%s14783_s23 + $0xbe0] sm:$0x11]  ;;  %v13569_v62 = vcombine.low %v485_v48, %v677_v49 }
 0x46b   : > { %12707 = vmatpush1.bf16.xpose.msra.mxu0 %v13561_v1  ;;  %8898 = vmatprep.mubr.bf16.mxu1 %v1807_v2  ;;  %v13380_v1 = vcombine.high %v390_v56, %v582_v57  ;;  %v273_v2 = vld [vmem:[%s14799_s27 + $0xb8] sm:$0xff] }
 0x46c   : > { %12738 = vmatprep.mubr.bf16.mxu0 %v2983_v3  ;;  %8906 = vmatprep.subr.bf16.mxu1 %v13372_v4  ;;  %v13572_v3 = vcombine.high %v486_v60, %v678_v61  ;;  %v297_v4 = vld [vmem:[%s14799_s27 + $0x178] sm:$0xff]  ;;  %v1864_v6 = vrot.slane %v273_v2, %v14794_v5  ;;  %v1857_v31 = vcombine.high %v273_v2, %v273_v2 }
 0x46d   : > { %12746 = vmatprep.subr.bf16.mxu0 %v13564_v7  ;;  %v3040_v7 = vrot.slane %v297_v4, %v14794_v5  ;;  %v3033_v34 = vcombine.high %v297_v4, %v297_v4 }
 0x46e   : > { %v1872_v8 = vcombine.high %v1864_v6, %v1864_v6 }
 0x46f   : > { %v3048_v9 = vcombine.high %v3040_v7, %v3040_v7  ;;  %v3056_v26 = vrot.slane %v3040_v7, %v14794_v5  ;;  %v3047_v37 = vrot.slane %v3033_v34, %v14794_v5 }
 0x470   : > { %v1894_v18 = vrot.slane %v1872_v8, %v14794_v5 }
 0x471   : > { %v3070_v19 = vrot.slane %v3048_v9, %v14794_v5  ;;  %v3049_v39 = vcombine.high %v3047_v37, %v3047_v37  ;;  %v3078_v44 = vcombine.high %v3056_v26, %v3056_v26 }
 0x472   : > { %v1904_v30 = vcombine.high %v1894_v18, %v1894_v18 }
 0x473   : > { %v3077_v49 = vrot.slane %v3049_v39, %v14794_v5 }
 0x475   : > { %8899 = vmatmul.mubr.bf16.vlgmr.msra.gmra.mrb[0].mxu1 %v1805_v13  ;;  %v13379_v13 = vcombine.low %v390_v56, %v582_v57  ;;  %v3081_v57 = vcombine.high %v3077_v49, %v3077_v49 }
 0x476   : > { %12739 = vmatmul.mubr.bf16.vlgmr.msra.gmra.mrb[0].mxu0 %v2981_v17  ;;  %8907 = vmatpush1.bf16.xpose.msra.mxu1 %v13371_v16  ;;  %v679_v16 = vld [vmem:[%s14783_s23 + $0xbe8] sm:$0x11]  ;;  %v13571_v17 = vcombine.low %v486_v60, %v678_v61 }
 0x477   : > { %12747 = vmatpush1.bf16.xpose.msra.mxu0 %v13563_v20  ;;  %8938 = vmatprep.mubr.bf16.mxu1 %v1845_v21  ;;  %v13382_v20 = vcombine.high %v391_v11, %v583_v12  ;;  %v13574_v21 = vcombine.high %v487_v15, %v679_v16 }
 0x478   : > { %12778 = vmatprep.mubr.bf16.mxu0 %v3021_v22  ;;  %8946 = vmatprep.subr.bf16.mxu1 %v13374_v23  ;;  %v1880_v22 = vrot.slane %v1864_v6, %v14794_v5  ;;  %v392_v23 = vld [vmem:[%s14783_s23 + $0x2f0] sm:$0xff] }
 0x479   : > { %12786 = vmatprep.subr.bf16.mxu0 %v13566_v24  ;;  %v584_v24 = vld [vmem:[%s14783_s23 + $0x8f0] sm:$0x11] }
 0x47a   : > { %v1902_v40 = vcombine.high %v1880_v22, %v1880_v22 }
 0x481   : > { %8939 = vmatmul.mubr.bf16.vlgmr.msra.gmra.mrb[0].mxu1 %v1831_v25  ;;  %v13381_v25 = vcombine.low %v391_v11, %v583_v12 }
 0x482   : > { %12779 = vmatmul.mubr.bf16.vlgmr.msra.gmra.mrb[0].mxu0 %v3007_v29  ;;  %8947 = vmatpush1.bf16.xpose.msra.mxu1 %v13373_v28  ;;  %v680_v28 = vld [vmem:[%s14783_s23 + $0xbf0] sm:$0x11]  ;;  %v13573_v29 = vcombine.low %v487_v15, %v679_v16 }
 0x483   : > { %12787 = vmatpush1.bf16.xpose.msra.mxu0 %v13565_v32  ;;  %8978 = vmatprep.mubr.bf16.mxu1 %v1855_v33  ;;  %v3080_v32 = vcombine.high %v3070_v19, %v3070_v19  ;;  %v13384_v33 = vcombine.high %v392_v23, %v584_v24 }
 0x484   : > { %12818 = vmatprep.mubr.bf16.mxu0 %v3031_v35  ;;  %8986 = vmatprep.subr.bf16.mxu1 %v13376_v36  ;;  %v13576_v35 = vcombine.high %v488_v27, %v680_v28  ;;  %v1871_v36 = vrot.slane %v1857_v31, %v14794_v5 }
 0x485   : > { %12826 = vmatprep.subr.bf16.mxu0 %v13568_v38 }
 0x486   : > { %v1873_v38 = vcombine.high %v1871_v36, %v1871_v36 }
 0x488   : > { %v1901_v48 = vrot.slane %v1873_v38, %v14794_v5 }
 0x48a   : > { %v1905_v56 = vcombine.high %v1901_v48, %v1901_v48 }
 0x48d   : > { %8979 = vmatmul.mubr.bf16.vlgmr.msra.gmra.mrb[0].mxu1 %v1853_v43  ;;  %v13383_v43 = vcombine.low %v392_v23, %v584_v24 }
 0x48e   : > { %12819 = vmatmul.mubr.bf16.vlgmr.msra.gmra.mrb[0].mxu0 %v3029_v47  ;;  %8987 = vmatpush1.bf16.xpose.msra.mxu1 %v13375_v46  ;;  %v681_v46 = vld [vmem:[%s14783_s23 + $0xbf8] sm:$0x11]  ;;  %v13575_v47 = vcombine.low %v488_v27, %v680_v28 }
 0x48f   : > { %12827 = vmatpush1.bf16.xpose.msra.mxu0 %v13567_v50  ;;  %9018 = vmatprep.mubr.bf16.mxu1 %v1852_v51  ;;  %v13386_v50 = vcombine.high %v393_v41, %v585_v42  ;;  %v13578_v51 = vcombine.high %v489_v45, %v681_v46 }
 0x490   : > { %12858 = vmatprep.mubr.bf16.mxu0 %v3028_v52  ;;  %9026 = vmatprep.subr.bf16.mxu1 %v13378_v53  ;;  %v1887_v52 = vrot.slane %v1871_v36, %v14794_v5  ;;  %v13385_v53 = vcombine.low %v393_v41, %v585_v42 }
 0x491   : > { %12866 = vmatprep.subr.bf16.mxu0 %v13570_v54  ;;  %v3063_v54 = vrot.slane %v3047_v37, %v14794_v5 }
 0x499   : > { %9019 = vmatmul.mubr.bf16.vlgmr.msra.gmra.mrb[0].mxu1 %v1838_v55  ;;  %v13577_v55 = vcombine.low %v489_v45, %v681_v46 }
 0x49a   : > { %12859 = vmatmul.mubr.bf16.vlgmr.msra.gmra.mrb[0].mxu0 %v3014_v59  ;;  %9027 = vmatpush1.bf16.xpose.msra.mxu1 %v13377_v58  ;;  %v1903_v58 = vcombine.high %v1887_v52, %v1887_v52  ;;  %v3079_v59 = vcombine.high %v3063_v54, %v3063_v54 }
 0x49b   : > { %12867 = vmatpush1.bf16.xpose.msra.mxu0 %v13569_v62  ;;  %9058 = vmatprep.mubr.bf16.mxu1 %v1856_v63 }
 0x49c   : > { %12898 = vmatprep.mubr.bf16.mxu0 %v3032_v0  ;;  %9066 = vmatprep.subr.bf16.mxu1 %v13380_v1 }
 0x49d   : > { %12906 = vmatprep.subr.bf16.mxu0 %v13572_v3 }
 0x4a5   : > { %9059 = vmatmul.mubr.bf16.vlgmr.msra.gmra.mrb[0].mxu1 %v1854_v10 }
 0x4a6   : > { %12899 = vmatmul.mubr.bf16.vlgmr.msra.gmra.mrb[0].mxu0 %v3030_v14  ;;  %9067 = vmatpush1.bf16.xpose.msra.mxu1 %v13379_v13 }
 0x4a7   : > { %12907 = vmatpush1.bf16.xpose.msra.mxu0 %v13571_v17  ;;  %9098 = vmatprep.mubr.bf16.mxu1 %v1894_v18 }
 0x4a8   : > { %12938 = vmatprep.mubr.bf16.mxu0 %v3070_v19  ;;  %9106 = vmatprep.subr.bf16.mxu1 %v13382_v20 }
 0x4a9   : > { %12946 = vmatprep.subr.bf16.mxu0 %v13574_v21 }
 0x4b1   : > { %9099 = vmatmul.mubr.bf16.vlgmr.msra.gmra.mrb[0].mxu1 %v1880_v22 }
 0x4b2   : > { %12939 = vmatmul.mubr.bf16.vlgmr.msra.gmra.mrb[0].mxu0 %v3056_v26  ;;  %9107 = vmatpush1.bf16.xpose.msra.mxu1 %v13381_v25 }
 0x4b3   : > { %12947 = vmatpush1.bf16.xpose.msra.mxu0 %v13573_v29  ;;  %9138 = vmatprep.mubr.bf16.mxu1 %v1904_v30 }
 0x4b4   : > { %12978 = vmatprep.mubr.bf16.mxu0 %v3080_v32  ;;  %9146 = vmatprep.subr.bf16.mxu1 %v13384_v33 }
 0x4b5   : > { %12986 = vmatprep.subr.bf16.mxu0 %v13576_v35 }
 0x4bd   : > { %9139 = vmatmul.mubr.bf16.vlgmr.msra.gmra.mrb[0].mxu1 %v1902_v40 }
 0x4be   : > { %12979 = vmatmul.mubr.bf16.vlgmr.msra.gmra.mrb[0].mxu0 %v3078_v44  ;;  %9147 = vmatpush1.bf16.xpose.msra.mxu1 %v13383_v43 }
 0x4bf   : > { %12987 = vmatpush1.bf16.xpose.msra.mxu0 %v13575_v47  ;;  %9178 = vmatprep.mubr.bf16.mxu1 %v1901_v48 }
 0x4c0   : > { %13018 = vmatprep.mubr.bf16.mxu0 %v3077_v49  ;;  %9186 = vmatprep.subr.bf16.mxu1 %v13386_v50 }
 0x4c1   : > { %13026 = vmatprep.subr.bf16.mxu0 %v13578_v51 }
 0x4c9   : > { %9179 = vmatmul.mubr.bf16.vlgmr.msra.gmra.mrb[0].mxu1 %v1887_v52 }
 0x4ca   : > { %13019 = vmatmul.mubr.bf16.vlgmr.msra.gmra.mrb[0].mxu0 %v3063_v54  ;;  %9187 = vmatpush1.bf16.xpose.msra.mxu1 %v13385_v53 }
 0x4cb   : > { %13027 = vmatpush1.bf16.xpose.msra.mxu0 %v13577_v55  ;;  %9218 = vmatprep.mubr.bf16.mxu1 %v1905_v56 }
 0x4cc   : > { %13058 = vmatprep.mubr.bf16.mxu0 %v3081_v57 }
 0x4d5   : > { %9219 = vmatmul.mubr.bf16.vlgmr.msra.gmra.mrb[0].mxu1 %v1903_v58 }
 0x4d6   : > { %13059 = vmatmul.mubr.bf16.vlgmr.msra.gmra.mrb[0].mxu0 %v3079_v59 }
 0x5a6   : > { %13069 = sbr.rel (%p13579_p4) target bundleno = 1453 (0x5ad), region = 44 }
 0x5a8   : > { %v9220_v60 = vpop.f32.mrb[0].mxu1 }
 0x5a9   : > { %v13060_v61 = vpop.f32.mrb[0].mxu0  ;;  %v9222_v62 = vpop.f32.mrb[1].mxu1 }
 0x5aa   : > { %v13589_v63 = vadd.f32 %v13060_v61, %v9220_v60  ;;  %v13062_v0 = vpop.f32.mrb[1].mxu0  ;;  %v9223_v1 = vpop.f32.mrb[2].mxu1 }
 0x5ab   : > { %v13063_v5 = vpop.f32.mrb[2].mxu0  ;;  %v9224_v2 = vpop.f32.mrb[3].mxu1 }
 0x5ac   : > { %v13064_v3 = vpop.f32.mrb[3].mxu0  ;;  %13071 = vst.msk [vmem:[#allocation7] sm:$0x3] (!%p13579_p4), %vm13070_vm0, %v13589_v63 }
 0x5ad PF: > { %p13580_p7 = scmp.le.s32.totalorder %s14611_s15, 0 }
 0x5ae   : > { %vm13078_vm1 = vcmask (!%p13580_p7), 74752  }
 0x5af   : > { %13075 = sbr.rel (%p13580_p7) target bundleno = 1463 (0x5b7), region = 48 }
 0x5b3   : > { %v13076_v4 = vld [vmem:[#allocation7] sm:$0x3] (!%p13580_p7) }
 0x5b4   : > { %v13077_v6 = vadd.f32 (!%p13580_p7), %v13589_v63, %v13076_v4 }
 0x5b6   : > { %13079 = vst.msk [vmem:[#allocation7] sm:$0x3] %vm13078_vm1, %v13077_v6 }
 0x5b7 PF: > { %p13080_p9 = scmp.eq.s32.totalorder %s14611_s15, 3 }
 0x5b8   : > { %v13582_v8 = vld [vmem:[#allocation5] ss:$0 sm:$0xff] (%p13080_p9)  ;;  %vm13095_vm2 = vcmask (%p13080_p9), 74752  }
 0x5b9   : > { %13085 = sbr.rel (!%p13080_p9) target bundleno = 1473 (0x5c1), region = 52 }
 0x5bd   : > { %v13086_v7 = vld [vmem:[#allocation7] sm:$0x3] (%p13080_p9) }
 0x5be   : > { %v13094_v9 = vadd.f32 (%p13080_p9), %v13582_v8, %v13086_v7 }
 0x5c0   : > { %13096 = vst.msk [vmem:[#allocation7] sm:$0x3] %vm13095_vm2, %v13094_v9 }
 0x5c1 PF: > { %p15526_p10 = scmp.eq.s32.totalorder %s13188_s18, 3  ;;  %s14627_s24 = smov [#allocation7]  }
 0x5c2   : > { %s13106_s7 = sshll.u32 %s14627_s24, 4  ;;  %s13107_s7 = int_to_ptr.vmem [resolvable:$true] %s13106_s7 }
 0x5c3   : > { %s14535_s28 = scalar_lea.vmem %s13107_s7, 32  ;;  %p14542_p13 = scmp.lt.s32.totalorder %s13107_s7, %s13107_s7 }
 0x5c4   : > { %p14536_p3 = scmp.ne.s32.totalorder %s13107_s7, %s14535_s28  ;;  %p14543_p1 = scmp.lt.s32.totalorder %s14535_s28, %s14535_s28 }
 0x5c6   : > { %p14537_p6 = pnand %p14536_p3, %p15526_p10  ;;  %p14544_p2 = por %p14543_p1, %p14542_p13 }
 0x5c8   : > { %p14538_p8 = pneg %p14537_p6 }
 0x5ca   : > { %p14545_p12 = pnand %p14544_p2, %p14538_p8 }
 0x5cc   : > { %14548 = shalt.err (!%p14545_p12)
}
 0x5cd   : > { %s14549_s18 = scalar_lea.hbm %s15573_s3, 32 }
 0x5ce   : > { %p14550_p0 = scmp.ne.s32.totalorder %s15573_s3, %s14549_s18  ;;  %p14555_p4 = scmp.lt.u32.totalorder %s14549_s18, %s15573_s3 }
 0x5d0   : > { %p14551_p5 = pnand %p14550_p0, %p15526_p10 }
 0x5d2   : > { %p14552_p11 = pneg %p14551_p5 }
 0x5d4   : > { %p14557_p7 = pnand %p14555_p4, %p14552_p11 }
 0x5d6   : > { %14560 = shalt.err (!%p14557_p7)
}
 0x5d7   : > { %14359 = dma.vmem_to_hbm [thread:$0]  (%p15526_p10), %s13107_s7, 32, %s15573_s3, [#allocation4]  }
 0x5d8   : > { %14594 = dma.done.wait (%p15526_p10), [#allocation4], 32  }
 0x5d9   : > { %14596 = vsyncadd (%p15526_p10), [#allocation4], 4294967264 }
 0x5da PF: > { %s18_s17 = sadd.s32 1, %s14619_s17   ;;  %s15589_s9 = smov %s15596_s12 }
 0x5db   : > { %p15_p9 = scmp.ge.s32.totalorder %s18_s17, 6   ;;  %s15590_s12 = smov %s14603_s13 }
 0x5dc   : > { %s15591_s13 = smov %s14607_s14  ;;  %s15592_s14 = smov %s14748_s6 }
 0x5dd   : > { %s15593_s15 = smov %s14615_s16  ;;  %s15594_s16 = smov %s15589_s9 }
 0x5de   :  { %17 = sbr.rel (!%p15_p9) target bundleno = 6 (0x6), region = 89 }
 0x5e5   :  { %13119 = vsyncpa [#allocation3], 1 }
 0x5e6   :  { %13121 = vsyncpa [#allocation3 + $0x1], 1 }
 0x5e7   :  { %13122 = vsyncpa [#allocation6], 1 }
 0x5e8   :  { %13123 = vsyncpa [#allocation4], 1 }
 0x5e9   :  { %13125 = vsyncpa [#allocation4 + $0x1], 1 }

</bundles_post_ra>
